<compile_context>
chip_gen: v6e
topology: v6e:2x2x1
jax: 0.10.0
libtpu: 0.0.40
codegen_flags: <defaults>
</compile_context>

<pallas_src>
import functools

import jax
import jax.numpy as jnp
from jax.experimental import pallas as pl
from jax.experimental.pallas import tpu as pltpu


def _im2col_3x3(xpad, H, W):
    """xpad: (H+2, W+2, C) f32 -> (H*W, 9*C) patch matrix (tap-major, cin-minor)."""
    taps = [xpad[dh:dh + H, dw:dw + W, :] for dh in range(3) for dw in range(3)]
    patch = jnp.concatenate(taps, axis=-1)            # (H, W, 9*C), built once
    return patch.reshape(H * W, patch.shape[-1])      # leading-dim merge only


def rcab_kernel(x_ref, w1_ref, b1_ref, w2_ref, b2_ref,
                wdu1_ref, bdu1_ref, wdu2_ref, bdu2_ref,
                o_ref, xpad_ref, *, H, W, C):
    f32 = jnp.float32
    x = x_ref[0].astype(f32)                          # (H, W, C)

    # ---- zero-padded activation scratch (reused for both convs) ------------
    xpad_ref[...] = jnp.zeros_like(xpad_ref)
    xpad_ref[1:H + 1, 1:W + 1, :] = x

    # ---- conv1 (3x3, SAME) + ReLU as one K=9C matmul ------------------------
    patch1 = _im2col_3x3(xpad_ref[...], H, W)         # (H*W, 9*C)
    h1 = jnp.dot(patch1, w1_ref[...], preferred_element_type=f32) + b1_ref[...]
    h1 = jnp.maximum(h1, 0.0)                         # (H*W, C)

    # ---- conv2 (3x3, SAME); reuse the padded scratch (border stays zero) ----
    xpad_ref[1:H + 1, 1:W + 1, :] = h1.reshape(H, W, C)
    patch2 = _im2col_3x3(xpad_ref[...], H, W)
    h2 = jnp.dot(patch2, w2_ref[...], preferred_element_type=f32) + b2_ref[...]

    # ---- channel attention: GAP -> 1x1 -> ReLU -> 1x1 -> sigmoid ------------
    pooled = jnp.mean(h2, axis=0, keepdims=True)      # (1, C)
    mid = jnp.maximum(
        jnp.dot(pooled, wdu1_ref[...], preferred_element_type=f32)
        + bdu1_ref[...], 0.0)                         # (1, C // reduction)
    scale = jax.nn.sigmoid(
        jnp.dot(mid, wdu2_ref[...], preferred_element_type=f32)
        + bdu2_ref[...])                              # (1, C)

    # ---- scale + residual add ------------------------------------------------
    out = h2 * scale + x.reshape(H * W, C)
    o_ref[0] = out.reshape(H, W, C).astype(o_ref.dtype)


def rcab_forward(x, params):
    B, H, W, C = x.shape
    Cm = params["w_du1"].shape[-1]
    # (kh, kw, Cin, Cout) -> (9*Cin, Cout): row index = (dh*3+dw)*Cin + cin,
    # matching the im2col tap/channel ordering built in the kernel.
    w1f = params["w_c1"].reshape(9 * C, C)
    w2f = params["w_c2"].reshape(9 * C, C)

    def full(shape):
        return pl.BlockSpec(shape, lambda i: (0,) * len(shape))

    kern = functools.partial(rcab_kernel, H=H, W=W, C=C)
    return pl.pallas_call(
        kern,
        out_shape=jax.ShapeDtypeStruct((B, H, W, C), x.dtype),
        grid=(B,),
        in_specs=[
            pl.BlockSpec((1, H, W, C), lambda i: (i, 0, 0, 0)),   # x
            full((9 * C, C)), full((1, C)),                        # conv1
            full((9 * C, C)), full((1, C)),                        # conv2
            full((C, Cm)), full((1, Cm)),                          # squeeze
            full((Cm, C)), full((1, C)),                           # excite
        ],
        out_specs=pl.BlockSpec((1, H, W, C), lambda i: (i, 0, 0, 0)),
        scratch_shapes=[pltpu.VMEM((H + 2, W + 2, C), jnp.float32)],
        compiler_params=pltpu.CompilerParams(
            dimension_semantics=("parallel",)),
    )(x, w1f, params["b_c1"], w2f, params["b_c2"],
      params["w_du1"], params["b_du1"], params["w_du2"], params["b_du2"])


# ----------------------------------------------------------------------------
# Pure-JAX reference for correctness checking.
# ----------------------------------------------------------------------------
def rcab_reference(x, params):
    def conv(h, w, b):
        y = jax.lax.conv_general_dilated(
            h, w, (1, 1), "SAME",
            dimension_numbers=("NHWC", "HWIO", "NHWC"))
        return y + b.reshape(1, 1, 1, -1)

    h1 = jax.nn.relu(conv(x, params["w_c1"], params["b_c1"]))
    h2 = conv(h1, params["w_c2"], params["b_c2"])
    pooled = jnp.mean(h2, axis=(1, 2))                      # (B, C)
    mid = jax.nn.relu(pooled @ params["w_du1"] + params["b_du1"])
    scale = jax.nn.sigmoid(mid @ params["w_du2"] + params["b_du2"])
    return h2 * scale[:, None, None, :] + x


if __name__ == "__main__":
    # Module hyper-params (chosen so channel // reduction >= 1)
    n_feat, reduction = 32, 16
    B, H, W = 2, 16, 16
    c_mid = n_feat // reduction

    key = jax.random.PRNGKey(0)
    ks = jax.random.split(key, 9)
    sc = 0.1
    params = {
        # two 3x3 convs, HWIO weights
        "w_c1": sc * jax.random.normal(ks[0], (3, 3, n_feat, n_feat), jnp.float32),
        "b_c1": sc * jax.random.normal(ks[1], (1, n_feat), jnp.float32),
        "w_c2": sc * jax.random.normal(ks[2], (3, 3, n_feat, n_feat), jnp.float32),
        "b_c2": sc * jax.random.normal(ks[3], (1, n_feat), jnp.float32),
        # CALayer squeeze/excite 1x1 convs as dense matrices
        "w_du1": sc * jax.random.normal(ks[4], (n_feat, c_mid), jnp.float32),
        "b_du1": sc * jax.random.normal(ks[5], (1, c_mid), jnp.float32),
        "w_du2": sc * jax.random.normal(ks[6], (c_mid, n_feat), jnp.float32),
        "b_du2": sc * jax.random.normal(ks[7], (1, n_feat), jnp.float32),
    }

    x = jax.random.normal(ks[8], (B, H, W, n_feat), jnp.float32)  # NHWC input

    out = jax.block_until_ready(rcab_forward(x, params))
    ref = jax.block_until_ready(rcab_reference(x, params))

    assert out.shape == (B, H, W, n_feat)
    assert jnp.max(jnp.abs(out - ref)) < 1e-4, "mismatch vs. JAX reference"

    print("KERNEL_OK")
</pallas_src>

<mosaic_0001>
module attributes {stable_mosaic.version = 11 : i64} {
  func.func @rcab_kernel(%arg0: i32, %arg1: memref<1x16x16x32xf32, #tpu.memory_space<vmem>>, %arg2: memref<288x32xf32, #tpu.memory_space<vmem>>, %arg3: memref<1x32xf32, #tpu.memory_space<vmem>>, %arg4: memref<288x32xf32, #tpu.memory_space<vmem>>, %arg5: memref<1x32xf32, #tpu.memory_space<vmem>>, %arg6: memref<32x2xf32, #tpu.memory_space<vmem>>, %arg7: memref<1x2xf32, #tpu.memory_space<vmem>>, %arg8: memref<2x32xf32, #tpu.memory_space<vmem>>, %arg9: memref<1x32xf32, #tpu.memory_space<vmem>>, %arg10: memref<1x16x16x32xf32, #tpu.memory_space<vmem>>, %arg11: memref<18x18x32xf32, #tpu.memory_space<vmem>>) attributes {dimension_semantics = [#tpu.dimension_semantics<parallel>], iteration_bounds = array<i64: 2>, scalar_prefetch = 0 : i64, scratch_operands = 1 : i64, tpu.core_type = #tpu.core_type<tc>, window_params = [{transform_indices = @transform_0, window_bounds = array<i64: 1, 16, 16, 32>}, {pipeline_mode = #tpu.pipeline_mode<synchronous>, transform_indices = @transform_1, window_bounds = array<i64: 288, 32>}, {pipeline_mode = #tpu.pipeline_mode<synchronous>, transform_indices = @transform_2, window_bounds = array<i64: 1, 32>}, {pipeline_mode = #tpu.pipeline_mode<synchronous>, transform_indices = @transform_3, window_bounds = array<i64: 288, 32>}, {pipeline_mode = #tpu.pipeline_mode<synchronous>, transform_indices = @transform_4, window_bounds = array<i64: 1, 32>}, {pipeline_mode = #tpu.pipeline_mode<synchronous>, transform_indices = @transform_5, window_bounds = array<i64: 32, 2>}, {pipeline_mode = #tpu.pipeline_mode<synchronous>, transform_indices = @transform_6, window_bounds = array<i64: 1, 2>}, {pipeline_mode = #tpu.pipeline_mode<synchronous>, transform_indices = @transform_7, window_bounds = array<i64: 2, 32>}, {pipeline_mode = #tpu.pipeline_mode<synchronous>, transform_indices = @transform_8, window_bounds = array<i64: 1, 32>}, {transform_indices = @transform_9, window_bounds = array<i64: 1, 16, 16, 32>}]} {
    %c0 = arith.constant 0 : index
    %c0_0 = arith.constant 0 : index
    %c0_1 = arith.constant 0 : index
    %c0_2 = arith.constant 0 : index
    %0 = vector.load %arg1[%c0, %c0_0, %c0_1, %c0_2] : memref<1x16x16x32xf32, #tpu.memory_space<vmem>>, vector<1x16x16x32xf32>
    %1 = vector.shape_cast %0 : vector<1x16x16x32xf32> to vector<16x16x32xf32>
    %cst = arith.constant 0.000000e+00 : f32
    %2 = vector.broadcast %cst : f32 to vector<18x18x32xf32>
    %c0_3 = arith.constant 0 : index
    %c0_4 = arith.constant 0 : index
    %c0_5 = arith.constant 0 : index
    %3 = vector.load %arg11[%c0_3, %c0_4, %c0_5] : memref<18x18x32xf32, #tpu.memory_space<vmem>>, vector<18x18x32xf32>
    tpu.vector_store %arg11[%c0_3, %c0_4, %c0_5], %2 {strides = array<i32>} : memref<18x18x32xf32, #tpu.memory_space<vmem>>, vector<18x18x32xf32>,
    %c1 = arith.constant 1 : index
    %c1_6 = arith.constant 1 : index
    %c0_7 = arith.constant 0 : index
    %4 = vector.load %arg11[%c1, %c1_6, %c0_7] : memref<18x18x32xf32, #tpu.memory_space<vmem>>, vector<16x16x32xf32>
    tpu.vector_store %arg11[%c1, %c1_6, %c0_7], %1 {strides = array<i32>} : memref<18x18x32xf32, #tpu.memory_space<vmem>>, vector<16x16x32xf32>,
    %c0_8 = arith.constant 0 : index
    %c0_9 = arith.constant 0 : index
    %c0_10 = arith.constant 0 : index
    %5 = vector.load %arg11[%c0_8, %c0_9, %c0_10] : memref<18x18x32xf32, #tpu.memory_space<vmem>>, vector<18x18x32xf32>
    %6 = vector.extract_strided_slice %5 {offsets = [0, 0, 0], sizes = [16, 16, 32], strides = [1, 1, 1]} : vector<18x18x32xf32> to vector<16x16x32xf32>
    %7 = vector.extract_strided_slice %5 {offsets = [0, 1, 0], sizes = [16, 16, 32], strides = [1, 1, 1]} : vector<18x18x32xf32> to vector<16x16x32xf32>
    %8 = vector.extract_strided_slice %5 {offsets = [0, 2, 0], sizes = [16, 16, 32], strides = [1, 1, 1]} : vector<18x18x32xf32> to vector<16x16x32xf32>
    %9 = vector.extract_strided_slice %5 {offsets = [1, 0, 0], sizes = [16, 16, 32], strides = [1, 1, 1]} : vector<18x18x32xf32> to vector<16x16x32xf32>
    %10 = vector.extract_strided_slice %5 {offsets = [1, 1, 0], sizes = [16, 16, 32], strides = [1, 1, 1]} : vector<18x18x32xf32> to vector<16x16x32xf32>
    %11 = vector.extract_strided_slice %5 {offsets = [1, 2, 0], sizes = [16, 16, 32], strides = [1, 1, 1]} : vector<18x18x32xf32> to vector<16x16x32xf32>
    %12 = vector.extract_strided_slice %5 {offsets = [2, 0, 0], sizes = [16, 16, 32], strides = [1, 1, 1]} : vector<18x18x32xf32> to vector<16x16x32xf32>
    %13 = vector.extract_strided_slice %5 {offsets = [2, 1, 0], sizes = [16, 16, 32], strides = [1, 1, 1]} : vector<18x18x32xf32> to vector<16x16x32xf32>
    %14 = vector.extract_strided_slice %5 {offsets = [2, 2, 0], sizes = [16, 16, 32], strides = [1, 1, 1]} : vector<18x18x32xf32> to vector<16x16x32xf32>
    %15 = tpu.concatenate %6, %7, %8, %9, %10, %11, %12, %13, %14 in 2 : vector<16x16x32xf32>, vector<16x16x32xf32>, vector<16x16x32xf32>, vector<16x16x32xf32>, vector<16x16x32xf32>, vector<16x16x32xf32>, vector<16x16x32xf32>, vector<16x16x32xf32>, vector<16x16x32xf32> -> vector<16x16x288xf32>
    %16 = vector.shape_cast %15 : vector<16x16x288xf32> to vector<256x288xf32>
    %c0_11 = arith.constant 0 : index
    %c0_12 = arith.constant 0 : index
    %17 = vector.load %arg2[%c0_11, %c0_12] : memref<288x32xf32, #tpu.memory_space<vmem>>, vector<288x32xf32>
    %cst_13 = arith.constant dense<0.000000e+00> : vector<256x32xf32>
    %18 = tpu.matmul %16, %17, %cst_13 {dimension_numbers = #tpu.dot_dimension_numbers<[1], [0], [0], [1], [0, 0, 1, 1], [], []>} : vector<256x288xf32>, vector<288x32xf32>, vector<256x32xf32> -> vector<256x32xf32>
    %c0_14 = arith.constant 0 : index
    %c0_15 = arith.constant 0 : index
    %19 = vector.load %arg3[%c0_14, %c0_15] : memref<1x32xf32, #tpu.memory_space<vmem>>, vector<1x32xf32>
    %20 = vector.broadcast %19 : vector<1x32xf32> to vector<256x32xf32>
    %21 = arith.addf %18, %20 : vector<256x32xf32>
    %cst_16 = arith.constant 0.000000e+00 : f32
    %22 = vector.broadcast %cst_16 : f32 to vector<256x32xf32>
    %23 = arith.maximumf %21, %22 : vector<256x32xf32>
    %24 = vector.shape_cast %23 : vector<256x32xf32> to vector<16x16x32xf32>
    %c1_17 = arith.constant 1 : index
    %c1_18 = arith.constant 1 : index
    %c0_19 = arith.constant 0 : index
    %25 = vector.load %arg11[%c1_17, %c1_18, %c0_19] : memref<18x18x32xf32, #tpu.memory_space<vmem>>, vector<16x16x32xf32>
    tpu.vector_store %arg11[%c1_17, %c1_18, %c0_19], %24 {strides = array<i32>} : memref<18x18x32xf32, #tpu.memory_space<vmem>>, vector<16x16x32xf32>,
    %c0_20 = arith.constant 0 : index
    %c0_21 = arith.constant 0 : index
    %c0_22 = arith.constant 0 : index
    %26 = vector.load %arg11[%c0_20, %c0_21, %c0_22] : memref<18x18x32xf32, #tpu.memory_space<vmem>>, vector<18x18x32xf32>
    %27 = vector.extract_strided_slice %26 {offsets = [0, 0, 0], sizes = [16, 16, 32], strides = [1, 1, 1]} : vector<18x18x32xf32> to vector<16x16x32xf32>
    %28 = vector.extract_strided_slice %26 {offsets = [0, 1, 0], sizes = [16, 16, 32], strides = [1, 1, 1]} : vector<18x18x32xf32> to vector<16x16x32xf32>
    %29 = vector.extract_strided_slice %26 {offsets = [0, 2, 0], sizes = [16, 16, 32], strides = [1, 1, 1]} : vector<18x18x32xf32> to vector<16x16x32xf32>
    %30 = vector.extract_strided_slice %26 {offsets = [1, 0, 0], sizes = [16, 16, 32], strides = [1, 1, 1]} : vector<18x18x32xf32> to vector<16x16x32xf32>
    %31 = vector.extract_strided_slice %26 {offsets = [1, 1, 0], sizes = [16, 16, 32], strides = [1, 1, 1]} : vector<18x18x32xf32> to vector<16x16x32xf32>
    %32 = vector.extract_strided_slice %26 {offsets = [1, 2, 0], sizes = [16, 16, 32], strides = [1, 1, 1]} : vector<18x18x32xf32> to vector<16x16x32xf32>
    %33 = vector.extract_strided_slice %26 {offsets = [2, 0, 0], sizes = [16, 16, 32], strides = [1, 1, 1]} : vector<18x18x32xf32> to vector<16x16x32xf32>
    %34 = vector.extract_strided_slice %26 {offsets = [2, 1, 0], sizes = [16, 16, 32], strides = [1, 1, 1]} : vector<18x18x32xf32> to vector<16x16x32xf32>
    %35 = vector.extract_strided_slice %26 {offsets = [2, 2, 0], sizes = [16, 16, 32], strides = [1, 1, 1]} : vector<18x18x32xf32> to vector<16x16x32xf32>
    %36 = tpu.concatenate %27, %28, %29, %30, %31, %32, %33, %34, %35 in 2 : vector<16x16x32xf32>, vector<16x16x32xf32>, vector<16x16x32xf32>, vector<16x16x32xf32>, vector<16x16x32xf32>, vector<16x16x32xf32>, vector<16x16x32xf32>, vector<16x16x32xf32>, vector<16x16x32xf32> -> vector<16x16x288xf32>
    %37 = vector.shape_cast %36 : vector<16x16x288xf32> to vector<256x288xf32>
    %c0_23 = arith.constant 0 : index
    %c0_24 = arith.constant 0 : index
    %38 = vector.load %arg4[%c0_23, %c0_24] : memref<288x32xf32, #tpu.memory_space<vmem>>, vector<288x32xf32>
    %cst_25 = arith.constant dense<0.000000e+00> : vector<256x32xf32>
    %39 = tpu.matmul %37, %38, %cst_25 {dimension_numbers = #tpu.dot_dimension_numbers<[1], [0], [0], [1], [0, 0, 1, 1], [], []>} : vector<256x288xf32>, vector<288x32xf32>, vector<256x32xf32> -> vector<256x32xf32>
    %c0_26 = arith.constant 0 : index
    %c0_27 = arith.constant 0 : index
    %40 = vector.load %arg5[%c0_26, %c0_27] : memref<1x32xf32, #tpu.memory_space<vmem>>, vector<1x32xf32>
    %41 = vector.broadcast %40 : vector<1x32xf32> to vector<256x32xf32>
    %42 = arith.addf %39, %41 : vector<256x32xf32>
    %cst_28 = arith.constant dense<0.000000e+00> : vector<32xf32>
    %43 = vector.multi_reduction <add>, %42, %cst_28 [0] : vector<256x32xf32> to vector<32xf32>
    %44 = vector.shape_cast %43 : vector<32xf32> to vector<1x32xf32>
    %cst_29 = arith.constant 2.560000e+02 : f32
    %45 = vector.broadcast %cst_29 : f32 to vector<1x32xf32>
    %46 = arith.divf %44, %45 : vector<1x32xf32>
    %c0_30 = arith.constant 0 : index
    %c0_31 = arith.constant 0 : index
    %47 = vector.load %arg6[%c0_30, %c0_31] : memref<32x2xf32, #tpu.memory_space<vmem>>, vector<32x2xf32>
    %cst_32 = arith.constant dense<0.000000e+00> : vector<1x2xf32>
    %48 = tpu.matmul %46, %47, %cst_32 {dimension_numbers = #tpu.dot_dimension_numbers<[1], [0], [0], [1], [0, 0, 1, 1], [], []>} : vector<1x32xf32>, vector<32x2xf32>, vector<1x2xf32> -> vector<1x2xf32>
    %c0_33 = arith.constant 0 : index
    %c0_34 = arith.constant 0 : index
    %49 = vector.load %arg7[%c0_33, %c0_34] : memref<1x2xf32, #tpu.memory_space<vmem>>, vector<1x2xf32>
    %50 = arith.addf %48, %49 : vector<1x2xf32>
    %cst_35 = arith.constant 0.000000e+00 : f32
    %51 = vector.broadcast %cst_35 : f32 to vector<1x2xf32>
    %52 = arith.maximumf %50, %51 : vector<1x2xf32>
    %c0_36 = arith.constant 0 : index
    %c0_37 = arith.constant 0 : index
    %53 = vector.load %arg8[%c0_36, %c0_37] : memref<2x32xf32, #tpu.memory_space<vmem>>, vector<2x32xf32>
    %cst_38 = arith.constant dense<0.000000e+00> : vector<1x32xf32>
    %54 = tpu.matmul %52, %53, %cst_38 {dimension_numbers = #tpu.dot_dimension_numbers<[1], [0], [0], [1], [0, 0, 1, 1], [], []>} : vector<1x2xf32>, vector<2x32xf32>, vector<1x32xf32> -> vector<1x32xf32>
    %c0_39 = arith.constant 0 : index
    %c0_40 = arith.constant 0 : index
    %55 = vector.load %arg9[%c0_39, %c0_40] : memref<1x32xf32, #tpu.memory_space<vmem>>, vector<1x32xf32>
    %56 = arith.addf %54, %55 : vector<1x32xf32>
    %57 = arith.negf %56 : vector<1x32xf32>
    %58 = math.exp %57 : vector<1x32xf32>
    %cst_41 = arith.constant 1.000000e+00 : f32
    %59 = vector.broadcast %cst_41 : f32 to vector<1x32xf32>
    %60 = arith.addf %59, %58 : vector<1x32xf32>
    %61 = arith.divf %59, %60 : vector<1x32xf32>
    %62 = vector.broadcast %61 : vector<1x32xf32> to vector<256x32xf32>
    %63 = arith.mulf %42, %62 : vector<256x32xf32>
    %64 = vector.shape_cast %1 : vector<16x16x32xf32> to vector<256x32xf32>
    %65 = arith.addf %63, %64 : vector<256x32xf32>
    %66 = vector.shape_cast %65 : vector<256x32xf32> to vector<16x16x32xf32>
    %c0_42 = arith.constant 0 : index
    %c0_43 = arith.constant 0 : index
    %c0_44 = arith.constant 0 : index
    %c0_45 = arith.constant 0 : index
    %67 = vector.load %arg10[%c0_42, %c0_43, %c0_44, %c0_45] : memref<1x16x16x32xf32, #tpu.memory_space<vmem>>, vector<1x16x16x32xf32>
    %68 = vector.shape_cast %67 : vector<1x16x16x32xf32> to vector<16x16x32xf32>
    %69 = vector.shape_cast %66 : vector<16x16x32xf32> to vector<1x16x16x32xf32>
    tpu.vector_store %arg10[%c0_42, %c0_43, %c0_44, %c0_45], %69 {strides = array<i32>} : memref<1x16x16x32xf32, #tpu.memory_space<vmem>>, vector<1x16x16x32xf32>,
    return
  }
  func.func @transform_0(%arg0: i32) -> (i32, i32, i32, i32) {
    %c0_i32 = arith.constant 0 : i32
    %c0_i32_0 = arith.constant 0 : i32
    %c0_i32_1 = arith.constant 0 : i32
    %c0_i32_2 = arith.constant 0 : i32
    return %arg0, %c0_i32, %c0_i32_0, %c0_i32_1 : i32, i32, i32, i32
  }
  func.func @transform_1(%arg0: i32) -> (i32, i32) {
    %c0_i32 = arith.constant 0 : i32
    %c0_i32_0 = arith.constant 0 : i32
    %c0_i32_1 = arith.constant 0 : i32
    return %c0_i32, %c0_i32_0 : i32, i32
  }
  func.func @transform_2(%arg0: i32) -> (i32, i32) {
    %c0_i32 = arith.constant 0 : i32
    %c0_i32_0 = arith.constant 0 : i32
    %c0_i32_1 = arith.constant 0 : i32
    return %c0_i32, %c0_i32_0 : i32, i32
  }
  func.func @transform_3(%arg0: i32) -> (i32, i32) {
    %c0_i32 = arith.constant 0 : i32
    %c0_i32_0 = arith.constant 0 : i32
    %c0_i32_1 = arith.constant 0 : i32
    return %c0_i32, %c0_i32_0 : i32, i32
  }
  func.func @transform_4(%arg0: i32) -> (i32, i32) {
    %c0_i32 = arith.constant 0 : i32
    %c0_i32_0 = arith.constant 0 : i32
    %c0_i32_1 = arith.constant 0 : i32
    return %c0_i32, %c0_i32_0 : i32, i32
  }
  func.func @transform_5(%arg0: i32) -> (i32, i32) {
    %c0_i32 = arith.constant 0 : i32
    %c0_i32_0 = arith.constant 0 : i32
    %c0_i32_1 = arith.constant 0 : i32
    return %c0_i32, %c0_i32_0 : i32, i32
  }
  func.func @transform_6(%arg0: i32) -> (i32, i32) {
    %c0_i32 = arith.constant 0 : i32
    %c0_i32_0 = arith.constant 0 : i32
    %c0_i32_1 = arith.constant 0 : i32
    return %c0_i32, %c0_i32_0 : i32, i32
  }
  func.func @transform_7(%arg0: i32) -> (i32, i32) {
    %c0_i32 = arith.constant 0 : i32
    %c0_i32_0 = arith.constant 0 : i32
    %c0_i32_1 = arith.constant 0 : i32
    return %c0_i32, %c0_i32_0 : i32, i32
  }
  func.func @transform_8(%arg0: i32) -> (i32, i32) {
    %c0_i32 = arith.constant 0 : i32
    %c0_i32_0 = arith.constant 0 : i32
    %c0_i32_1 = arith.constant 0 : i32
    return %c0_i32, %c0_i32_0 : i32, i32
  }
  func.func @transform_9(%arg0: i32) -> (i32, i32, i32, i32) {
    %c0_i32 = arith.constant 0 : i32
    %c0_i32_0 = arith.constant 0 : i32
    %c0_i32_1 = arith.constant 0 : i32
    %c0_i32_2 = arith.constant 0 : i32
    return %arg0, %c0_i32, %c0_i32_0, %c0_i32_1 : i32, i32, i32, i32
  }
}

</mosaic_0001>

<bundles_post_ra>
// kernel: tpu_custom_call.1
= control target key start
LH: loop header
LB: loop body
LE: loop exit
PB: predicated region body
PF: predicated region fallthrough
CT: control target
= control target key end

     0   :  { %14 = vsyncpa [#allocation4], 0  ;;  %s8841_s0 = inlined_call_operand.vmem [shape: f32[2,16,16,32], index: 0, kind: input, shape index: {}]   ;;  %s8842_s1 = inlined_call_operand.vmem [shape: f32[288,32], index: 1, kind: input, shape index: {}]   ;;  %s8843_s2 = inlined_call_operand.vmem [shape: f32[1,32], index: 2, kind: input, shape index: {}]   ;;  %s8844_s3 = inlined_call_operand.vmem [shape: f32[288,32], index: 3, kind: input, shape index: {}]   ;;  %s8845_s4 = inlined_call_operand.vmem [shape: f32[1,32], index: 4, kind: input, shape index: {}]   ;;  %s8846_s5 = inlined_call_operand.vmem [shape: f32[32,2], index: 5, kind: input, shape index: {}]   ;;  %s8847_s6 = inlined_call_operand.vmem [shape: f32[1,2], index: 6, kind: input, shape index: {}]   ;;  %s8848_s7 = inlined_call_operand.vmem [shape: f32[2,32], index: 7, kind: input, shape index: {}]   ;;  %s8849_s8 = inlined_call_operand.vmem [shape: f32[1,32], index: 8, kind: input, shape index: {}]   ;;  %s8850_s9 = inlined_call_operand.hbm [shape: f32[2,16,16,32], index: 9, kind: output, shape index: {}]  }
   0x1   :  { %16 = vsyncpa [#allocation4 + $0x1], 0  ;;  %s5716_s30 = smov 0   ;;  %s5718_s10 = smov 0  }
   0x2   :  { %s5720_s11 = smov 0   ;;  %s5722_s12 = smov 0  }
   0x3 LB: > { %s5737_s13 = sadd.s32 4294967295, %s5656_s12   ;;  %s4222_s14 = sadd.s32 4294967294, %s5656_s12   ;;  %s5656_s12 = sphi %s5722_s12, %s9006_s12   ;;  %s5652_s11 = sphi %s5720_s11, %s9005_s11   ;;  %s5648_s10 = sphi %s5718_s10, %s9004_s10   ;;  %s5644_s30 = sphi %s5716_s30, %s9003_s30  }
   0x4   : > { %s5741_s15 = sadd.s32 1, %s5656_s12   ;;  %s223_s16 = sadd.s32 1, %s5652_s11 }
   0x5   : > { %s220_s17 = ssub.s32 %s5656_s12, %s5741_s15  ;;  %p233_p0 = scmp.ne.s32.totalorder %s5652_s11, %s5648_s10 }
   0x6   : > { %p221_p1 = scmp.eq.s32.totalorder %s220_s17, 0  ;;  %p234_p2 = scmp.eq.s32.totalorder %s5737_s13, 1 }
   0x7   : > { %p239_p3 = scmp.ne.s32.totalorder %s5648_s10, %s5644_s30  ;;  %p240_p4 = scmp.eq.s32.totalorder %s4222_s14, 1 }
   0x8   : > { %s5752_s18 = scalar_select %p221_p1, %s5652_s11, %s223_s16  }
   0x9   : > { %p5754_p5 = por %p234_p2, %p233_p0  ;;  %p5758_p6 = por %p240_p4, %p239_p3 }
   0xa   : > { %p4225_p7 = scmp.ge.s32.totalorder %s5656_s12, 1  ;;  %p290_p8 = scmp.lt.s32.totalorder %s5656_s12, 3 }
   0xc   : > { %p291_p9 = pnand %p4225_p7, %p290_p8 }
   0xe   : > { %294 = sbr.rel (%p291_p9) target bundleno = 1422 (0x58e), region = 56 }
  0x13   : > { %p326_p10 = scmp.lt.s32.totalorder %s5737_s13, 1  ;;  %vm363_vm0 = vcmask 261120   ;;  %vm366_vm1 = vcmask 254976   ;;  %v8852_v0 = vmov 0.0   ;;  %v1559_v1 = vld [vmem:[%s8842_s1 + $0x78] sm:$0xff]  ;;  %v1558_v2 = vld [vmem:[%s8842_s1 + $0x70] sm:$0xff] }
  0x14   : > { %364 = vst.msk [vmem:[#allocation2] sm:$0xff] %vm363_vm0, %v8852_v0  ;;  %365 = vst.msk [vmem:[#allocation2 + $0x8] sm:$0xff] %vm363_vm0, %v8852_v0  ;;  %1651 = vmatprep.subr.mxu0 %v8852_v0  ;;  %v1557_v3 = vld [vmem:[%s8842_s1 + $0x68] sm:$0xff]  ;;  %v1556_v4 = vld [vmem:[%s8842_s1 + $0x60] sm:$0xff]  ;;  %vm731_vm2 = vcmask 1045504   ;;  %vm554_vm3 = vcmask 1046528  }
  0x15   : > { %371 = vst.msk [vmem:[#allocation2 + $0x30] sm:$0xff] %vm363_vm0, %v8852_v0  ;;  %372 = vst.msk [vmem:[#allocation2 + $0x38] sm:$0xff] %vm363_vm0, %v8852_v0  ;;  %s327_s25 = scalar_select %p326_p10, %s5737_s13, 1  ;;  %1652 = vmatpush1.msra.mxu0 %v1559_v1  ;;  %v1555_v5 = vld [vmem:[%s8842_s1 + $0x58] sm:$0xff]  ;;  %v1554_v12 = vld [vmem:[%s8842_s1 + $0x50] sm:$0xff]  ;;  %vm1382_vm4 = vcmask 523264  }
  0x16   : > { %373 = vst.msk [vmem:[#allocation2 + $0x40] sm:$0x3] %vm366_vm1, %v8852_v0  ;;  %367 = vst.msk [vmem:[#allocation2 + $0x10] sm:$0x3] %vm366_vm1, %v8852_v0  ;;  %1653 = vmatprep.subr.mxu0 %v8852_v0  ;;  %v1553_v21 = vld [vmem:[%s8842_s1 + $0x48] sm:$0xff]  ;;  %v1552_v36 = vld [vmem:[%s8842_s1 + $0x40] sm:$0xff] }
  0x17   : > { %368 = vst.msk [vmem:[#allocation2 + $0x18] sm:$0xff] %vm363_vm0, %v8852_v0  ;;  %369 = vst.msk [vmem:[#allocation2 + $0x20] sm:$0xff] %vm363_vm0, %v8852_v0  ;;  %s4304_s28 = sshll.u32 %s327_s25, 8  ;;  %1654 = vmatpush1.msra.mxu0 %v1558_v2  ;;  %v1551_v42 = vld [vmem:[%s8842_s1 + $0x38] sm:$0xff]  ;;  %s5659_s21 = smov 64   ;;  %v1550_v59 = vld [vmem:[%s8842_s1 + $0x30] sm:$0xff] }
  0x18   : > { %370 = vst.msk [vmem:[#allocation2 + $0x28] sm:$0x3] %vm366_vm1, %v8852_v0  ;;  %376 = vst.msk [vmem:[#allocation2 + $0x58] sm:$0x3] %vm366_vm1, %v8852_v0  ;;  %s5890_s16 = scalar_lea.vmem %s8841_s0, %s4304_s28  ;;  %1655 = vmatprep.subr.mxu0 %v8852_v0  ;;  %s5660_s26 = smov 96   ;;  %vm1415_vm5 = vcmask 785408  }
  0x19   : > { %374 = vst.msk [vmem:[#allocation2 + $0x48] sm:$0xff] %vm363_vm0, %v8852_v0  ;;  %375 = vst.msk [vmem:[#allocation2 + $0x50] sm:$0xff] %vm363_vm0, %v8852_v0  ;;  %v5900_v6 = vld [vmem:[%s5890_s16 + $0x10] sm:$0xff]  ;;  %v5903_v7 = vld [vmem:[%s5890_s16 + $0x18] sm:$0xff]  ;;  %1656 = vmatpush1.msra.mxu0 %v1557_v3  ;;  %s5661_s29 = smov 32   ;;  %vm5662_vm6 = vmmov 0  }
  0x1a   : > { %377 = vst.msk [vmem:[#allocation2 + $0x60] sm:$0xff] %vm363_vm0, %v8852_v0  ;;  %378 = vst.msk [vmem:[#allocation2 + $0x68] sm:$0xff] %vm363_vm0, %v8852_v0  ;;  %v5906_v8 = vld [vmem:[%s5890_s16] sm:$0xff]  ;;  %v5915_v9 = vld [vmem:[%s5890_s16 + $0x8] sm:$0xff]  ;;  %1657 = vmatprep.subr.mxu0 %v8852_v0  ;;  %vm3966_vm7 = vcmask 1041408   ;;  %vm3962_vm8 = vcmask 15360  }
  0x1b   : > { %379 = vst.msk [vmem:[#allocation2 + $0x70] sm:$0x3] %vm366_vm1, %v8852_v0  ;;  %382 = vst.msk [vmem:[#allocation2 + $0x88] sm:$0x3] %vm366_vm1, %v8852_v0  ;;  %v5918_v10 = vld [vmem:[%s5890_s16 + $0x20] sm:$0xff]  ;;  %v5921_v11 = vld [vmem:[%s5890_s16 + $0x28] sm:$0xff]  ;;  %1658 = vmatpush1.msra.mxu0 %v1556_v4 }
  0x1c   : > { %380 = vst.msk [vmem:[#allocation2 + $0x78] sm:$0xff] %vm363_vm0, %v8852_v0  ;;  %381 = vst.msk [vmem:[#allocation2 + $0x80] sm:$0xff] %vm363_vm0, %v8852_v0  ;;  %v452_v13 = vld [vmem:[#allocation2] sm:$0xff]  ;;  %v453_v14 = vld [vmem:[#allocation2 + $0x8] sm:$0xff]  ;;  %1659 = vmatprep.subr.mxu0 %v8852_v0  ;;  %s4305_s24 = sshll.u32 %s5737_s13, 12 }
  0x1d   : > { %383 = vst.msk [vmem:[#allocation2 + $0x90] sm:$0xff] %vm363_vm0, %v8852_v0  ;;  %384 = vst.msk [vmem:[#allocation2 + $0x98] sm:$0xff] %vm363_vm0, %v8852_v0  ;;  %v454_v15 = vld [vmem:[#allocation2 + $0x10] sm:$0x3]  ;;  %v732_v16 = vrot.slane %v452_v13, 2  ;;  %v733_v17 = vrot.slane %v453_v14, 2  ;;  %1660 = vmatpush1.msra.mxu0 %v1555_v5  ;;  %s8767_s28 = scalar_lea.hbm %s8850_s9, %s4305_s24 }
  0x1e   : > { %385 = vst.msk [vmem:[#allocation2 + $0xa0] sm:$0x3] %vm366_vm1, %v8852_v0  ;;  %388 = vst.msk [vmem:[#allocation2 + $0xb8] sm:$0x3] %vm366_vm1, %v8852_v0  ;;  %v735_v18 = vrot.slane %v454_v15, 2  ;;  %v5934_v19 = vld [vmem:[%s5890_s16 + $0x30] sm:$0xff]  ;;  %1661 = vmatprep.subr.mxu0 %v8852_v0 }
  0x1f   : > { %386 = vst.msk [vmem:[#allocation2 + $0xa8] sm:$0xff] %vm363_vm0, %v8852_v0  ;;  %387 = vst.msk [vmem:[#allocation2 + $0xb0] sm:$0xff] %vm363_vm0, %v8852_v0  ;;  %v5937_v20 = vld [vmem:[%s5890_s16 + $0x38] sm:$0xff]  ;;  %v556_v22 = vrot.slane %v453_v14, 1  ;;  %v558_v23 = vrot.slane %v454_v15, 1  ;;  %v555_v24 = vrot.slane %v452_v13, 1  ;;  %v734_v31 = vsel %vm731_vm2, %v732_v16, %v733_v17  ;;  %1662 = vmatpush1.msra.mxu0 %v1554_v12 }
  0x20   : > { %389 = vst.msk [vmem:[#allocation2 + $0xc0] sm:$0xff] %vm363_vm0, %v8852_v0  ;;  %390 = vst.msk [vmem:[#allocation2 + $0xc8] sm:$0xff] %vm363_vm0, %v8852_v0  ;;  %v5948_v25 = vld [vmem:[%s5890_s16 + $0x40] sm:$0xff]  ;;  %v5951_v26 = vld [vmem:[%s5890_s16 + $0x48] sm:$0xff]  ;;  %v736_v32 = vsel %vm731_vm2, %v733_v17, %v735_v18  ;;  %1663 = vmatprep.subr.mxu0 %v8852_v0 }
  0x21   : > { %391 = vst.msk [vmem:[#allocation2 + $0xd0] sm:$0x3] %vm366_vm1, %v8852_v0  ;;  %394 = vst.msk [vmem:[#allocation2 + $0xe8] sm:$0x3] %vm366_vm1, %v8852_v0  ;;  %v5954_v27 = vld [vmem:[%s5890_s16 + $0x50] sm:$0xff]  ;;  %v5961_v28 = vld [vmem:[%s5890_s16 + $0x58] sm:$0xff]  ;;  %v559_v40 = vsel %vm554_vm3, %v556_v22, %v558_v23  ;;  %v557_v41 = vsel %vm554_vm3, %v555_v24, %v556_v22  ;;  %1664 = vmatpush1.msra.mxu0 %v1553_v21 }
  0x22   : > { %392 = vst.msk [vmem:[#allocation2 + $0xd8] sm:$0xff] %vm363_vm0, %v8852_v0  ;;  %393 = vst.msk [vmem:[#allocation2 + $0xe0] sm:$0xff] %vm363_vm0, %v8852_v0  ;;  %v5966_v29 = vld [vmem:[%s5890_s16 + $0x60] sm:$0xff]  ;;  %v5969_v30 = vld [vmem:[%s5890_s16 + $0x68] sm:$0xff]  ;;  %1665 = vmatprep.subr.mxu0 %v8852_v0 }
  0x23   : > { %395 = vst.msk [vmem:[#allocation2 + $0xf0] sm:$0xff] %vm363_vm0, %v8852_v0  ;;  %396 = vst.msk [vmem:[#allocation2 + $0xf8] sm:$0xff] %vm363_vm0, %v8852_v0  ;;  %v5981_v33 = vld [vmem:[%s5890_s16 + $0x70] sm:$0xff]  ;;  %v5984_v34 = vld [vmem:[%s5890_s16 + $0x78] sm:$0xff]  ;;  %1666 = vmatpush1.msra.mxu0 %v1552_v36 }
  0x24   : > { %397 = vst.msk [vmem:[#allocation2 + $0x100] sm:$0x3] %vm366_vm1, %v8852_v0  ;;  %400 = vst.msk [vmem:[#allocation2 + $0x118] sm:$0x3] %vm366_vm1, %v8852_v0  ;;  %v5987_v35 = vld [vmem:[%s5890_s16 + $0x80] sm:$0xff]  ;;  %v5998_v37 = vld [vmem:[%s5890_s16 + $0x88] sm:$0xff]  ;;  %1667 = vmatprep.subr.mxu0 %v8852_v0 }
  0x25   : > { %398 = vst.msk [vmem:[#allocation2 + $0x108] sm:$0xff] %vm363_vm0, %v8852_v0  ;;  %399 = vst.msk [vmem:[#allocation2 + $0x110] sm:$0xff] %vm363_vm0, %v8852_v0  ;;  %1668 = vmatpush1.msra.mxu0 %v1551_v42  ;;  %v1549_v3 = vld [vmem:[%s8842_s1 + $0x28] sm:$0xff]  ;;  %v1548_v17 = vld [vmem:[%s8842_s1 + $0x20] sm:$0xff] }
  0x26   : > { %401 = vst.msk [vmem:[#allocation2 + $0x120] sm:$0xff] %vm363_vm0, %v8852_v0  ;;  %402 = vst.msk [vmem:[#allocation2 + $0x128] sm:$0xff] %vm363_vm0, %v8852_v0  ;;  %1669 = vmatprep.subr.mxu0 %v8852_v0  ;;  %v1547_v21 = vld [vmem:[%s8842_s1 + $0x18] sm:$0xff]  ;;  %v6087_v22 = vld [vmem:[%s5890_s16 + $0x90] sm:$0xff] }
  0x27   : > { %403 = vst.msk [vmem:[#allocation2 + $0x130] sm:$0x3] %vm366_vm1, %v8852_v0  ;;  %406 = vst.msk [vmem:[#allocation2 + $0x148] sm:$0x3] %vm366_vm1, %v8852_v0  ;;  %1670 = vmatpush1.msra.mxu0 %v1550_v59  ;;  %v6090_v23 = vld [vmem:[%s5890_s16 + $0x98] sm:$0xff]  ;;  %v6111_v42 = vld [vmem:[%s5890_s16 + $0xa0] sm:$0xff] }
  0x28   : > { %404 = vst.msk [vmem:[#allocation2 + $0x138] sm:$0xff] %vm363_vm0, %v8852_v0  ;;  %405 = vst.msk [vmem:[#allocation2 + $0x140] sm:$0xff] %vm363_vm0, %v8852_v0  ;;  %1671 = vmatprep.subr.mxu0 %v8852_v0  ;;  %v1578_v59 = vld [vmem:[%s8842_s1 + $0x110] sm:$0xff] }
  0x29   : > { %407 = vst.msk [vmem:[#allocation2 + $0x150] sm:$0xff] %vm363_vm0, %v8852_v0  ;;  %408 = vst.msk [vmem:[#allocation2 + $0x158] sm:$0xff] %vm363_vm0, %v8852_v0  ;;  %1672 = vmatpush1.msra.mxu0 %v1549_v3 }
  0x2a   : > { %409 = vst.msk [vmem:[#allocation2 + $0x160] sm:$0x3] %vm366_vm1, %v8852_v0  ;;  %412 = vst.msk [vmem:[#allocation2 + $0x178] sm:$0x3] %vm366_vm1, %v8852_v0  ;;  %1673 = vmatprep.subr.mxu0 %v8852_v0 }
  0x2b   : > { %410 = vst.msk [vmem:[#allocation2 + $0x168] sm:$0xff] %vm363_vm0, %v8852_v0  ;;  %411 = vst.msk [vmem:[#allocation2 + $0x170] sm:$0xff] %vm363_vm0, %v8852_v0  ;;  %1674 = vmatpush1.msra.mxu0 %v1548_v17 }
  0x2c   : > { %413 = vst.msk [vmem:[#allocation2 + $0x180] sm:$0xff] %vm363_vm0, %v8852_v0  ;;  %414 = vst.msk [vmem:[#allocation2 + $0x188] sm:$0xff] %vm363_vm0, %v8852_v0  ;;  %1675 = vmatprep.subr.mxu0 %v8852_v0 }
  0x2d   : > { %415 = vst.msk [vmem:[#allocation2 + $0x190] sm:$0x3] %vm366_vm1, %v8852_v0  ;;  %418 = vst.msk [vmem:[#allocation2 + $0x1a8] sm:$0x3] %vm366_vm1, %v8852_v0  ;;  %1676 = vmatpush1.msra.mxu0 %v1547_v21  ;;  %v6199_v21 = vld [vmem:[%s5890_s16 + $0xd8] sm:$0xff] }
  0x2e   : > { %416 = vst.msk [vmem:[#allocation2 + $0x198] sm:$0xff] %vm363_vm0, %v8852_v0  ;;  %417 = vst.msk [vmem:[#allocation2 + $0x1a0] sm:$0xff] %vm363_vm0, %v8852_v0  ;;  %1677 = vmatprep.subr.mxu0 %v8852_v0 }
  0x2f   : > { %8907 = vst [vmem:[#allocation6_spill] sm:$0xff] %v5900_v6  ;;  %8908 = vst [vmem:[#allocation7_spill] sm:$0xff] %v5903_v7 }
  0x30   : > { %8909 = vst [vmem:[#allocation8_spill] sm:$0xff] %v5906_v8  ;;  %422 = vst.msk [vmem:[#allocation2 + $0x31] sm:$0xff] %vm363_vm0, %v5900_v6 }
  0x31   : > { %423 = vst.msk [vmem:[#allocation2 + $0x39] sm:$0xff] %vm363_vm0, %v5903_v7  ;;  %420 = vst.msk [vmem:[#allocation2 + $0x19] sm:$0xff] %vm363_vm0, %v5906_v8 }
  0x32   : > { %8910 = vst [vmem:[#allocation9_spill] sm:$0xff] %v5915_v9  ;;  %8911 = vst [vmem:[#allocation10_spill] sm:$0xff] %v5918_v10 }
  0x33   : > { %8912 = vst [vmem:[#allocation11_spill] sm:$0xff] %v5921_v11  ;;  %421 = vst.msk [vmem:[#allocation2 + $0x21] sm:$0xff] %vm363_vm0, %v5915_v9 }
  0x34   : > { %424 = vst.msk [vmem:[#allocation2 + $0x49] sm:$0xff] %vm363_vm0, %v5918_v10  ;;  %425 = vst.msk [vmem:[#allocation2 + $0x51] sm:$0xff] %vm363_vm0, %v5921_v11 }
  0x35   : > { %8913 = vst [vmem:[#allocation12_spill] sm:$0xff] %v5934_v19  ;;  %8914 = vst [vmem:[#allocation13_spill] sm:$0xff] %v5937_v20 }
  0x36   : > { %426 = vst.msk [vmem:[#allocation2 + $0x61] sm:$0xff] %vm363_vm0, %v5934_v19  ;;  %427 = vst.msk [vmem:[#allocation2 + $0x69] sm:$0xff] %vm363_vm0, %v5937_v20 }
  0x37   : > { %8915 = vst [vmem:[#allocation14_spill] sm:$0xff] %v5948_v25  ;;  %8916 = vst [vmem:[#allocation15_spill] sm:$0xff] %v5951_v26  ;;  %v6002_v38 = vld [vmem:[#allocation2 + $0x30] sm:$0xff] }
  0x38   : > { %8917 = vst [vmem:[#allocation16_spill] sm:$0xff] %v5954_v27  ;;  %428 = vst.msk [vmem:[#allocation2 + $0x79] sm:$0xff] %vm363_vm0, %v5948_v25  ;;  %v6004_v39 = vld [vmem:[#allocation2 + $0x38] sm:$0xff]  ;;  %v4567_v43 = vpack.i.bf16 %v734_v31, %v6002_v38  ;;  %v565_v45 = vrot.slane %v6002_v38, 1  ;;  %v6027_v53 = vld [vmem:[#allocation2 + $0x40] sm:$0x3] }
  0x39   : > { %429 = vst.msk [vmem:[#allocation2 + $0x81] sm:$0xff] %vm363_vm0, %v5951_v26  ;;  %8918 = vst [vmem:[#allocation17_spill] sm:$0xff] %v5961_v28  ;;  %v6014_v44 = vld [vmem:[#allocation2 + $0x18] sm:$0xff]  ;;  %v566_v46 = vrot.slane %v6004_v39, 1  ;;  %v4572_v47 = vpack.i.bf16 %v736_v32, %v6004_v39  ;;  %v568_v56 = vrot.slane %v6027_v53, 1  ;;  %v742_v58 = vrot.slane %v6002_v38, 2 }
  0x3a   : > { %430 = vst.msk [vmem:[#allocation2 + $0x91] sm:$0xff] %vm363_vm0, %v5954_v27  ;;  %8919 = vst [vmem:[#allocation18_spill] sm:$0xff] %v5966_v29  ;;  %v6019_v48 = vld [vmem:[#allocation2 + $0x20] sm:$0xff]  ;;  %v6021_v49 = vld [vmem:[#allocation2 + $0x28] sm:$0x3]  ;;  %v737_v52 = vrot.slane %v6014_v44, 2  ;;  %4568 = vrot.lane.b32.xlu0 %v4567_v43, %s5659_s21 }
  0x3b   : > { %8920 = vst [vmem:[#allocation19_spill] sm:$0xff] %v5969_v30  ;;  %431 = vst.msk [vmem:[#allocation2 + $0x99] sm:$0xff] %vm363_vm0, %v5961_v28  ;;  %v738_v50 = vrot.slane %v6019_v48, 2  ;;  %v740_v51 = vrot.slane %v6021_v49, 2  ;;  %v560_v54 = vrot.slane %v6014_v44, 1  ;;  %v6032_v55 = vsel %vm554_vm3, %v565_v45, %v566_v46  ;;  %v6050_v1 = vld [vmem:[#allocation2 + $0x48] sm:$0xff] }
  0x3c   : > { %432 = vst.msk [vmem:[#allocation2 + $0xa9] sm:$0xff] %vm363_vm0, %v5966_v29  ;;  %433 = vst.msk [vmem:[#allocation2 + $0xb1] sm:$0xff] %vm363_vm0, %v5969_v30  ;;  %v561_v57 = vrot.slane %v6019_v48, 1  ;;  %v4582_v60 = vpack.i.bf16 %v6014_v44, %v6032_v55  ;;  %v743_v63 = vrot.slane %v6004_v39, 2  ;;  %v6052_v2 = vld [vmem:[#allocation2 + $0x50] sm:$0xff]  ;;  %v6063_v12 = vsel %vm554_vm3, %v566_v46, %v568_v56  ;;  %v6114_v43 = vld [vmem:[%s5890_s16 + $0xa8] sm:$0xff] }
  0x3d   : > { %8921 = vst [vmem:[#allocation20_spill] sm:$0xff] %v5981_v33  ;;  %8922 = vst [vmem:[#allocation21_spill] sm:$0xff] %v5984_v34  ;;  %v6044_v61 = vsel %vm731_vm2, %v738_v50, %v740_v51  ;;  %v6047_v62 = vsel %vm731_vm2, %v737_v52, %v738_v50  ;;  %v570_v15 = vrot.slane %v6050_v1, 1  ;;  %v571_v16 = vrot.slane %v6052_v2, 1  ;;  %v1545_v46 = vld [vmem:[%s8842_s1 + $0x8] sm:$0xff]  ;;  %v1579_v51 = vld [vmem:[%s8842_s1 + $0x118] sm:$0xff] }
  0x3e   : > { %8923 = vst [vmem:[#allocation22_spill] sm:$0xff] %v5987_v35  ;;  %434 = vst.msk [vmem:[#allocation2 + $0xc1] sm:$0xff] %vm363_vm0, %v5981_v33  ;;  %4583 = vrot.lane.b32.xlu1 %v4582_v60, %s5660_s26  ;;  %v4587_v4 = vpack.i.bf16 %v559_v40, %v6044_v61  ;;  %4573 = vrot.lane.b32.xlu0 %v4572_v47, %s5659_s21  ;;  %v4577_v5 = vpack.i.bf16 %v557_v41, %v6047_v62  ;;  %v563_v31 = vrot.slane %v6021_v49, 1  ;;  %v6104_v40 = vld [vmem:[#allocation2 + $0x58] sm:$0x3]  ;;  %v1546_v41 = vld [vmem:[%s8842_s1 + $0x10] sm:$0xff] }
  0x3f   : > { %435 = vst.msk [vmem:[#allocation2 + $0xc9] sm:$0xff] %vm363_vm0, %v5984_v34  ;;  %8924 = vst [vmem:[#allocation23_spill] sm:$0xff] %v5998_v37  ;;  %v6066_v13 = vsel %vm731_vm2, %v742_v58, %v743_v63  ;;  %v6070_v14 = vsel %vm554_vm3, %v560_v54, %v561_v57  ;;  %v4592_v18 = vpack.i.bf16 %v6019_v48, %v6063_v12  ;;  %v745_v32 = vrot.slane %v6027_v53, 2  ;;  %v6147_v54 = vld [vmem:[%s5890_s16 + $0xb0] sm:$0xff]  ;;  %v6150_v56 = vld [vmem:[%s5890_s16 + $0xb8] sm:$0xff] }
  0x40   : > { %436 = vst.msk [vmem:[#allocation2 + $0xd9] sm:$0xff] %vm363_vm0, %v5987_v35  ;;  %437 = vst.msk [vmem:[#allocation2 + $0xe1] sm:$0xff] %vm363_vm0, %v5998_v37  ;;  %4393 = vmatprep.mubr.msk.f32.mxu1 %vm363_vm0, %v6066_v13  ;;  %v4597_v24 = vpack.i.bf16 %v6070_v14, %v6066_v13  ;;  %v6102_v36 = vsel %vm554_vm3, %v570_v15, %v571_v16  ;;  %v4602_v45 = vpack.i.bf16 %v6047_v62, %v6050_v1  ;;  %v6154_v58 = vld [vmem:[#allocation2 + $0x68] sm:$0xff]  ;;  %v1575_v62 = vld [vmem:[%s8842_s1 + $0xf8] sm:$0xff] }
  0x41   : > { %8925 = vst [vmem:[#allocation24_spill] sm:$0xff] %v6087_v22  ;;  %8926 = vst [vmem:[#allocation25_spill] sm:$0xff] %v6090_v23  ;;  %v4607_v47 = vpack.i.bf16 %v6002_v38, %v6102_v36  ;;  %v6131_v48 = vsel %vm554_vm3, %v561_v57, %v563_v31  ;;  %v6134_v49 = vsel %vm731_vm2, %v743_v63, %v745_v32  ;;  %v573_v50 = vrot.slane %v6104_v40, 1  ;;  %v1544_v38 = vld [vmem:[%s8842_s1] sm:$0xff]  ;;  %v1573_v32 = vld [vmem:[%s8842_s1 + $0xe8] sm:$0xff] }
  0x42   : > { %4588 = vrot.lane.b32.xlu1 %v4587_v4, %s5661_s29  ;;  %4578 = vrot.lane.b32.xlu0 %v4577_v5, %s5661_s29  ;;  %438 = vst.msk [vmem:[#allocation2 + $0xf1] sm:$0xff] %vm363_vm0, %v6087_v22  ;;  %439 = vst.msk [vmem:[#allocation2 + $0xf9] sm:$0xff] %vm363_vm0, %v6090_v23  ;;  %v747_v52 = vrot.slane %v6050_v1, 2  ;;  %v748_v53 = vrot.slane %v6052_v2, 2  ;;  %v6152_v57 = vld [vmem:[#allocation2 + $0x60] sm:$0xff]  ;;  %v4612_v60 = vpack.i.bf16 %v6131_v48, %v6134_v49  ;;  %v1574_v4 = vld [vmem:[%s8842_s1 + $0xf0] sm:$0xff] }
  0x43   : > { %8927 = vst [vmem:[#allocation26_spill] sm:$0xff] %v6111_v42  ;;  %8928 = vst [vmem:[#allocation27_spill] sm:$0xff] %v6114_v43  ;;  %1678 = vmatpush1.msra.mxu0 %v1546_v41  ;;  %4385 = vmatprep.subr.mxu1 %v1579_v51  ;;  %v4617_v63 = vpack.i.bf16 %v6044_v61, %v6052_v2  ;;  %v6174_v3 = vsel %vm554_vm3, %v571_v16, %v573_v50  ;;  %v6180_v5 = vld [vmem:[%s5890_s16 + $0xc0] sm:$0xff]  ;;  %v575_v17 = vrot.slane %v6152_v57, 1  ;;  %v6191_v61 = vld [vmem:[%s5890_s16 + $0xc8] sm:$0xff] }
  0x44   : > { %440 = vst.msk [vmem:[#allocation2 + $0x109] sm:$0xff] %vm363_vm0, %v6111_v42  ;;  %441 = vst.msk [vmem:[#allocation2 + $0x111] sm:$0xff] %vm363_vm0, %v6114_v43  ;;  %1679 = vmatprep.subr.mxu0 %v8852_v0  ;;  %4386 = vmatpush3.msra.mxu1 %v1579_v51  ;;  %v6185_v15 = vsel %vm731_vm2, %v747_v52, %v748_v53  ;;  %v6196_v16 = vld [vmem:[%s5890_s16 + $0xd0] sm:$0xff]  ;;  %v4622_v31 = vpack.i.bf16 %v6004_v39, %v6174_v3  ;;  %v6218_v41 = vld [vmem:[%s5890_s16 + $0xe0] sm:$0xff] }
  0x45   : > { %8929 = vst [vmem:[#allocation28_spill] sm:$0xff] %v6147_v54  ;;  %8930 = vst [vmem:[#allocation29_spill] sm:$0xff] %v6150_v56  ;;  %1680 = vmatpush1.msra.mxu0 %v1545_v46  ;;  %4387 = vmatprep.subr.mxu1 %v1578_v59  ;;  %v4627_v46 = vpack.i.bf16 %v6032_v55, %v6185_v15  ;;  %v6234_v50 = vld [vmem:[#allocation2 + $0x70] sm:$0x3]  ;;  %v1572_v51 = vld [vmem:[%s8842_s1 + $0xe0] sm:$0xff]  ;;  %v4632_v52 = vpack.i.bf16 %v6066_v13, %v6152_v57  ;;  %v752_v13 = vrot.slane %v6152_v57, 2 }
  0x46   : > { %4593 = vrot.lane.b32.xlu1 %v4592_v18, %s5660_s26  ;;  %4598 = vrot.lane.b32.xlu0 %v4597_v24, %s5661_s29  ;;  %442 = vst.msk [vmem:[#allocation2 + $0x121] sm:$0xff] %vm363_vm0, %v6147_v54  ;;  %443 = vst.msk [vmem:[#allocation2 + $0x129] sm:$0xff] %vm363_vm0, %v6150_v56  ;;  %v576_v18 = vrot.slane %v6154_v58, 1  ;;  %v1577_v24 = vld [vmem:[%s8842_s1 + $0x108] sm:$0xff] }
  0x47   : > { %1681 = vmatprep.subr.mxu0 %v8852_v0  ;;  %8931 = vst [vmem:[#allocation30_spill] sm:$0xff] %v6180_v5  ;;  %8932 = vst [vmem:[#allocation31_spill] sm:$0xff] %v6191_v61  ;;  %4388 = vmatpush3.msra.mxu1 %v1578_v59  ;;  %v6446_v42 = vld [vmem:[#allocation2 + $0xd8] sm:$0xff] }
  0x48   : > { %1682 = vmatpush1.msra.mxu0 %v1544_v38  ;;  %444 = vst.msk [vmem:[#allocation2 + $0x139] sm:$0xff] %vm363_vm0, %v6180_v5  ;;  %8933 = vst [vmem:[#allocation32_spill] sm:$0xff] %v6196_v16  ;;  %v6232_v39 = vsel %vm554_vm3, %v575_v17, %v576_v18  ;;  %4389 = vmatprep.subr.mxu1 %v1577_v24  ;;  %v1571_v38 = vld [vmem:[%s8842_s1 + $0xd8] sm:$0xff]  ;;  %v6267_v17 = vld [vmem:[#allocation2 + $0x80] sm:$0xff] }
  0x49   : > { %1683 = vmatprep.subr.mxu0 %v8852_v0  ;;  %8934 = vst [vmem:[#allocation33_spill] sm:$0xff] %v6199_v21  ;;  %445 = vst.msk [vmem:[#allocation2 + $0x141] sm:$0xff] %vm363_vm0, %v6191_v61  ;;  %4390 = vmatpush3.msra.mxu1 %v1577_v24  ;;  %v4637_v59 = vpack.i.bf16 %v6050_v1, %v6232_v39  ;;  %v6265_v1 = vld [vmem:[#allocation2 + $0x78] sm:$0xff]  ;;  %v1569_v24 = vld [vmem:[%s8842_s1 + $0xc8] sm:$0xff] }
  0x4a   : > { %4603 = vrot.lane.b32.xlu1 %v4602_v45, %s5659_s21  ;;  %4608 = vrot.lane.b32.xlu0 %v4607_v47, %s5660_s26  ;;  %446 = vst.msk [vmem:[#allocation2 + $0x151] sm:$0xff] %vm363_vm0, %v6196_v16  ;;  %447 = vst.msk [vmem:[#allocation2 + $0x159] sm:$0xff] %vm363_vm0, %v6199_v21  ;;  %v6221_v45 = vld [vmem:[%s5890_s16 + $0xe8] sm:$0xff]  ;;  %v750_v47 = vrot.slane %v6104_v40, 2  ;;  %v1576_v40 = vld [vmem:[%s8842_s1 + $0x100] sm:$0xff] }
  0x4b   : > { %1684 = vmatpush2.msra.mxu0 %v1575_v62  ;;  %8935 = vst [vmem:[#allocation34_spill] sm:$0xff] %v6218_v41  ;;  %8936 = vst [vmem:[#allocation35_spill] sm:$0xff] %v6221_v45  ;;  %v578_v62 = vrot.slane %v6234_v50, 1  ;;  %4391 = vmatprep.subr.mxu1 %v1576_v40  ;;  %v6414_v5 = vld [vmem:[#allocation2 + $0xc8] sm:$0xff]  ;;  %v6476_v37 = vld [vmem:[#allocation2 + $0xf0] sm:$0xff] }
  0x4c   : > { %1685 = vmatprep.subr.mxu0 %v8852_v0  ;;  %448 = vst.msk [vmem:[#allocation2 + $0x169] sm:$0xff] %vm363_vm0, %v6218_v41  ;;  %449 = vst.msk [vmem:[#allocation2 + $0x171] sm:$0xff] %vm363_vm0, %v6221_v45  ;;  %4392 = vmatpush3.msra.mxu1 %v1576_v40  ;;  %v1568_v40 = vld [vmem:[%s8842_s1 + $0xc0] sm:$0xff]  ;;  %v8942_v45 = vmov 0.0   ;;  %v6378_v41 = vld [vmem:[#allocation2 + $0xa8] sm:$0xff]  ;;  %v773_v43 = vrot.slane %v6414_v5, 2 }
  0x4d   : > { %1686 = vmatpush2.msra.mxu0 %v1574_v4  ;;  %8937 = vst [vmem:[#allocation36_spill] sm:$0xff] %v6232_v39  ;;  %v1570_v4 = vld [vmem:[%s8842_s1 + $0xd0] sm:$0xff]  ;;  %4394 = vmatmul.mubr.msk.f32.vlgmr.msra.gmra.mxu1 %vm363_vm0, %v6134_v49  ;;  %v6502_v33 = vld [vmem:[#allocation2 + $0x108] sm:$0xff]  ;;  %v6531_v26 = vld [vmem:[#allocation2 + $0x120] sm:$0xff] }
  0x4e   : > { %4613 = vrot.lane.b32.xlu1 %v4612_v60, %s5661_s29  ;;  %4618 = vrot.lane.b32.xlu0 %v4617_v63, %s5659_s21  ;;  %v6256_v60 = vsel %vm731_vm2, %v748_v53, %v750_v47  ;;  %v753_v63 = vrot.slane %v6154_v58, 2  ;;  %v580_v47 = vrot.slane %v6265_v1, 1  ;;  %v6504_v30 = vld [vmem:[#allocation2 + $0x110] sm:$0xff]  ;;  %v6533_v25 = vld [vmem:[#allocation2 + $0x128] sm:$0xff]  ;;  %v792_v20 = vrot.slane %v6531_v26, 2 }
  0x4f   : > { %1687 = vmatprep.subr.mxu0 %v8852_v0  ;;  %v4642_v53 = vpack.i.bf16 %v6063_v12, %v6256_v60  ;;  %4396 = vmatprep.mubr.msk.f32.mxu1 %vm363_vm0, %v6185_v15  ;;  %v788_v28 = vrot.slane %v6504_v30, 2  ;;  %v6560_v11 = vld [vmem:[#allocation2 + $0x138] sm:$0xff] }
  0x50   : > { %1688 = vmatpush2.msra.mxu0 %v1573_v32  ;;  %v6280_v32 = vsel %vm554_vm3, %v576_v18, %v578_v62  ;;  %v6296_v18 = vld [vmem:[%s5890_s16 + $0xf0] sm:$0xff]  ;;  %v755_v62 = vrot.slane %v6234_v50, 2  ;;  %v4662_v50 = vpack.i.bf16 %v6185_v15, %v6265_v1  ;;  %3360 = vmatprep.subr.mxu1 %v8942_v45 }
  0x51   : > { %1689 = vmatprep.subr.mxu0 %v8852_v0  ;;  %8938 = vst [vmem:[#allocation37_spill] sm:$0xff] %v6280_v32  ;;  %8939 = vst [vmem:[#allocation38_spill] sm:$0xff] %v6296_v18  ;;  %4397 = vmatmul.mubr.msk.f32.gmra.mxu1 %vm363_vm0, %v6256_v60  ;;  %v6586_v6 = vld [vmem:[#allocation2 + $0x150] sm:$0xff]  ;;  %v6588_v9 = vld [vmem:[#allocation2 + $0x158] sm:$0xff] }
  0x52   : > { %4623 = vrot.lane.b32.xlu1 %v4622_v31, %s5660_s26  ;;  %4628 = vrot.lane.b32.xlu0 %v4627_v46, %s5661_s29  ;;  %v4647_v31 = vpack.i.bf16 %v6134_v49, %v6154_v58  ;;  %v6283_v46 = vsel %vm731_vm2, %v752_v13, %v753_v63  ;;  %450 = vst.msk [vmem:[#allocation2 + $0x181] sm:$0xff] %vm363_vm0, %v6296_v18  ;;  %v469_v13 = vld [vmem:[#allocation2 + $0x88] sm:$0x3] }
  0x53   : > { %1690 = vmatpush2.msra.mxu0 %v1572_v51  ;;  %v581_v51 = vrot.slane %v6267_v17, 1  ;;  %v4657_v49 = vpack.i.bf16 %v6102_v36, %v6283_v46  ;;  %4399 = vmatprep.mubr.msk.f32.mxu1 %vm363_vm0, %v6283_v46  ;;  %v760_v15 = vrot.slane %v469_v13, 2 }
  0x54   : > { %1691 = vmatprep.subr.mxu0 %v8852_v0 }
  0x55   : > { %1692 = vmatpush2.msra.mxu0 %v1571_v38  ;;  %v4652_v38 = vpack.i.bf16 %v6052_v2, %v6280_v32  ;;  %v6317_v2 = vsel %vm554_vm3, %v580_v47, %v581_v51 }
  0x56   : > { %4633 = vrot.lane.b32.xlu1 %v4632_v52, %s5659_s21  ;;  %1693 = vmatprep.subr.mxu0 %v8852_v0  ;;  %v6299_v52 = vld [vmem:[%s5890_s16 + $0xf8] sm:$0xff]  ;;  %8941 = vst [vmem:[#allocation40_spill] sm:$0xff] %v6317_v2  ;;  %v4667_v47 = vpack.i.bf16 %v6152_v57, %v6317_v2  ;;  %v1564_v57 = vld [vmem:[%s8842_s1 + $0xa0] sm:$0xff]  ;;  %s323_s16 = sand.u32 1, %s5648_s10  }
  0x57   : > { %4638 = vrot.lane.b32.xlu0 %v4637_v59, %s5660_s26  ;;  %1694 = vmatpush2.msra.mxu0 %v1570_v4  ;;  %8940 = vst [vmem:[#allocation39_spill] sm:$0xff] %v6299_v52  ;;  %v1567_v59 = vld [vmem:[%s8842_s1 + $0xb8] sm:$0xff]  ;;  %451 = vst.msk [vmem:[#allocation2 + $0x189] sm:$0xff] %vm363_vm0, %v6299_v52  ;;  %v757_v4 = vrot.slane %v6265_v1, 2  ;;  %v6342_v52 = vld [vmem:[#allocation2 + $0x90] sm:$0xff]  ;;  %s4226_s22 = sshll.u32 %s323_s16, 8 }
  0x58   : > { %1695 = vmatprep.subr.mxu0 %v8852_v0  ;;  %v762_v18 = vrot.slane %v6342_v52, 2  ;;  %s8704_s23 = scalar_lea.vmem [#allocation3], %s4226_s22  ;;  %s8801_s14 = scalar_lea.sflag [#allocation4], %s323_s16 }
  0x59   : > { %1696 = vmatpush2.msra.mxu0 %v1569_v24  ;;  %v1566_v24 = vld [vmem:[%s8842_s1 + $0xb0] sm:$0xff]  ;;  %s4160_s25 = sshll.u32 %s8704_s23, 4  ;;  %s8769_s25 = int_to_ptr.vmem [resolvable:$true] %s4160_s25 }
  0x5a   : > { %4643 = vrot.lane.b32.xlu1 %v4642_v53, %s5661_s29  ;;  %1697 = vmatprep.subr.mxu0 %v8852_v0  ;;  %v758_v53 = vrot.slane %v6267_v17, 2 }
  0x5b   : > { %4648 = vrot.lane.b32.xlu0 %v4647_v31, %s5659_s21  ;;  %1698 = vmatpush2.msra.mxu0 %v1568_v40  ;;  %v1565_v31 = vld [vmem:[%s8842_s1 + $0xa8] sm:$0xff]  ;;  %v6340_v40 = vsel %vm731_vm2, %v753_v63, %v755_v62  ;;  %v4677_v62 = vpack.i.bf16 %v6256_v60, %v6267_v17  ;;  %v6380_v60 = vld [vmem:[#allocation2 + $0xb0] sm:$0xff] }
  0x5c   : > { %1699 = vmatprep.subr.mxu0 %v8852_v0  ;;  %4400 = vmatmul.mubr.msk.f32.gmra.mxu1 %vm363_vm0, %v6340_v40  ;;  %v4672_v63 = vpack.i.bf16 %v6174_v3, %v6340_v40 }
  0x5d   : > { %1700 = vmatpush2.msra.mxu0 %v1567_v59  ;;  %v583_v59 = vrot.slane %v469_v13, 1  ;;  %v6364_v13 = vld [vmem:[#allocation2 + $0xa0] sm:$0x3] }
  0x5e   : > { %4653 = vrot.lane.b32.xlu1 %v4652_v38, %s5660_s26  ;;  %1701 = vmatprep.subr.mxu0 %v8852_v0  ;;  %v6344_v38 = vld [vmem:[#allocation2 + $0x98] sm:$0xff]  ;;  %v6347_v0 = vsel %vm731_vm2, %v757_v4, %v758_v53  ;;  %v765_v21 = vrot.slane %v6364_v13, 2 }
  0x5f   : > { %4658 = vrot.lane.b32.xlu0 %v4657_v49, %s5661_s29  ;;  %1702 = vmatpush2.msra.mxu0 %v1566_v24  ;;  %v763_v49 = vrot.slane %v6344_v38, 2  ;;  %v1563_v4 = vld [vmem:[%s8842_s1 + $0x98] sm:$0xff]  ;;  %v6372_v24 = vsel %vm554_vm3, %v581_v51, %v583_v59  ;;  %v586_v16 = vrot.slane %v6344_v38, 1  ;;  %v767_v51 = vrot.slane %v6378_v41, 2 }
  0x60   : > { %1703 = vmatprep.subr.mxu0 %v8942_v45  ;;  %4402 = vmatprep.mubr.msk.f32.mxu1 %vm363_vm0, %v6347_v0  ;;  %8943 = vst [vmem:[#allocation41_spill] sm:$0xff] %v6372_v24  ;;  %v6400_v59 = vld [vmem:[#allocation2 + $0xb8] sm:$0x3] }
  0x61   : > { %1704 = vmatpush2.msra.mxu0 %v1565_v31  ;;  %v6376_v31 = vsel %vm731_vm2, %v758_v53, %v760_v15  ;;  %v6385_v61 = vsel %vm731_vm2, %v762_v18, %v763_v49  ;;  %v1562_v53 = vld [vmem:[%s8842_s1 + $0x90] sm:$0xff]  ;;  %v4682_v18 = vpack.i.bf16 %v6154_v58, %v6372_v24  ;;  %v1561_v15 = vld [vmem:[%s8842_s1 + $0x88] sm:$0xff]  ;;  %v770_v58 = vrot.slane %v6400_v59, 2 }
  0x62   : > { %4663 = vrot.lane.b32.xlu1 %v4662_v50, %s5659_s21  ;;  %1705 = vmatprep.subr.mxu0 %v8942_v45  ;;  %v585_v50 = vrot.slane %v6342_v52, 1 }
  0x63   : > { %4668 = vrot.lane.b32.xlu0 %v4667_v47, %s5660_s26  ;;  %1706 = vmatpush2.msra.mxu0 %v1564_v57  ;;  %v768_v47 = vrot.slane %v6380_v60, 2  ;;  %v4687_v57 = vpack.i.bf16 %v6232_v39, %v6347_v0 }
  0x64   : > { %1707 = vmatprep.subr.mxu0 %v8942_v45  ;;  %4403 = vmatmul.mubr.msk.f32.gmra.mxu1 %vm363_vm0, %v6376_v31  ;;  %v6418_v56 = vsel %vm554_vm3, %v585_v50, %v586_v16  ;;  %v6436_v50 = vld [vmem:[#allocation2 + $0xd0] sm:$0x3] }
  0x65   : > { %1708 = vmatpush2.msra.mxu0 %v1563_v4  ;;  %4405 = vmatprep.mubr.msk.f32.mxu1 %vm363_vm0, %v6385_v61  ;;  %v6410_v4 = vsel %vm731_vm2, %v763_v49, %v765_v21  ;;  %8944 = vst [vmem:[#allocation42_spill] sm:$0xff] %v6418_v56  ;;  %v6421_v54 = vsel %vm731_vm2, %v767_v51, %v768_v47  ;;  %v1560_v21 = vld [vmem:[%s8842_s1 + $0x80] sm:$0xff] }
  0x66   : > { %4673 = vrot.lane.b32.xlu1 %v4672_v63, %s5661_s29  ;;  %1709 = vmatprep.subr.mxu0 %v8942_v45  ;;  %v6412_v63 = vld [vmem:[#allocation2 + $0xc0] sm:$0xff]  ;;  %v4692_v49 = vpack.i.bf16 %v6283_v46, %v6342_v52  ;;  %v4697_v51 = vpack.i.bf16 %v6265_v1, %v6418_v56  ;;  %v775_v46 = vrot.slane %v6436_v50, 2  ;;  %v4702_v1 = vpack.i.bf16 %v6280_v32, %v6376_v31 }
  0x67   : > { %4678 = vrot.lane.b32.xlu0 %v4677_v62, %s5659_s21  ;;  %1710 = vmatpush2.msra.mxu0 %v1562_v53  ;;  %v772_v62 = vrot.slane %v6412_v63, 2  ;;  %v588_v53 = vrot.slane %v6364_v13, 1  ;;  %v4707_v13 = vpack.i.bf16 %v6340_v40, %v6344_v38  ;;  %v591_v40 = vrot.slane %v6380_v60, 1 }
  0x68   : > { %1711 = vmatprep.subr.mxu0 %v8942_v45  ;;  %4406 = vmatmul.mubr.msk.f32.gmra.mxu1 %vm363_vm0, %v6410_v4 }
  0x69   : > { %1712 = vmatpush2.msra.mxu0 %v1561_v15  ;;  %4408 = vmatprep.mubr.msk.f32.mxu1 %vm363_vm0, %v6421_v54  ;;  %v6444_v15 = vsel %vm731_vm2, %v768_v47, %v770_v58  ;;  %v6452_v23 = vsel %vm731_vm2, %v772_v62, %v773_v43  ;;  %v6466_v47 = vld [vmem:[#allocation2 + $0xe8] sm:$0x3]  ;;  %v6470_v58 = vsel %vm554_vm3, %v586_v16, %v588_v53  ;;  %v590_v62 = vrot.slane %v6378_v41, 1  ;;  %v6494_v53 = vld [vmem:[#allocation2 + $0x100] sm:$0x3] }
  0x6a   : > { %4683 = vrot.lane.b32.xlu1 %v4682_v18, %s5660_s26  ;;  %1713 = vmatprep.subr.mxu0 %v8942_v45  ;;  %v6448_v18 = vld [vmem:[#allocation2 + $0xe0] sm:$0xff]  ;;  %8945 = vst [vmem:[#allocation43_spill] sm:$0xff] %v6470_v58  ;;  %v780_v35 = vrot.slane %v6466_v47, 2  ;;  %v785_v29 = vrot.slane %v6494_v53, 2  ;;  %v803_v45 = vrot.slane %v6588_v9, 2 }
  0x6b   : > { %4688 = vrot.lane.b32.xlu0 %v4687_v57, %s5661_s29  ;;  %1714 = vmatpush2.msra.mxu0 %v1560_v21  ;;  %v777_v57 = vrot.slane %v6446_v42, 2  ;;  %v778_v22 = vrot.slane %v6448_v18, 2  ;;  %v6474_v21 = vsel %vm731_vm2, %v773_v43, %v775_v46  ;;  %v4712_v43 = vpack.i.bf16 %v6267_v17, %v6470_v58 }
  0x6c   : > { %4409 = vmatmul.mubr.msk.f32.gmra.mxu1 %vm363_vm0, %v6444_v15  ;;  %v4717_v46 = vpack.i.bf16 %v6317_v2, %v6385_v61  ;;  %v6617_v2 = vld [vmem:[#allocation2 + $0x170] sm:$0xff] }
  0x6d   : > { %4411 = vmatprep.mubr.msk.f32.mxu1 %vm363_vm0, %v6452_v23  ;;  %v6483_v34 = vsel %vm731_vm2, %v777_v57, %v778_v22  ;;  %v6500_v57 = vsel %vm731_vm2, %v778_v22, %v780_v35  ;;  %v4722_v35 = vpack.i.bf16 %v6347_v0, %v6378_v41  ;;  %v6522_v22 = vld [vmem:[#allocation2 + $0x118] sm:$0x3]  ;;  %8946 = vst [vmem:[#allocation44_spill] sm:$0xff] %v6617_v2 }
  0x6e   : > { %4693 = vrot.lane.b32.xlu1 %v4692_v49, %s5659_s21  ;;  %v6478_v49 = vld [vmem:[#allocation2 + $0xf8] sm:$0xff] }
  0x6f   : > { %4698 = vrot.lane.b32.xlu0 %v4697_v51, %s5660_s26  ;;  %v782_v51 = vrot.slane %v6476_v37, 2  ;;  %v783_v16 = vrot.slane %v6478_v49, 2 }
  0x70   : > { %4412 = vmatmul.mubr.msk.f32.gmra.mxu1 %vm363_vm0, %v6474_v21 }
  0x71   : > { %4414 = vmatprep.mubr.msk.f32.mxu1 %vm363_vm0, %v6483_v34  ;;  %v6511_v17 = vsel %vm731_vm2, %v782_v51, %v783_v16  ;;  %v593_v51 = vrot.slane %v6400_v59, 1  ;;  %v6529_v27 = vsel %vm731_vm2, %v783_v16, %v785_v29  ;;  %v4732_v29 = vpack.i.bf16 %v6372_v24, %v6410_v4  ;;  %v6550_v59 = vld [vmem:[#allocation2 + $0x130] sm:$0x3]  ;;  %v6615_v24 = vld [vmem:[#allocation2 + $0x168] sm:$0xff] }
  0x72   : > { %4703 = vrot.lane.b32.xlu1 %v4702_v1, %s5661_s29  ;;  %v6508_v1 = vsel %vm554_vm3, %v590_v62, %v591_v40  ;;  %v795_v10 = vrot.slane %v6550_v59, 2  ;;  %v807_v32 = vrot.slane %v6615_v24, 2 }
  0x73   : > { %4708 = vrot.lane.b32.xlu0 %v4707_v13, %s5659_s21  ;;  %v787_v13 = vrot.slane %v6502_v33, 2  ;;  %v4727_v62 = vpack.i.bf16 %v6342_v52, %v6508_v1  ;;  %v4737_v52 = vpack.i.bf16 %v6376_v31, %v6380_v60  ;;  %v6554_v16 = vsel %vm554_vm3, %v591_v40, %v593_v51  ;;  %v6578_v51 = vld [vmem:[#allocation2 + $0x148] sm:$0x3] }
  0x74   : > { %4415 = vmatmul.mubr.msk.f32.gmra.mxu1 %vm363_vm0, %v6500_v57  ;;  %v596_v31 = vrot.slane %v6414_v5, 1  ;;  %v800_v8 = vrot.slane %v6578_v51, 2 }
  0x75   : > { %4417 = vmatprep.mubr.msk.f32.mxu1 %vm363_vm0, %v6511_v17  ;;  %v6537_v0 = vsel %vm731_vm2, %v787_v13, %v788_v28  ;;  %v595_v13 = vrot.slane %v6412_v63, 1 }
  0x76   : > { %4713 = vrot.lane.b32.xlu1 %v4712_v43, %s5660_s26  ;;  %v790_v43 = vrot.slane %v6522_v22, 2 }
  0x77   : > { %4718 = vrot.lane.b32.xlu0 %v4717_v46, %s5661_s29  ;;  %v793_v46 = vrot.slane %v6533_v25, 2 }
  0x78   : > { %4418 = vmatmul.mubr.msk.f32.gmra.mxu1 %vm363_vm0, %v6529_v27  ;;  %v6558_v19 = vsel %vm731_vm2, %v788_v28, %v790_v43  ;;  %v4742_v28 = vpack.i.bf16 %v6344_v38, %v6554_v16 }
  0x79   : > { %4420 = vmatprep.mubr.msk.f32.mxu1 %vm363_vm0, %v6537_v0  ;;  %v6567_v7 = vsel %vm731_vm2, %v792_v20, %v793_v46  ;;  %v4747_v20 = vpack.i.bf16 %v6418_v56, %v6421_v54  ;;  %v6584_v43 = vsel %vm731_vm2, %v793_v46, %v795_v10  ;;  %v4752_v10 = vpack.i.bf16 %v6385_v61, %v6412_v63  ;;  %v6606_v46 = vld [vmem:[#allocation2 + $0x160] sm:$0x3] }
  0x7a   : > { %4723 = vrot.lane.b32.xlu1 %v4722_v35, %s5659_s21  ;;  %v6562_v35 = vld [vmem:[#allocation2 + $0x140] sm:$0xff] }
  0x7b   : > { %4728 = vrot.lane.b32.xlu0 %v4727_v62, %s5660_s26  ;;  %v797_v62 = vrot.slane %v6560_v11, 2  ;;  %v798_v40 = vrot.slane %v6562_v35, 2 }
  0x7c   : > { %4421 = vmatmul.mubr.msk.f32.gmra.mxu1 %vm363_vm0, %v6558_v19 }
  0x7d   : > { %4423 = vmatprep.mubr.msk.f32.mxu1 %vm363_vm0, %v6567_v7  ;;  %v6595_v38 = vsel %vm731_vm2, %v797_v62, %v798_v40  ;;  %v598_v62 = vrot.slane %v6436_v50, 1  ;;  %v6613_v56 = vsel %vm731_vm2, %v798_v40, %v800_v8  ;;  %v4762_v8 = vpack.i.bf16 %v6470_v58, %v6444_v15  ;;  %v6634_v50 = vld [vmem:[#allocation2 + $0x178] sm:$0x3] }
  0x7e   : > { %4733 = vrot.lane.b32.xlu1 %v4732_v29, %s5661_s29  ;;  %v6592_v29 = vsel %vm554_vm3, %v595_v13, %v596_v31  ;;  %v810_v58 = vrot.slane %v6634_v50, 2 }
  0x7f   : > { %4738 = vrot.lane.b32.xlu0 %v4737_v52, %s5659_s21  ;;  %v802_v52 = vrot.slane %v6586_v6, 2  ;;  %v4757_v13 = vpack.i.bf16 %v6378_v41, %v6592_v29  ;;  %v4767_v41 = vpack.i.bf16 %v6410_v4, %v6414_v5  ;;  %v6638_v40 = vsel %vm554_vm3, %v596_v31, %v598_v62  ;;  %v6662_v62 = vld [vmem:[#allocation2 + $0x190] sm:$0x3] }
  0x80   : > { %4424 = vmatmul.mubr.msk.f32.gmra.mxu1 %vm363_vm0, %v6584_v43  ;;  %8948 = vst [vmem:[#allocation46_spill] sm:$0xff] %v6638_v40  ;;  %v601_v4 = vrot.slane %v6448_v18, 1 }
  0x81   : > { %4426 = vmatprep.mubr.msk.f32.mxu1 %vm363_vm0, %v6595_v38  ;;  %v6621_v61 = vsel %vm731_vm2, %v802_v52, %v803_v45  ;;  %v600_v52 = vrot.slane %v6446_v42, 1 }
  0x82   : > { %4743 = vrot.lane.b32.xlu1 %v4742_v28, %s5660_s26  ;;  %v805_v28 = vrot.slane %v6606_v46, 2  ;;  %8947 = vst [vmem:[#allocation45_spill] sm:$0xff] %v6621_v61 }
  0x83   : > { %4748 = vrot.lane.b32.xlu0 %v4747_v20, %s5661_s29  ;;  %v808_v20 = vrot.slane %v6617_v2, 2 }
  0x84   : > { %4427 = vmatmul.mubr.msk.f32.gmra.mxu1 %vm363_vm0, %v6613_v56  ;;  %v6642_v39 = vsel %vm731_vm2, %v803_v45, %v805_v28  ;;  %v4772_v45 = vpack.i.bf16 %v6380_v60, %v6638_v40  ;;  %v4782_v60 = vpack.i.bf16 %v6421_v54, %v6446_v42  ;;  %v4797_v54 = vpack.i.bf16 %v6444_v15, %v6448_v18 }
  0x85   : > { %4429 = vmatprep.mubr.msk.f32.mxu1 %vm363_vm0, %v6621_v61  ;;  %v6644_v61 = vld [vmem:[#allocation2 + $0x180] sm:$0xff]  ;;  %v6651_v2 = vsel %vm731_vm2, %v807_v32, %v808_v20  ;;  %v4777_v32 = vpack.i.bf16 %v6508_v1, %v6452_v23  ;;  %v6668_v28 = vsel %vm731_vm2, %v808_v20, %v810_v58  ;;  %v603_v20 = vrot.slane %v6466_v47, 1 }
  0x86   : > { %4753 = vrot.lane.b32.xlu1 %v4752_v10, %s5659_s21  ;;  %8949 = vst [vmem:[#allocation47_spill] sm:$0xff] %v6644_v61  ;;  %v6646_v10 = vld [vmem:[#allocation2 + $0x188] sm:$0xff]  ;;  %v605_v47 = vrot.slane %v6476_v37, 1  ;;  %v4812_v15 = vpack.i.bf16 %v6452_v23, %v6476_v37  ;;  %v610_v23 = vrot.slane %v6502_v33, 1 }
  0x87   : > { %4758 = vrot.lane.b32.xlu0 %v4757_v13, %s5660_s26  ;;  %8950 = vst [vmem:[#allocation48_spill] sm:$0xff] %v6646_v10  ;;  %v1044_v13 = vrot.slane %v6644_v61, 2  ;;  %v1045_v31 = vrot.slane %v6646_v10, 2  ;;  %v1047_v10 = vrot.slane %v6662_v62, 2  ;;  %v6672_v61 = vsel %vm554_vm3, %v600_v52, %v601_v4 }
  0x88   : > { %4430 = vmatmul.mubr.msk.f32.gmra.mxu1 %vm363_vm0, %v6642_v39  ;;  %8951 = vst [vmem:[#allocation49_spill] sm:$0xff] %v6672_v61  ;;  %v4787_v58 = vpack.i.bf16 %v6412_v63, %v6672_v61  ;;  %v4792_v52 = vpack.i.bf16 %v6554_v16, %v6474_v21  ;;  %v6700_v63 = vsel %vm554_vm3, %v601_v4, %v603_v20  ;;  %v611_v20 = vrot.slane %v6504_v30, 1 }
  0x89   : > { %4432 = vmatprep.mubr.msk.f32.mxu1 %vm363_vm0, %v6651_v2  ;;  %8952 = vst [vmem:[#allocation50_spill] sm:$0xff] %v6700_v63 }
  0x8a   : > { %4763 = vrot.lane.b32.xlu1 %v4762_v8, %s5661_s29  ;;  %v6675_v8 = vsel %vm731_vm2, %v1044_v13, %v1045_v31  ;;  %v4802_v13 = vpack.i.bf16 %v6414_v5, %v6700_v63  ;;  %v608_v5 = vrot.slane %v6494_v53, 1  ;;  %v4837_v53 = vpack.i.bf16 %v6672_v61, %v6511_v17 }
  0x8b   : > { %4768 = vrot.lane.b32.xlu0 %v4767_v41, %s5659_s21  ;;  %v6689_v41 = vsel %vm731_vm2, %v1045_v31, %v1047_v10  ;;  %v606_v10 = vrot.slane %v6478_v49, 1  ;;  %v4807_v31 = vpack.i.bf16 %v6592_v29, %v6483_v34 }
  0x8c   : > { %4433 = vmatmul.mubr.msk.f32.gmra.mxu1 %vm363_vm0, %v6668_v28 }
  0x8d   : > { %4435 = vmatprep.mubr.msk.f32.mxu1 %vm363_vm0, %v6675_v8 }
  0x8e   : > { %4773 = vrot.lane.b32.xlu1 %v4772_v45, %s5660_s26  ;;  %v6711_v45 = vsel %vm554_vm3, %v605_v47, %v606_v10  ;;  %v4852_v47 = vpack.i.bf16 %v6700_v63, %v6529_v27 }
  0x8f   : > { %4778 = vrot.lane.b32.xlu0 %v4777_v32, %s5661_s29  ;;  %8953 = vst [vmem:[#allocation51_spill] sm:$0xff] %v6711_v45  ;;  %v4817_v4 = vpack.i.bf16 %v6446_v42, %v6711_v45  ;;  %v4822_v32 = vpack.i.bf16 %v6638_v40, %v6500_v57 }
  0x90   : > { %4436 = vmatmul.mubr.msk.f32.gmra.mxu1 %vm363_vm0, %v6689_v41 }
  0x92   : > { %4783 = vrot.lane.b32.xlu1 %v4782_v60, %s5659_s21  ;;  %v4827_v60 = vpack.i.bf16 %v6474_v21, %v6478_v49  ;;  %v4842_v21 = vpack.i.bf16 %v6483_v34, %v6502_v33  ;;  %v615_v34 = vrot.slane %v6531_v26, 1 }
  0x93   : > { %4788 = vrot.lane.b32.xlu0 %v4787_v58, %s5660_s26  ;;  %v6727_v58 = vsel %vm554_vm3, %v606_v10, %v608_v5  ;;  %v4857_v10 = vpack.i.bf16 %v6500_v57, %v6504_v30  ;;  %v4867_v57 = vpack.i.bf16 %v6711_v45, %v6537_v0  ;;  %v5531_v45 = vld [vmem:[#allocation2] sm:$0xff] }
  0x94   : > { %8954 = vst [vmem:[#allocation52_spill] sm:$0xff] %v6727_v58  ;;  %v4832_v42 = vpack.i.bf16 %v6448_v18, %v6727_v58  ;;  %v613_v18 = vrot.slane %v6522_v22, 1 }
  0x96   : > { %4793 = vrot.lane.b32.xlu1 %v4792_v52, %s5661_s29  ;;  %v6738_v52 = vsel %vm554_vm3, %v610_v23, %v611_v20 }
  0x97   : > { %4798 = vrot.lane.b32.xlu0 %v4797_v54, %s5659_s21  ;;  %v4847_v54 = vpack.i.bf16 %v6476_v37, %v6738_v52 }
  0x9a   : > { %4803 = vrot.lane.b32.xlu1 %v4802_v13, %s5660_s26  ;;  %v6754_v13 = vsel %vm554_vm3, %v611_v20, %v613_v18  ;;  %v4887_v20 = vpack.i.bf16 %v6529_v27, %v6533_v25 }
  0x9b   : > { %4808 = vrot.lane.b32.xlu0 %v4807_v31, %s5661_s29  ;;  %v616_v31 = vrot.slane %v6533_v25, 1  ;;  %v4862_v22 = vpack.i.bf16 %v6478_v49, %v6754_v13 }
  0x9d   : > { %v6766_v5 = vsel %vm554_vm3, %v615_v34, %v616_v31 }
  0x9e   : > { %4813 = vrot.lane.b32.xlu1 %v4812_v15, %s5659_s21  ;;  %v618_v15 = vrot.slane %v6550_v59, 1  ;;  %v4877_v49 = vpack.i.bf16 %v6502_v33, %v6766_v5  ;;  %v621_v33 = vrot.slane %v6562_v35, 1 }
  0x9f   : > { %4818 = vrot.lane.b32.xlu0 %v4817_v4, %s5660_s26 }
  0xa0   : > { %v6772_v23 = vsel %vm554_vm3, %v616_v31, %v618_v15 }
  0xa2   : > { %4823 = vrot.lane.b32.xlu1 %v4822_v32, %s5661_s29 }
  0xa3   : > { %4828 = vrot.lane.b32.xlu0 %v4827_v60, %s5659_s21  ;;  %v4872_v60 = vpack.i.bf16 %v6511_v17, %v6531_v26  ;;  %v4892_v17 = vpack.i.bf16 %v6504_v30, %v6772_v23 }
  0xa6   : > { %4833 = vrot.lane.b32.xlu1 %v4832_v42, %s5660_s26 }
  0xa7   : > { %4838 = vrot.lane.b32.xlu0 %v4837_v53, %s5661_s29 }
  0xaa   : > { %4843 = vrot.lane.b32.xlu1 %v4842_v21, %s5659_s21  ;;  %v4882_v21 = vpack.i.bf16 %v6727_v58, %v6558_v19 }
  0xab   : > { %4848 = vrot.lane.b32.xlu0 %v4847_v54, %s5660_s26  ;;  %v620_v54 = vrot.slane %v6560_v11, 1 }
  0xac   : > { %v4569_v37 = vpop.permute.xlu0 %4568 }
  0xad   : > { %v4571_v18 = vunpack.i.h.bf16 %v4569_v37  ;;  %v4570_v27 = vunpack.i.l.bf16 %v4569_v37 }
  0xae   : > { %4853 = vrot.lane.b32.xlu1 %v4852_v47, %s5661_s29 }
  0xaf   : > { %4858 = vrot.lane.b32.xlu0 %v4857_v10, %s5659_s21 }
  0xb0   : > { %v4584_v4 = vpop.permute.xlu1 %4583  ;;  %v4574_v32 = vpop.permute.xlu0 %4573 }
  0xb1   : > { %v4575_v34 = vunpack.i.l.bf16 %v4574_v32  ;;  %v4586_v15 = vunpack.i.h.bf16 %v4584_v4 }
  0xb2   : > { %4863 = vrot.lane.b32.xlu1 %v4862_v22, %s5660_s26 }
  0xb3   : > { %4868 = vrot.lane.b32.xlu0 %v4867_v57, %s5661_s29  ;;  %v4585_v57 = vunpack.i.l.bf16 %v4584_v4 }
  0xb4   : > { %v4589_v59 = vpop.permute.xlu1 %4588  ;;  %v4579_v53 = vpop.permute.xlu0 %4578 }
  0xb5   : > { %v4590_v42 = vunpack.i.l.bf16 %v4589_v59  ;;  %v4581_v47 = vunpack.i.h.bf16 %v4579_v53  ;;  %v4580_v10 = vunpack.i.l.bf16 %v4579_v53  ;;  %v4591_v31 = vunpack.i.h.bf16 %v4589_v59 }
  0xb6   : > { %4873 = vrot.lane.b32.xlu1 %v4872_v60, %s5659_s21 }
  0xb7   : > { %4878 = vrot.lane.b32.xlu0 %v4877_v49, %s5660_s26  ;;  %v1449_v22 = vsel %vm363_vm0, %v6131_v48, %v4590_v42  ;;  %v1448_v58 = vsel %vm363_vm0, %v6070_v14, %v4580_v10  ;;  %v1350_v53 = vsel %vm363_vm0, %v5531_v45, %v4581_v47  ;;  %v5532_v42 = vld [vmem:[#allocation2 + $0x8] sm:$0xff]  ;;  %v4576_v47 = vunpack.i.h.bf16 %v4574_v32 }
  0xb8   : > { %v4594_v30 = vpop.permute.xlu1 %4593  ;;  %v4599_v63 = vpop.permute.xlu0 %4598  ;;  %v1480_v37 = vsel %vm1382_vm4, %v1448_v58, %v4570_v27  ;;  %v1383_v59 = vsel %vm1382_vm4, %v1350_v53, %v4571_v18  ;;  %v1481_v49 = vsel %vm1382_vm4, %v1449_v22, %v4575_v34  ;;  %v4897_v58 = vpack.i.bf16 %v6738_v52, %v6567_v7 }
  0xb9   : > { %v4595_v60 = vunpack.i.l.bf16 %v4594_v30  ;;  %v4601_v61 = vunpack.i.h.bf16 %v4599_v63  ;;  %v4600_v40 = vunpack.i.l.bf16 %v4599_v63  ;;  %v1512_v48 = vsel %vm1415_vm5, %v1480_v37, %v4585_v57 }
  0xba   : > { %4883 = vrot.lane.b32.xlu1 %v4882_v21, %s5661_s29  ;;  %v1416_v4 = vsel %vm1415_vm5, %v1383_v59, %v4586_v15  ;;  %v4596_v14 = vunpack.i.h.bf16 %v4594_v30  ;;  %1715 = vmatprep.mubr.f32.mxu0 %v1512_v48  ;;  %v1351_v18 = vsel %vm363_vm0, %v5532_v42, %v4591_v31  ;;  %v6806_v10 = vsel %vm554_vm3, %v620_v54, %v621_v33 }
  0xbb   : > { %4888 = vrot.lane.b32.xlu0 %v4887_v20, %s5659_s21  ;;  %v1513_v45 = vsel %vm1415_vm5, %v1481_v49, %v4595_v60  ;;  %1716 = vmatmul.mubr.f32.vlgmr.msra.gmra.mxu0 %v1416_v4  ;;  %v1450_v21 = vsel %vm363_vm0, %v6032_v55, %v4600_v40  ;;  %v1352_v22 = vsel %vm363_vm0, %v6014_v44, %v4601_v61  ;;  %v623_v55 = vrot.slane %v6578_v51, 1 }
  0xbc   : > { %v4604_v63 = vpop.permute.xlu1 %4603  ;;  %v4609_v34 = vpop.permute.xlu0 %4608  ;;  %1720 = vmatprep.mubr.f32.mxu0 %v1513_v45  ;;  %v1384_v32 = vsel %vm1382_vm4, %v1351_v18, %v4576_v47  ;;  %v4902_v31 = vpack.i.bf16 %v6537_v0, %v6560_v11  ;;  %v4907_v44 = vpack.i.bf16 %v6531_v26, %v6806_v10  ;;  %v4912_v59 = vpack.i.bf16 %v6754_v13, %v6584_v43 }
  0xbd   : > { %v4606_v27 = vunpack.i.h.bf16 %v4604_v63  ;;  %v4605_v20 = vunpack.i.l.bf16 %v4604_v63  ;;  %v4610_v15 = vunpack.i.l.bf16 %v4609_v34  ;;  %v4611_v40 = vunpack.i.h.bf16 %v4609_v34 }
  0xbe   : > { %4893 = vrot.lane.b32.xlu1 %v4892_v17, %s5660_s26  ;;  %v1417_v54 = vsel %vm1415_vm5, %v1384_v32, %v4596_v14  ;;  %v6826_v49 = vsel %vm554_vm3, %v621_v33, %v623_v55  ;;  %v4917_v48 = vpack.i.bf16 %v6558_v19, %v6562_v35  ;;  %v5533_v14 = vld [vmem:[#allocation2 + $0x20] sm:$0xff]  ;;  %v625_v42 = vrot.slane %v6586_v6, 1 }
  0xbf   : > { %4898 = vrot.lane.b32.xlu0 %v4897_v58, %s5661_s29  ;;  %v1482_v57 = vsel %vm1382_vm4, %v1450_v21, %v4605_v20  ;;  %1721 = vmatmul.mubr.f32.gmra.mxu0 %v1417_v54  ;;  %v1385_v30 = vsel %vm1382_vm4, %v1352_v22, %v4606_v27  ;;  %v626_v33 = vrot.slane %v6588_v9, 1  ;;  %v4922_v21 = vpack.i.bf16 %v6533_v25, %v6826_v49 }
  0xc0   : > { %v4614_v61 = vpop.permute.xlu1 %4613  ;;  %v1514_v17 = vsel %vm1415_vm5, %v1482_v57, %v4610_v15  ;;  %v4619_v60 = vpop.permute.xlu0 %4618  ;;  %v1418_v26 = vsel %vm1415_vm5, %v1385_v30, %v4611_v40  ;;  %v4927_v15 = vpack.i.bf16 %v6766_v5, %v6595_v38  ;;  %v4932_v30 = vpack.i.bf16 %v6567_v7, %v6586_v6 }
  0xc1   : > { %v4616_v53 = vunpack.i.h.bf16 %v4614_v61  ;;  %v4615_v0 = vunpack.i.l.bf16 %v4614_v61  ;;  %1725 = vmatprep.mubr.f32.mxu0 %v1514_v17  ;;  %v4621_v51 = vunpack.i.h.bf16 %v4619_v60  ;;  %v4620_v37 = vunpack.i.l.bf16 %v4619_v60 }
  0xc2   : > { %4903 = vrot.lane.b32.xlu1 %v4902_v31, %s5659_s21  ;;  %v5534_v31 = vld [vmem:[#allocation2 + $0x30] sm:$0xff]  ;;  %v6851_v40 = vsel %vm554_vm3, %v625_v42, %v626_v33  ;;  %v5535_v42 = vld [vmem:[#allocation2 + $0x38] sm:$0xff] }
  0xc3   : > { %4908 = vrot.lane.b32.xlu0 %v4907_v44, %s5660_s26  ;;  %v1451_v4 = vsel %vm363_vm0, %v6063_v12, %v4615_v0  ;;  %v1353_v45 = vsel %vm363_vm0, %v5533_v14, %v4616_v53  ;;  %1726 = vmatmul.mubr.f32.gmra.mxu0 %v1418_v26  ;;  %v628_v53 = vrot.slane %v6606_v46, 1  ;;  %v4937_v60 = vpack.i.bf16 %v6560_v11, %v6851_v40 }
  0xc4   : > { %v4624_v58 = vpop.permute.xlu1 %4623  ;;  %v4629_v63 = vpop.permute.xlu0 %4628  ;;  %v1483_v12 = vsel %vm1382_vm4, %v1451_v4, %v4620_v37  ;;  %v1386_v20 = vsel %vm1382_vm4, %v1353_v45, %v4621_v51  ;;  %v4942_v14 = vpack.i.bf16 %v6772_v23, %v6613_v56  ;;  %v4947_v11 = vpack.i.bf16 %v6584_v43, %v6588_v9 }
  0xc5   : > { %v4626_v18 = vunpack.i.h.bf16 %v4624_v58  ;;  %v4625_v47 = vunpack.i.l.bf16 %v4624_v58  ;;  %v4631_v27 = vunpack.i.h.bf16 %v4629_v63  ;;  %v4630_v19 = vunpack.i.l.bf16 %v4629_v63 }
  0xc6   : > { %4913 = vrot.lane.b32.xlu1 %v4912_v59, %s5661_s29  ;;  %v6868_v45 = vsel %vm554_vm3, %v626_v33, %v628_v53  ;;  %v630_v63 = vrot.slane %v6615_v24, 1 }
  0xc7   : > { %4918 = vrot.lane.b32.xlu0 %v4917_v48, %s5659_s21  ;;  %v1515_v34 = vsel %vm1415_vm5, %v1483_v12, %v4625_v47  ;;  %v1419_v22 = vsel %vm1415_vm5, %v1386_v20, %v4626_v18  ;;  %v1452_v25 = vsel %vm363_vm0, %v6102_v36, %v4630_v19  ;;  %v1354_v55 = vsel %vm363_vm0, %v5534_v31, %v4631_v27 }
  0xc8   : > { %v4634_v32 = vpop.permute.xlu1 %4633  ;;  %1730 = vmatprep.mubr.f32.mxu0 %v1515_v34  ;;  %v4952_v20 = vpack.i.bf16 %v6562_v35, %v6868_v45  ;;  %v8957_v35 = vld [vmem:[#allocation36_spill] sm:$0xff] }
  0xc9   : > { %v4636_v54 = vunpack.i.h.bf16 %v4634_v32  ;;  %v4635_v57 = vunpack.i.l.bf16 %v4634_v32  ;;  %v4639_v44 = vpop.permute.xlu0 %4638  ;;  %1731 = vmatmul.mubr.f32.gmra.mxu0 %v1419_v22 }
  0xca   : > { %v4641_v61 = vunpack.i.h.bf16 %v4639_v44  ;;  %v4640_v17 = vunpack.i.l.bf16 %v4639_v44  ;;  %4923 = vrot.lane.b32.xlu1 %v4922_v21, %s5660_s26  ;;  %v8955_v21 = vld [vmem:[#allocation44_spill] sm:$0xff] }
  0xcb   : > { %4928 = vrot.lane.b32.xlu0 %v4927_v15, %s5661_s29  ;;  %v1484_v36 = vsel %vm1382_vm4, %v1452_v25, %v4635_v57  ;;  %v1387_v0 = vsel %vm1382_vm4, %v1354_v55, %v4636_v54  ;;  %v631_v27 = vrot.slane %v8955_v21, 1  ;;  %v8956_v25 = vld [vmem:[#allocation45_spill] sm:$0xff] }
  0xcc   : > { %v4644_v51 = vpop.permute.xlu1 %4643  ;;  %v1516_v37 = vsel %vm1415_vm5, %v1484_v36, %v4640_v17  ;;  %v1420_v59 = vsel %vm1415_vm5, %v1387_v0, %v4641_v61  ;;  %v4957_v31 = vpack.i.bf16 %v6806_v10, %v8956_v25  ;;  %v5536_v57 = vld [vmem:[#allocation2 + $0x48] sm:$0xff] }
  0xcd   : > { %v4646_v26 = vunpack.i.h.bf16 %v4644_v51  ;;  %v4645_v48 = vunpack.i.l.bf16 %v4644_v51  ;;  %v4649_v4 = vpop.permute.xlu0 %4648  ;;  %1735 = vmatprep.mubr.f32.mxu0 %v1516_v37  ;;  %v6892_v61 = vsel %vm554_vm3, %v630_v63, %v631_v27  ;;  %v633_v51 = vrot.slane %v6634_v50, 1  ;;  %v5537_v63 = vld [vmem:[#allocation2 + $0x50] sm:$0xff] }
  0xce   : > { %v4651_v7 = vunpack.i.h.bf16 %v4649_v4  ;;  %v4650_v46 = vunpack.i.l.bf16 %v4649_v4  ;;  %4933 = vrot.lane.b32.xlu1 %v4932_v30, %s5659_s21  ;;  %1736 = vmatmul.mubr.f32.gmra.mxu0 %v1420_v59 }
  0xcf   : > { %4938 = vrot.lane.b32.xlu0 %v4937_v60, %s5660_s26  ;;  %v1453_v58 = vsel %vm363_vm0, %v6174_v3, %v4645_v48  ;;  %v1355_v18 = vsel %vm363_vm0, %v5535_v42, %v4646_v26  ;;  %v4962_v60 = vpack.i.bf16 %v6595_v38, %v6615_v24  ;;  %v4967_v26 = vpack.i.bf16 %v6586_v6, %v6892_v61 }
  0xd0   : > { %v4654_v47 = vpop.permute.xlu1 %4653  ;;  %v1485_v3 = vsel %vm1382_vm4, %v1453_v58, %v4650_v46  ;;  %v1388_v43 = vsel %vm1382_vm4, %v1355_v18, %v4651_v7  ;;  %v4972_v58 = vpack.i.bf16 %v6826_v49, %v6642_v39  ;;  %v6909_v42 = vsel %vm554_vm3, %v631_v27, %v633_v51  ;;  %v8958_v18 = vld [vmem:[#allocation37_spill] sm:$0xff] }
  0xd1   : > { %v4656_v19 = vunpack.i.h.bf16 %v4654_v47  ;;  %v4655_v12 = vunpack.i.l.bf16 %v4654_v47  ;;  %v4659_v33 = vpop.permute.xlu0 %4658  ;;  %v4977_v6 = vpack.i.bf16 %v6613_v56, %v8955_v21 }
  0xd2   : > { %v4661_v34 = vunpack.i.h.bf16 %v4659_v33  ;;  %v4660_v22 = vunpack.i.l.bf16 %v4659_v33  ;;  %4943 = vrot.lane.b32.xlu1 %v4942_v14, %s5661_s29  ;;  %v8959_v33 = vld [vmem:[#allocation47_spill] sm:$0xff] }
  0xd3   : > { %4948 = vrot.lane.b32.xlu0 %v4947_v11, %s5659_s21  ;;  %v1517_v15 = vsel %vm1415_vm5, %v1485_v3, %v4655_v12  ;;  %v1421_v32 = vsel %vm1415_vm5, %v1388_v43, %v4656_v19 }
  0xd4   : > { %v4664_v55 = vpop.permute.xlu1 %4663  ;;  %1740 = vmatprep.mubr.f32.mxu0 %v1517_v15  ;;  %v1454_v54 = vsel %vm363_vm0, %v8957_v35, %v4660_v22  ;;  %v1356_v44 = vsel %vm363_vm0, %v5536_v57, %v4661_v34  ;;  %v8960_v34 = vld [vmem:[#allocation48_spill] sm:$0xff]  ;;  %v4982_v15 = vpack.i.bf16 %v6588_v9, %v6909_v42  ;;  %v4987_v57 = vpack.i.bf16 %v6851_v40, %v6651_v2 }
  0xd5   : > { %v4666_v17 = vunpack.i.h.bf16 %v4664_v55  ;;  %v4665_v30 = vunpack.i.l.bf16 %v4664_v55  ;;  %v4669_v53 = vpop.permute.xlu0 %4668  ;;  %1741 = vmatmul.mubr.f32.gmra.mxu0 %v1421_v32  ;;  %v1008_v22 = vrot.slane %v8960_v34, 1  ;;  %v8961_v9 = vld [vmem:[#allocation40_spill] sm:$0xff] }
  0xd6   : > { %v4671_v36 = vunpack.i.h.bf16 %v4669_v53  ;;  %v4670_v0 = vunpack.i.l.bf16 %v4669_v53  ;;  %4953 = vrot.lane.b32.xlu1 %v4952_v20, %s5660_s26  ;;  %v1007_v20 = vrot.slane %v8959_v33, 1 }
  0xd7   : > { %4958 = vrot.lane.b32.xlu0 %v4957_v31, %s5661_s29  ;;  %v1486_v37 = vsel %vm1382_vm4, %v1454_v54, %v4665_v30  ;;  %v1389_v59 = vsel %vm1382_vm4, %v1356_v44, %v4666_v17  ;;  %v5538_v30 = vld [vmem:[#allocation2 + $0x60] sm:$0xff] }
  0xd8   : > { %v4674_v48 = vpop.permute.xlu1 %4673  ;;  %v1518_v4 = vsel %vm1415_vm5, %v1486_v37, %v4670_v0  ;;  %v1422_v7 = vsel %vm1415_vm5, %v1389_v59, %v4671_v36  ;;  %v6933_v36 = vsel %vm554_vm3, %v1007_v20, %v1008_v22  ;;  %v1010_v37 = vrot.slane %v6662_v62, 1 }
  0xd9   : > { %v4676_v46 = vunpack.i.h.bf16 %v4674_v48  ;;  %v4675_v14 = vunpack.i.l.bf16 %v4674_v48  ;;  %v4679_v11 = vpop.permute.xlu0 %4678  ;;  %1745 = vmatprep.mubr.f32.mxu0 %v1518_v4  ;;  %v4992_v48 = vpack.i.bf16 %v8956_v25, %v8959_v33  ;;  %v5002_v25 = vpack.i.bf16 %v6868_v45, %v6668_v28 }
  0xda   : > { %v4681_v38 = vunpack.i.h.bf16 %v4679_v11  ;;  %v4680_v50 = vunpack.i.l.bf16 %v4679_v11  ;;  %4963 = vrot.lane.b32.xlu1 %v4962_v60, %s5659_s21  ;;  %1746 = vmatmul.mubr.f32.gmra.mxu0 %v1422_v7 }
  0xdb   : > { %4968 = vrot.lane.b32.xlu0 %v4967_v26, %s5660_s26  ;;  %v1455_v47 = vsel %vm363_vm0, %v8958_v18, %v4675_v14  ;;  %v1357_v19 = vsel %vm363_vm0, %v5537_v63, %v4676_v46  ;;  %v4997_v46 = vpack.i.bf16 %v6615_v24, %v6933_v36  ;;  %v6951_v18 = vld [vmem:[#allocation2 + $0x198] sm:$0xff] }
  0xdc   : > { %v4684_v12 = vpop.permute.xlu1 %4683  ;;  %v1487_v56 = vsel %vm1382_vm4, %v1455_v47, %v4680_v50  ;;  %v1390_v55 = vsel %vm1382_vm4, %v1357_v19, %v4681_v38  ;;  %v6953_v47 = vld [vmem:[#allocation2 + $0x1a0] sm:$0xff]  ;;  %v505_v19 = vld [vmem:[#allocation2 + $0x1a8] sm:$0x3] }
  0xdd   : > { %v4686_v3 = vunpack.i.h.bf16 %v4684_v12  ;;  %v4685_v43 = vunpack.i.l.bf16 %v4684_v12  ;;  %v4689_v27 = vpop.permute.xlu0 %4688  ;;  %v1345_v12 = vrot.slane %v6951_v18, 2  ;;  %v1346_v20 = vrot.slane %v6953_v47, 2 }
  0xde   : > { %v4691_v32 = vunpack.i.h.bf16 %v4689_v27  ;;  %v4690_v31 = vunpack.i.l.bf16 %v4689_v27  ;;  %4973 = vrot.lane.b32.xlu1 %v4972_v58, %s5661_s29  ;;  %v5539_v27 = vld [vmem:[#allocation2 + $0x68] sm:$0xff] }
  0xdf   : > { %4978 = vrot.lane.b32.xlu0 %v4977_v6, %s5659_s21  ;;  %v1519_v35 = vsel %vm1415_vm5, %v1487_v56, %v4685_v43  ;;  %v1423_v54 = vsel %vm1415_vm5, %v1390_v55, %v4686_v3  ;;  %v6949_v6 = vsel %vm554_vm3, %v1008_v22, %v1010_v37  ;;  %v5007_v22 = vpack.i.bf16 %v6642_v39, %v8960_v34  ;;  %v8962_v3 = vld [vmem:[#allocation41_spill] sm:$0xff] }
  0xe0   : > { %v4694_v44 = vpop.permute.xlu1 %4693  ;;  %1750 = vmatprep.mubr.f32.mxu0 %v1519_v35  ;;  %v1456_v17 = vsel %vm363_vm0, %v8961_v9, %v4690_v31  ;;  %v1358_v53 = vsel %vm363_vm0, %v5538_v30, %v4691_v32  ;;  %v1348_v32 = vrot.slane %v505_v19, 2  ;;  %v1244_v56 = vrot.slane %v6951_v18, 1 }
  0xe1   : > { %v4696_v0 = vunpack.i.h.bf16 %v4694_v44  ;;  %v4695_v60 = vunpack.i.l.bf16 %v4694_v44  ;;  %v4699_v51 = vpop.permute.xlu0 %4698  ;;  %1751 = vmatmul.mubr.f32.gmra.mxu0 %v1423_v54  ;;  %v1245_v55 = vrot.slane %v6953_v47, 1  ;;  %v1347_v35 = vsel %vm731_vm2, %v1345_v12, %v1346_v20 }
  0xe2   : > { %v4701_v59 = vunpack.i.h.bf16 %v4699_v51  ;;  %v4700_v26 = vunpack.i.l.bf16 %v4699_v51  ;;  %4983 = vrot.lane.b32.xlu1 %v4982_v15, %s5660_s26  ;;  %v5012_v39 = vpack.i.bf16 %v8955_v21, %v6949_v6  ;;  %4438 = vmatprep.mubr.msk.f32.mxu1 %vm363_vm0, %v1347_v35  ;;  %v1349_v9 = vsel %vm731_vm2, %v1346_v20, %v1348_v32 }
  0xe3   : > { %4988 = vrot.lane.b32.xlu0 %v4987_v57, %s5661_s29  ;;  %v1488_v4 = vsel %vm1382_vm4, %v1456_v17, %v4695_v60  ;;  %v1391_v7 = vsel %vm1382_vm4, %v1358_v53, %v4696_v0  ;;  %4439 = vmatmul.mubr.msk.f32.gmra.mxu1 %vm363_vm0, %v1349_v9  ;;  %v5017_v51 = vpack.i.bf16 %v6892_v61, %v6675_v8 }
  0xe4   : > { %v4704_v14 = vpop.permute.xlu1 %4703  ;;  %v1520_v11 = vsel %vm1415_vm5, %v1488_v4, %v4700_v26  ;;  %v1424_v62 = vsel %vm1415_vm5, %v1391_v7, %v4701_v59  ;;  %v8963_v59 = vld [vmem:[#allocation42_spill] sm:$0xff]  ;;  %v1246_v7 = vsel %vm554_vm3, %v1244_v56, %v1245_v55  ;;  %v5022_v8 = vpack.i.bf16 %v6651_v2, %v6951_v18 }
  0xe5   : > { %v4706_v38 = vunpack.i.h.bf16 %v4704_v14  ;;  %v4705_v50 = vunpack.i.l.bf16 %v4704_v14  ;;  %v4709_v58 = vpop.permute.xlu0 %4708  ;;  %1755 = vmatprep.mubr.f32.mxu0 %v1520_v11  ;;  %v5032_v18 = vpack.i.bf16 %v6909_v42, %v6689_v41 }
  0xe6   : > { %v4711_v24 = vunpack.i.h.bf16 %v4709_v58  ;;  %v4710_v63 = vunpack.i.l.bf16 %v4709_v58  ;;  %4993 = vrot.lane.b32.xlu1 %v4992_v48, %s5659_s21  ;;  %1756 = vmatmul.mubr.f32.gmra.mxu0 %v1424_v62  ;;  %v5540_v48 = vld [vmem:[#allocation2 + $0x78] sm:$0xff] }
  0xe7   : > { %4998 = vrot.lane.b32.xlu0 %v4997_v46, %s5660_s26  ;;  %v1457_v43 = vsel %vm363_vm0, %v8962_v3, %v4705_v50  ;;  %v1359_v15 = vsel %vm363_vm0, %v5539_v27, %v4706_v38  ;;  %v1247_v50 = vrot.slane %v505_v19, 1 }
  0xe8   : > { %v4714_v31 = vpop.permute.xlu1 %4713  ;;  %v1489_v53 = vsel %vm1382_vm4, %v1457_v43, %v4710_v63  ;;  %v1392_v0 = vsel %vm1382_vm4, %v1359_v15, %v4711_v24  ;;  %v5027_v24 = vpack.i.bf16 %v8959_v33, %v1246_v7  ;;  %v5037_v33 = vpack.i.bf16 %v6668_v28, %v6953_v47  ;;  %v8964_v15 = vld [vmem:[#allocation43_spill] sm:$0xff] }
  0xe9   : > { %v4716_v54 = vunpack.i.h.bf16 %v4714_v31  ;;  %v4715_v57 = vunpack.i.l.bf16 %v4714_v31  ;;  %v4719_v44 = vpop.permute.xlu0 %4718  ;;  %v1248_v19 = vsel %vm554_vm3, %v1245_v55, %v1247_v50  ;;  %v5541_v31 = vld [vmem:[#allocation2 + $0x80] sm:$0xff]  ;;  %v5543_v50 = vld [vmem:[#allocation2 + $0x98] sm:$0xff] }
  0xea   : > { %v4721_v17 = vunpack.i.h.bf16 %v4719_v44  ;;  %v4720_v30 = vunpack.i.l.bf16 %v4719_v44  ;;  %5003 = vrot.lane.b32.xlu1 %v5002_v25, %s5661_s29 }
  0xeb   : > { %5008 = vrot.lane.b32.xlu0 %v5007_v22, %s5659_s21  ;;  %v1521_v60 = vsel %vm1415_vm5, %v1489_v53, %v4715_v57  ;;  %v1425_v21 = vsel %vm1415_vm5, %v1392_v0, %v4716_v54 }
  0xec   : > { %v4724_v37 = vpop.permute.xlu1 %4723  ;;  %1760 = vmatprep.mubr.f32.mxu0 %v1521_v60  ;;  %v1458_v26 = vsel %vm363_vm0, %v8963_v59, %v4720_v30  ;;  %v1360_v4 = vsel %vm363_vm0, %v5540_v48, %v4721_v17 }
  0xed   : > { %v4726_v46 = vunpack.i.h.bf16 %v4724_v37  ;;  %v4725_v14 = vunpack.i.l.bf16 %v4724_v37  ;;  %v4729_v11 = vpop.permute.xlu0 %4728  ;;  %1761 = vmatmul.mubr.f32.gmra.mxu0 %v1425_v21 }
  0xee   : > { %v4731_v62 = vunpack.i.h.bf16 %v4729_v11  ;;  %v4730_v38 = vunpack.i.l.bf16 %v4729_v11  ;;  %5013 = vrot.lane.b32.xlu1 %v5012_v39, %s5660_s26  ;;  %v5042_v39 = vpack.i.bf16 %v8960_v34, %v1248_v19  ;;  %v5542_v34 = vld [vmem:[#allocation2 + $0x90] sm:$0xff]  ;;  %v5544_v19 = vld [vmem:[#allocation2 + $0xa8] sm:$0xff] }
  0xef   : > { %5018 = vrot.lane.b32.xlu0 %v5017_v51, %s5661_s29  ;;  %v1490_v58 = vsel %vm1382_vm4, %v1458_v26, %v4725_v14  ;;  %v1393_v25 = vsel %vm1382_vm4, %v1360_v4, %v4726_v46 }
  0xf0   : > { %v4734_v63 = vpop.permute.xlu1 %4733  ;;  %v1522_v12 = vsel %vm1415_vm5, %v1490_v58, %v4730_v38  ;;  %v1426_v20 = vsel %vm1415_vm5, %v1393_v25, %v4731_v62 }
  0xf1   : > { %v4736_v22 = vunpack.i.h.bf16 %v4734_v63  ;;  %v4735_v3 = vunpack.i.l.bf16 %v4734_v63  ;;  %v4739_v43 = vpop.permute.xlu0 %4738  ;;  %1765 = vmatprep.mubr.f32.mxu0 %v1522_v12 }
  0xf2   : > { %v4741_v27 = vunpack.i.h.bf16 %v4739_v43  ;;  %v4740_v2 = vunpack.i.l.bf16 %v4739_v43  ;;  %5023 = vrot.lane.b32.xlu1 %v5022_v8, %s5659_s21  ;;  %1766 = vmatmul.mubr.f32.gmra.mxu0 %v1426_v20 }
  0xf3   : > { %5028 = vrot.lane.b32.xlu0 %v5027_v24, %s5660_s26  ;;  %v1459_v32 = vsel %vm363_vm0, %v8964_v15, %v4735_v3  ;;  %v1361_v56 = vsel %vm363_vm0, %v5541_v31, %v4736_v22 }
  0xf4   : > { %v4744_v35 = vpop.permute.xlu1 %4743  ;;  %v1491_v55 = vsel %vm1382_vm4, %v1459_v32, %v4740_v2  ;;  %v1394_v28 = vsel %vm1382_vm4, %v1361_v56, %v4741_v27 }
  0xf5   : > { %v4746_v54 = vunpack.i.h.bf16 %v4744_v35  ;;  %v4745_v57 = vunpack.i.l.bf16 %v4744_v35  ;;  %v4749_v44 = vpop.permute.xlu0 %4748 }
  0xf6   : > { %v4751_v41 = vunpack.i.h.bf16 %v4749_v44  ;;  %v4750_v9 = vunpack.i.l.bf16 %v4749_v44  ;;  %5033 = vrot.lane.b32.xlu1 %v5032_v18, %s5661_s29 }
  0xf7   : > { %5038 = vrot.lane.b32.xlu0 %v5037_v33, %s5659_s21  ;;  %v1523_v47 = vsel %vm1415_vm5, %v1491_v55, %v4745_v57  ;;  %v1427_v17 = vsel %vm1415_vm5, %v1394_v28, %v4746_v54 }
  0xf8   : > { %v4754_v30 = vpop.permute.xlu1 %4753  ;;  %1770 = vmatprep.mubr.f32.mxu0 %v1523_v47  ;;  %v1460_v53 = vsel %vm363_vm0, %v6508_v1, %v4750_v9  ;;  %v1362_v0 = vsel %vm363_vm0, %v5542_v34, %v4751_v41 }
  0xf9   : > { %v4756_v60 = vunpack.i.h.bf16 %v4754_v30  ;;  %v4755_v21 = vunpack.i.l.bf16 %v4754_v30  ;;  %v4759_v51 = vpop.permute.xlu0 %4758  ;;  %1771 = vmatmul.mubr.f32.gmra.mxu0 %v1427_v17  ;;  %v8965_v17 = vld [vmem:[#allocation46_spill] sm:$0xff] }
  0xfa   : > { %v4761_v37 = vunpack.i.h.bf16 %v4759_v51  ;;  %v4760_v59 = vunpack.i.l.bf16 %v4759_v51  ;;  %5043 = vrot.lane.b32.xlu1 %v5042_v39, %s5660_s26 }
  0xfb   : > { %v1492_v26 = vsel %vm1382_vm4, %v1460_v53, %v4755_v21  ;;  %v1395_v48 = vsel %vm1382_vm4, %v1362_v0, %v4756_v60  ;;  %v5545_v53 = vld [vmem:[#allocation2 + $0xb0] sm:$0xff] }
  0xfc   : > { %v4764_v4 = vpop.permute.xlu1 %4763  ;;  %v1524_v7 = vsel %vm1415_vm5, %v1492_v26, %v4760_v59  ;;  %v1428_v1 = vsel %vm1415_vm5, %v1395_v48, %v4761_v37 }
  0xfd   : > { %v4766_v46 = vunpack.i.h.bf16 %v4764_v4  ;;  %v4765_v14 = vunpack.i.l.bf16 %v4764_v4  ;;  %v4769_v11 = vpop.permute.xlu0 %4768  ;;  %1775 = vmatprep.mubr.f32.mxu0 %v1524_v7 }
  0xfe   : > { %v4771_v62 = vunpack.i.h.bf16 %v4769_v11  ;;  %v4770_v38 = vunpack.i.l.bf16 %v4769_v11  ;;  %1776 = vmatmul.mubr.f32.gmra.mxu0 %v1428_v1  ;;  %v5546_v11 = vld [vmem:[#allocation2 + $0xc0] sm:$0xff] }
  0xff   : > { %v1461_v8 = vsel %vm363_vm0, %v6554_v16, %v4765_v14  ;;  %v1363_v58 = vsel %vm363_vm0, %v5543_v50, %v4766_v46  ;;  %v8966_v46 = vld [vmem:[#allocation49_spill] sm:$0xff] }
 0x100   : > { %v4774_v25 = vpop.permute.xlu1 %4773  ;;  %v1493_v3 = vsel %vm1382_vm4, %v1461_v8, %v4770_v38  ;;  %v1396_v43 = vsel %vm1382_vm4, %v1363_v58, %v4771_v62 }
 0x101   : > { %v4776_v24 = vunpack.i.h.bf16 %v4774_v25  ;;  %v4775_v63 = vunpack.i.l.bf16 %v4774_v25  ;;  %v4779_v12 = vpop.permute.xlu0 %4778 }
 0x102   : > { %v4781_v20 = vunpack.i.h.bf16 %v4779_v12  ;;  %v4780_v22 = vunpack.i.l.bf16 %v4779_v12  ;;  %v7047_v12 = vld [vmem:[%s8844_s3 + $0x118] sm:$0xff] }
 0x103   : > { %v1525_v27 = vsel %vm1415_vm5, %v1493_v3, %v4775_v63  ;;  %v1429_v2 = vsel %vm1415_vm5, %v1396_v43, %v4776_v24  ;;  %4441 = vmatprep.subr.mxu0 %v7047_v12 }
 0x104   : > { %v4784_v18 = vpop.permute.xlu1 %4783  ;;  %1780 = vmatprep.mubr.f32.mxu0 %v1525_v27  ;;  %v1462_v16 = vsel %vm363_vm0, %v6592_v29, %v4780_v22  ;;  %v1364_v33 = vsel %vm363_vm0, %v5544_v19, %v4781_v20  ;;  %4442 = vmatpush3.msra.mxu0 %v7047_v12 }
 0x105   : > { %v4786_v15 = vunpack.i.h.bf16 %v4784_v18  ;;  %v4785_v32 = vunpack.i.l.bf16 %v4784_v18  ;;  %v4789_v31 = vpop.permute.xlu0 %4788  ;;  %1781 = vmatmul.mubr.f32.gmra.mxu0 %v1429_v2  ;;  %v3287_v18 = vld [vmem:[%s8844_s3 + $0x110] sm:$0xff] }
 0x106   : > { %v4791_v56 = vunpack.i.h.bf16 %v4789_v31  ;;  %v4790_v35 = vunpack.i.l.bf16 %v4789_v31  ;;  %4443 = vmatprep.subr.mxu0 %v3287_v18 }
 0x107   : > { %v1494_v54 = vsel %vm1382_vm4, %v1462_v16, %v4785_v32  ;;  %v1397_v57 = vsel %vm1382_vm4, %v1364_v33, %v4786_v15  ;;  %v8967_v33 = vld [vmem:[#allocation50_spill] sm:$0xff]  ;;  %v5547_v32 = vld [vmem:[#allocation2 + $0xc8] sm:$0xff]  ;;  %4444 = vmatpush3.msra.mxu0 %v3287_v18 }
 0x108   : > { %v4794_v44 = vpop.permute.xlu1 %4793  ;;  %v1526_v39 = vsel %vm1415_vm5, %v1494_v54, %v4790_v35  ;;  %v1430_v41 = vsel %vm1415_vm5, %v1397_v57, %v4791_v56  ;;  %v3286_v56 = vld [vmem:[%s8844_s3 + $0x108] sm:$0xff] }
 0x109   : > { %v4796_v9 = vunpack.i.h.bf16 %v4794_v44  ;;  %v4795_v29 = vunpack.i.l.bf16 %v4794_v44  ;;  %v4799_v55 = vpop.permute.xlu0 %4798  ;;  %1785 = vmatprep.mubr.f32.mxu0 %v1526_v39  ;;  %4445 = vmatprep.subr.mxu0 %v3286_v56  ;;  %v3285_v39 = vld [vmem:[%s8844_s3 + $0x100] sm:$0xff] }
 0x10a   : > { %v4801_v28 = vunpack.i.h.bf16 %v4799_v55  ;;  %v4800_v47 = vunpack.i.l.bf16 %v4799_v55  ;;  %1786 = vmatmul.mubr.f32.gmra.mxu0 %v1430_v41 }
 0x10b   : > { %v1463_v30 = vsel %vm363_vm0, %v8965_v17, %v4795_v29  ;;  %v1365_v34 = vsel %vm363_vm0, %v5545_v53, %v4796_v9  ;;  %4446 = vmatpush3.msra.mxu0 %v3286_v56 }
 0x10c   : > { %v4804_v0 = vpop.permute.xlu1 %4803  ;;  %v1495_v26 = vsel %vm1382_vm4, %v1463_v30, %v4800_v47  ;;  %v1398_v48 = vsel %vm1382_vm4, %v1365_v34, %v4801_v28  ;;  %4447 = vmatprep.subr.mxu0 %v3285_v39  ;;  %v8968_v30 = vld [vmem:[#allocation51_spill] sm:$0xff] }
 0x10d   : > { %v4806_v60 = vunpack.i.h.bf16 %v4804_v0  ;;  %v4805_v21 = vunpack.i.l.bf16 %v4804_v0  ;;  %v4809_v51 = vpop.permute.xlu0 %4808  ;;  %4448 = vmatpush3.msra.mxu0 %v3285_v39  ;;  %v5548_v34 = vld [vmem:[#allocation2 + $0xd8] sm:$0xff] }
 0x10e   : > { %v4811_v37 = vunpack.i.h.bf16 %v4809_v51  ;;  %v4810_v59 = vunpack.i.l.bf16 %v4809_v51 }
 0x10f   : > { %v1527_v4 = vsel %vm1415_vm5, %v1495_v26, %v4805_v21  ;;  %v1431_v7 = vsel %vm1415_vm5, %v1398_v48, %v4806_v60 }
 0x110   : > { %v4814_v1 = vpop.permute.xlu1 %4813  ;;  %1790 = vmatprep.mubr.f32.mxu0 %v1527_v4  ;;  %v1464_v14 = vsel %vm363_vm0, %v8966_v46, %v4810_v59  ;;  %v1366_v62 = vsel %vm363_vm0, %v5546_v11, %v4811_v37 }
 0x111   : > { %v4816_v38 = vunpack.i.h.bf16 %v4814_v1  ;;  %v4815_v8 = vunpack.i.l.bf16 %v4814_v1  ;;  %v4819_v50 = vpop.permute.xlu0 %4818  ;;  %1791 = vmatmul.mubr.f32.gmra.mxu0 %v1431_v7 }
 0x112   : > { %v4821_v58 = vunpack.i.h.bf16 %v4819_v50  ;;  %v4820_v25 = vunpack.i.l.bf16 %v4819_v50 }
 0x113   : > { %v1496_v24 = vsel %vm1382_vm4, %v1464_v14, %v4815_v8  ;;  %v1399_v63 = vsel %vm1382_vm4, %v1366_v62, %v4816_v38  ;;  %v8969_v8 = vld [vmem:[#allocation52_spill] sm:$0xff] }
 0x114   : > { %v4824_v20 = vpop.permute.xlu1 %4823  ;;  %v1528_v22 = vsel %vm1415_vm5, %v1496_v24, %v4820_v25  ;;  %v1432_v3 = vsel %vm1415_vm5, %v1399_v63, %v4821_v58  ;;  %v5549_v58 = vld [vmem:[#allocation2 + $0xe0] sm:$0xff] }
 0x115   : > { %v4826_v43 = vunpack.i.h.bf16 %v4824_v20  ;;  %v4825_v27 = vunpack.i.l.bf16 %v4824_v20  ;;  %v4829_v2 = vpop.permute.xlu0 %4828  ;;  %1795 = vmatprep.mubr.f32.mxu0 %v1528_v22 }
 0x116   : > { %v4831_v16 = vunpack.i.h.bf16 %v4829_v2  ;;  %v4830_v19 = vunpack.i.l.bf16 %v4829_v2  ;;  %1796 = vmatmul.mubr.f32.gmra.mxu0 %v1432_v3 }
 0x117   : > { %v1465_v15 = vsel %vm363_vm0, %v8967_v33, %v4825_v27  ;;  %v1367_v31 = vsel %vm363_vm0, %v5547_v32, %v4826_v43 }
 0x118   : > { %v4834_v35 = vpop.permute.xlu1 %4833  ;;  %v1497_v29 = vsel %vm1382_vm4, %v1465_v15, %v4830_v19  ;;  %v1400_v55 = vsel %vm1382_vm4, %v1367_v31, %v4831_v16  ;;  %v5550_v15 = vld [vmem:[#allocation2 + $0xf0] sm:$0xff] }
 0x119   : > { %v4836_v54 = vunpack.i.h.bf16 %v4834_v35  ;;  %v4835_v57 = vunpack.i.l.bf16 %v4834_v35  ;;  %v4839_v44 = vpop.permute.xlu0 %4838 }
 0x11a   : > { %v4841_v41 = vunpack.i.h.bf16 %v4839_v44  ;;  %v4840_v9 = vunpack.i.l.bf16 %v4839_v44 }
 0x11b   : > { %v1529_v28 = vsel %vm1415_vm5, %v1497_v29, %v4835_v57  ;;  %v1433_v47 = vsel %vm1415_vm5, %v1400_v55, %v4836_v54 }
 0x11c   : > { %v4844_v17 = vpop.permute.xlu1 %4843  ;;  %1800 = vmatprep.mubr.f32.mxu0 %v1529_v28  ;;  %v1466_v53 = vsel %vm363_vm0, %v8968_v30, %v4840_v9  ;;  %v1368_v0 = vsel %vm363_vm0, %v5548_v34, %v4841_v41 }
 0x11d   : > { %v4846_v60 = vunpack.i.h.bf16 %v4844_v17  ;;  %v4845_v21 = vunpack.i.l.bf16 %v4844_v17  ;;  %v4849_v51 = vpop.permute.xlu0 %4848  ;;  %1801 = vmatmul.mubr.f32.gmra.mxu0 %v1433_v47 }
 0x11e   : > { %v4851_v37 = vunpack.i.h.bf16 %v4849_v51  ;;  %v4850_v59 = vunpack.i.l.bf16 %v4849_v51 }
 0x11f   : > { %v1498_v26 = vsel %vm1382_vm4, %v1466_v53, %v4845_v21  ;;  %v1401_v48 = vsel %vm1382_vm4, %v1368_v0, %v4846_v60  ;;  %v5551_v53 = vld [vmem:[#allocation2 + $0xf8] sm:$0xff] }
 0x120   : > { %v4854_v4 = vpop.permute.xlu1 %4853  ;;  %v1530_v7 = vsel %vm1415_vm5, %v1498_v26, %v4850_v59  ;;  %v1434_v1 = vsel %vm1415_vm5, %v1401_v48, %v4851_v37 }
 0x121   : > { %v4856_v46 = vunpack.i.h.bf16 %v4854_v4  ;;  %v4855_v14 = vunpack.i.l.bf16 %v4854_v4  ;;  %v4859_v11 = vpop.permute.xlu0 %4858  ;;  %1805 = vmatprep.mubr.f32.mxu0 %v1530_v7 }
 0x122   : > { %v4861_v62 = vunpack.i.h.bf16 %v4859_v11  ;;  %v4860_v38 = vunpack.i.l.bf16 %v4859_v11  ;;  %1806 = vmatmul.mubr.f32.gmra.mxu0 %v1434_v1 }
 0x123   : > { %v1467_v50 = vsel %vm363_vm0, %v8969_v8, %v4855_v14  ;;  %v1369_v25 = vsel %vm363_vm0, %v5549_v58, %v4856_v46  ;;  %v5552_v46 = vld [vmem:[#allocation2 + $0x108] sm:$0xff] }
 0x124   : > { %v4864_v24 = vpop.permute.xlu1 %4863  ;;  %v1499_v27 = vsel %vm1382_vm4, %v1467_v50, %v4860_v38  ;;  %v1402_v2 = vsel %vm1382_vm4, %v1369_v25, %v4861_v62 }
 0x125   : > { %v4866_v63 = vunpack.i.h.bf16 %v4864_v24  ;;  %v4865_v20 = vunpack.i.l.bf16 %v4864_v24  ;;  %v4869_v22 = vpop.permute.xlu0 %4868 }
 0x126   : > { %v4871_v3 = vunpack.i.h.bf16 %v4869_v22  ;;  %v4870_v43 = vunpack.i.l.bf16 %v4869_v22 }
 0x127   : > { %v1531_v18 = vsel %vm1415_vm5, %v1499_v27, %v4865_v20  ;;  %v1435_v16 = vsel %vm1415_vm5, %v1402_v2, %v4866_v63 }
 0x128   : > { %v4874_v19 = vpop.permute.xlu1 %4873  ;;  %1810 = vmatprep.mubr.f32.mxu0 %v1531_v18  ;;  %v1468_v33 = vsel %vm363_vm0, %v6738_v52, %v4870_v43  ;;  %v1370_v32 = vsel %vm363_vm0, %v5550_v15, %v4871_v3  ;;  %v5553_v18 = vld [vmem:[#allocation2 + $0x110] sm:$0xff] }
 0x129   : > { %v4876_v31 = vunpack.i.h.bf16 %v4874_v19  ;;  %v4875_v56 = vunpack.i.l.bf16 %v4874_v19  ;;  %v4879_v35 = vpop.permute.xlu0 %4878  ;;  %1811 = vmatmul.mubr.f32.gmra.mxu0 %v1435_v16 }
 0x12a   : > { %v4881_v54 = vunpack.i.h.bf16 %v4879_v35  ;;  %v4880_v57 = vunpack.i.l.bf16 %v4879_v35 }
 0x12b   : > { %v1500_v44 = vsel %vm1382_vm4, %v1468_v33, %v4875_v56  ;;  %v1403_v39 = vsel %vm1382_vm4, %v1370_v32, %v4876_v31 }
 0x12c   : > { %v4884_v41 = vpop.permute.xlu1 %4883  ;;  %v1532_v9 = vsel %vm1415_vm5, %v1500_v44, %v4880_v57  ;;  %v1436_v29 = vsel %vm1415_vm5, %v1403_v39, %v4881_v54 }
 0x12d   : > { %v4886_v55 = vunpack.i.h.bf16 %v4884_v41  ;;  %v4885_v52 = vunpack.i.l.bf16 %v4884_v41  ;;  %v4889_v28 = vpop.permute.xlu0 %4888  ;;  %1815 = vmatprep.mubr.f32.mxu0 %v1532_v9  ;;  %v5554_v41 = vld [vmem:[#allocation2 + $0x120] sm:$0xff] }
 0x12e   : > { %v4891_v47 = vunpack.i.h.bf16 %v4889_v28  ;;  %v4890_v17 = vunpack.i.l.bf16 %v4889_v28  ;;  %1816 = vmatmul.mubr.f32.gmra.mxu0 %v1436_v29 }
 0x12f   : > { %v1469_v30 = vsel %vm363_vm0, %v6754_v13, %v4885_v52  ;;  %v1371_v34 = vsel %vm363_vm0, %v5551_v53, %v4886_v55 }
 0x130   : > { %v4894_v0 = vpop.permute.xlu1 %4893  ;;  %v1501_v26 = vsel %vm1382_vm4, %v1469_v30, %v4890_v17  ;;  %v1404_v48 = vsel %vm1382_vm4, %v1371_v34, %v4891_v47 }
 0x131   : > { %v4896_v60 = vunpack.i.h.bf16 %v4894_v0  ;;  %v4895_v21 = vunpack.i.l.bf16 %v4894_v0  ;;  %v4899_v51 = vpop.permute.xlu0 %4898 }
 0x132   : > { %v4901_v37 = vunpack.i.h.bf16 %v4899_v51  ;;  %v4900_v59 = vunpack.i.l.bf16 %v4899_v51 }
 0x133   : > { %v1533_v4 = vsel %vm1415_vm5, %v1501_v26, %v4895_v21  ;;  %v1437_v7 = vsel %vm1415_vm5, %v1404_v48, %v4896_v60  ;;  %v5555_v26 = vld [vmem:[#allocation2 + $0x128] sm:$0xff] }
 0x134   : > { %v4904_v1 = vpop.permute.xlu1 %4903  ;;  %1820 = vmatprep.mubr.f32.mxu0 %v1533_v4  ;;  %v1470_v13 = vsel %vm363_vm0, %v6766_v5, %v4900_v59  ;;  %v1372_v14 = vsel %vm363_vm0, %v5552_v46, %v4901_v37 }
 0x135   : > { %v4906_v11 = vunpack.i.h.bf16 %v4904_v1  ;;  %v4905_v62 = vunpack.i.l.bf16 %v4904_v1  ;;  %v4909_v38 = vpop.permute.xlu0 %4908  ;;  %1821 = vmatmul.mubr.f32.gmra.mxu0 %v1437_v7 }
 0x136   : > { %v4911_v8 = vunpack.i.h.bf16 %v4909_v38  ;;  %v4910_v50 = vunpack.i.l.bf16 %v4909_v38 }
 0x137   : > { %v1502_v58 = vsel %vm1382_vm4, %v1470_v13, %v4905_v62  ;;  %v1405_v25 = vsel %vm1382_vm4, %v1372_v14, %v4906_v11 }
 0x138   : > { %v4914_v24 = vpop.permute.xlu1 %4913  ;;  %v1534_v63 = vsel %vm1415_vm5, %v1502_v58, %v4910_v50  ;;  %v1438_v20 = vsel %vm1415_vm5, %v1405_v25, %v4911_v8  ;;  %v5556_v58 = vld [vmem:[#allocation2 + $0x138] sm:$0xff] }
 0x139   : > { %v4916_v22 = vunpack.i.h.bf16 %v4914_v24  ;;  %v4915_v5 = vunpack.i.l.bf16 %v4914_v24  ;;  %v4919_v3 = vpop.permute.xlu0 %4918  ;;  %1825 = vmatprep.mubr.f32.mxu0 %v1534_v63 }
 0x13a   : > { %v4921_v43 = vunpack.i.h.bf16 %v4919_v3  ;;  %v4920_v27 = vunpack.i.l.bf16 %v4919_v3  ;;  %1826 = vmatmul.mubr.f32.gmra.mxu0 %v1438_v20 }
 0x13b   : > { %v1471_v2 = vsel %vm363_vm0, %v6772_v23, %v4915_v5  ;;  %v1373_v16 = vsel %vm363_vm0, %v5553_v18, %v4916_v22 }
 0x13c   : > { %v4924_v19 = vpop.permute.xlu1 %4923  ;;  %v1503_v35 = vsel %vm1382_vm4, %v1471_v2, %v4920_v27  ;;  %v1406_v54 = vsel %vm1382_vm4, %v1373_v16, %v4921_v43 }
 0x13d   : > { %v4926_v33 = vunpack.i.h.bf16 %v4924_v19  ;;  %v4925_v15 = vunpack.i.l.bf16 %v4924_v19  ;;  %v4929_v32 = vpop.permute.xlu0 %4928 }
 0x13e   : > { %v4931_v31 = vunpack.i.h.bf16 %v4929_v32  ;;  %v4930_v56 = vunpack.i.l.bf16 %v4929_v32 }
 0x13f   : > { %v1535_v57 = vsel %vm1415_vm5, %v1503_v35, %v4925_v15  ;;  %v1439_v44 = vsel %vm1415_vm5, %v1406_v54, %v4926_v33 }
 0x140   : > { %v4934_v39 = vpop.permute.xlu1 %4933  ;;  %1830 = vmatprep.mubr.f32.mxu0 %v1535_v57  ;;  %v1472_v23 = vsel %vm363_vm0, %v6806_v10, %v4930_v56  ;;  %v1374_v9 = vsel %vm363_vm0, %v5554_v41, %v4931_v31  ;;  %v5557_v31 = vld [vmem:[#allocation2 + $0x140] sm:$0xff] }
 0x141   : > { %v4936_v29 = vunpack.i.h.bf16 %v4934_v39  ;;  %v4935_v55 = vunpack.i.l.bf16 %v4934_v39  ;;  %v4939_v52 = vpop.permute.xlu0 %4938  ;;  %1831 = vmatmul.mubr.f32.gmra.mxu0 %v1439_v44 }
 0x142   : > { %v4941_v28 = vunpack.i.h.bf16 %v4939_v52  ;;  %v4940_v47 = vunpack.i.l.bf16 %v4939_v52 }
 0x143   : > { %v1504_v17 = vsel %vm1382_vm4, %v1472_v23, %v4935_v55  ;;  %v1407_v30 = vsel %vm1382_vm4, %v1374_v9, %v4936_v29 }
 0x144   : > { %v4944_v53 = vpop.permute.xlu1 %4943  ;;  %v1536_v34 = vsel %vm1415_vm5, %v1504_v17, %v4940_v47  ;;  %v1440_v0 = vsel %vm1415_vm5, %v1407_v30, %v4941_v28  ;;  %v5558_v47 = vld [vmem:[#allocation2 + $0x150] sm:$0xff] }
 0x145   : > { %v4946_v60 = vunpack.i.h.bf16 %v4944_v53  ;;  %v4945_v10 = vunpack.i.l.bf16 %v4944_v53  ;;  %v4949_v21 = vpop.permute.xlu0 %4948  ;;  %1835 = vmatprep.mubr.f32.mxu0 %v1536_v34 }
 0x146   : > { %v4951_v51 = vunpack.i.h.bf16 %v4949_v21  ;;  %v4950_v37 = vunpack.i.l.bf16 %v4949_v21  ;;  %1836 = vmatmul.mubr.f32.gmra.mxu0 %v1440_v0  ;;  %v8970_v0 = vmov 0.0  }
 0x147   : > { %v1473_v59 = vsel %vm363_vm0, %v6826_v49, %v4945_v10  ;;  %v1375_v48 = vsel %vm363_vm0, %v5555_v26, %v4946_v60  ;;  %v3267_v60 = vld [vmem:[%s8844_s3 + $0x70] sm:$0xff] }
 0x148   : > { %v4954_v4 = vpop.permute.xlu1 %4953  ;;  %v1505_v11 = vsel %vm1382_vm4, %v1473_v59, %v4950_v37  ;;  %v1408_v62 = vsel %vm1382_vm4, %v1375_v48, %v4951_v51  ;;  %v3266_v37 = vld [vmem:[%s8844_s3 + $0x68] sm:$0xff] }
 0x149   : > { %v4956_v7 = vunpack.i.h.bf16 %v4954_v4  ;;  %v4955_v1 = vunpack.i.l.bf16 %v4954_v4  ;;  %v4959_v13 = vpop.permute.xlu0 %4958 }
 0x14a   : > { %v4961_v46 = vunpack.i.h.bf16 %v4959_v13  ;;  %v4960_v14 = vunpack.i.l.bf16 %v4959_v13  ;;  %v3265_v13 = vld [vmem:[%s8844_s3 + $0x60] sm:$0xff] }
 0x14b   : > { %v1537_v38 = vsel %vm1415_vm5, %v1505_v11, %v4955_v1  ;;  %v1441_v8 = vsel %vm1415_vm5, %v1408_v62, %v4956_v7  ;;  %v5559_v62 = vld [vmem:[#allocation2 + $0x158] sm:$0xff] }
 0x14c   : > { %v4964_v50 = vpop.permute.xlu1 %4963  ;;  %1840 = vmatprep.mubr.f32.mxu0 %v1537_v38  ;;  %v1474_v49 = vsel %vm363_vm0, %v6851_v40, %v4960_v14  ;;  %v1376_v25 = vsel %vm363_vm0, %v5556_v58, %v4961_v46 }
 0x14d   : > { %v4966_v24 = vunpack.i.h.bf16 %v4964_v50  ;;  %v4965_v63 = vunpack.i.l.bf16 %v4964_v50  ;;  %v4969_v20 = vpop.permute.xlu0 %4968  ;;  %1841 = vmatmul.mubr.f32.gmra.mxu0 %v1441_v8  ;;  %v3264_v8 = vld [vmem:[%s8844_s3 + $0x58] sm:$0xff] }
 0x14e   : > { %v4971_v22 = vunpack.i.h.bf16 %v4969_v20  ;;  %v4970_v5 = vunpack.i.l.bf16 %v4969_v20 }
 0x14f   : > { %v1506_v3 = vsel %vm1382_vm4, %v1474_v49, %v4965_v63  ;;  %v1409_v43 = vsel %vm1382_vm4, %v1376_v25, %v4966_v24 }
 0x150   : > { %v4974_v27 = vpop.permute.xlu1 %4973  ;;  %v1538_v2 = vsel %vm1415_vm5, %v1506_v3, %v4970_v5  ;;  %v1442_v18 = vsel %vm1415_vm5, %v1409_v43, %v4971_v22  ;;  %v3262_v43 = vld [vmem:[%s8844_s3 + $0x48] sm:$0xff] }
 0x151   : > { %v4976_v16 = vunpack.i.h.bf16 %v4974_v27  ;;  %v4975_v40 = vunpack.i.l.bf16 %v4974_v27  ;;  %v4979_v19 = vpop.permute.xlu0 %4978  ;;  %1845 = vmatprep.mubr.f32.mxu0 %v1538_v2 }
 0x152   : > { %v4981_v33 = vunpack.i.h.bf16 %v4979_v19  ;;  %v4980_v15 = vunpack.i.l.bf16 %v4979_v19  ;;  %1846 = vmatmul.mubr.f32.gmra.mxu0 %v1442_v18  ;;  %v5560_v18 = vld [vmem:[#allocation2 + $0x168] sm:$0xff] }
 0x153   : > { %v1475_v32 = vsel %vm363_vm0, %v6868_v45, %v4975_v40  ;;  %v1377_v56 = vsel %vm363_vm0, %v5557_v31, %v4976_v16  ;;  %v3268_v45 = vld [vmem:[%s8844_s3 + $0x78] sm:$0xff] }
 0x154   : > { %v4984_v35 = vpop.permute.xlu1 %4983  ;;  %v1507_v41 = vsel %vm1382_vm4, %v1475_v32, %v4980_v15  ;;  %v1410_v9 = vsel %vm1382_vm4, %v1377_v56, %v4981_v33  ;;  %3361 = vmatpush1.msra.mxu1 %v3268_v45  ;;  %v3261_v15 = vld [vmem:[%s8844_s3 + $0x40] sm:$0xff] }
 0x155   : > { %v4986_v54 = vunpack.i.h.bf16 %v4984_v35  ;;  %v4985_v57 = vunpack.i.l.bf16 %v4984_v35  ;;  %v4989_v44 = vpop.permute.xlu0 %4988  ;;  %3362 = vmatprep.subr.mxu1 %v8970_v0  ;;  %v3260_v35 = vld [vmem:[%s8844_s3 + $0x38] sm:$0xff] }
 0x156   : > { %v4991_v39 = vunpack.i.h.bf16 %v4989_v44  ;;  %v4990_v23 = vunpack.i.l.bf16 %v4989_v44  ;;  %3363 = vmatpush1.msra.mxu1 %v3267_v60 }
 0x157   : > { %v1539_v29 = vsel %vm1415_vm5, %v1507_v41, %v4985_v57  ;;  %v1443_v55 = vsel %vm1415_vm5, %v1410_v9, %v4986_v54  ;;  %3364 = vmatprep.subr.mxu1 %v8970_v0  ;;  %v3259_v9 = vld [vmem:[%s8844_s3 + $0x30] sm:$0xff] }
 0x158   : > { %v4994_v52 = vpop.permute.xlu1 %4993  ;;  %1850 = vmatprep.mubr.f32.mxu0 %v1539_v29  ;;  %v1476_v28 = vsel %vm363_vm0, %v6892_v61, %v4990_v23  ;;  %v1378_v17 = vsel %vm363_vm0, %v5558_v47, %v4991_v39  ;;  %3365 = vmatpush1.msra.mxu1 %v3266_v37  ;;  %v3258_v47 = vld [vmem:[%s8844_s3 + $0x28] sm:$0xff] }
 0x159   : > { %v4996_v30 = vunpack.i.h.bf16 %v4994_v52  ;;  %v4995_v53 = vunpack.i.l.bf16 %v4994_v52  ;;  %v4999_v34 = vpop.permute.xlu0 %4998  ;;  %1851 = vmatmul.mubr.f32.gmra.mxu0 %v1443_v55  ;;  %3366 = vmatprep.subr.mxu1 %v8970_v0  ;;  %v5561_v52 = vld [vmem:[#allocation2 + $0x170] sm:$0xff]  ;;  %v3254_v37 = vld [vmem:[%s8844_s3 + $0x8] sm:$0xff] }
 0x15a   : > { %v5001_v10 = vunpack.i.h.bf16 %v4999_v34  ;;  %v5000_v21 = vunpack.i.l.bf16 %v4999_v34  ;;  %3367 = vmatpush1.msra.mxu1 %v3265_v13  ;;  %v3257_v34 = vld [vmem:[%s8844_s3 + $0x20] sm:$0xff] }
 0x15b   : > { %v1508_v51 = vsel %vm1382_vm4, %v1476_v28, %v4995_v53  ;;  %v1411_v61 = vsel %vm1382_vm4, %v1378_v17, %v4996_v30  ;;  %3368 = vmatprep.subr.mxu1 %v8970_v0 }
 0x15c   : > { %v5004_v59 = vpop.permute.xlu1 %5003  ;;  %v1540_v26 = vsel %vm1415_vm5, %v1508_v51, %v5000_v21  ;;  %v1444_v48 = vsel %vm1415_vm5, %v1411_v61, %v5001_v10  ;;  %3369 = vmatpush1.msra.mxu1 %v3264_v8  ;;  %v3256_v51 = vld [vmem:[%s8844_s3 + $0x18] sm:$0xff]  ;;  %v3255_v61 = vld [vmem:[%s8844_s3 + $0x10] sm:$0xff] }
 0x15d   : > { %v5006_v4 = vunpack.i.h.bf16 %v5004_v59  ;;  %v5005_v7 = vunpack.i.l.bf16 %v5004_v59  ;;  %v5009_v1 = vpop.permute.xlu0 %5008  ;;  %1855 = vmatprep.mubr.f32.mxu0 %v1540_v26  ;;  %3370 = vmatprep.subr.mxu1 %v8970_v0  ;;  %v3253_v59 = vld [vmem:[%s8844_s3] sm:$0xff]  ;;  %v3284_v26 = vld [vmem:[%s8844_s3 + $0xf8] sm:$0xff] }
 0x15e   : > { %v5011_v46 = vunpack.i.h.bf16 %v5009_v1  ;;  %v5010_v14 = vunpack.i.l.bf16 %v5009_v1  ;;  %1856 = vmatmul.mubr.f32.gmra.mxu0 %v1444_v48  ;;  %v4395_v48 = vpop.f32.mrf.mxu1  ;;  %v3282_v1 = vld [vmem:[%s8844_s3 + $0xe8] sm:$0xff]  ;;  %v3280_v8 = vld [vmem:[%s8844_s3 + $0xd8] sm:$0xff] }
 0x15f   : > { %v1477_v11 = vsel %vm363_vm0, %v6909_v42, %v5005_v7  ;;  %v1379_v38 = vsel %vm363_vm0, %v5559_v62, %v5006_v4  ;;  %v3263_v42 = vld [vmem:[%s8844_s3 + $0x50] sm:$0xff]  ;;  %v7241_v7 = vld [vmem:[%s8843_s2] ss:$0 sm:$0xff] }
 0x160   : > { %v5014_v50 = vpop.permute.xlu1 %5013  ;;  %v1509_v20 = vsel %vm1382_vm4, %v1477_v11, %v5010_v14  ;;  %v1412_v22 = vsel %vm1382_vm4, %v1379_v38, %v5011_v46  ;;  %3371 = vmatpush1.msra.mxu1 %v3263_v42  ;;  %v3283_v4 = vld [vmem:[%s8844_s3 + $0xf0] sm:$0xff]  ;;  %v1942_v46 = vpop.f32.mrf.mxu1  ;;  %v3281_v11 = vld [vmem:[%s8844_s3 + $0xe0] sm:$0xff] }
 0x161   : > { %v5016_v49 = vunpack.i.h.bf16 %v5014_v50  ;;  %v5015_v58 = vunpack.i.l.bf16 %v5014_v50  ;;  %v5019_v25 = vpop.permute.xlu0 %5018  ;;  %3372 = vmatprep.subr.mxu1 %v8970_v0  ;;  %v3279_v42 = vld [vmem:[%s8844_s3 + $0xd0] sm:$0xff] }
 0x162   : > { %v5021_v24 = vunpack.i.h.bf16 %v5019_v25  ;;  %v5020_v63 = vunpack.i.l.bf16 %v5019_v25  ;;  %3373 = vmatpush1.msra.mxu1 %v3262_v43 }
 0x163   : > { %v1541_v5 = vsel %vm1415_vm5, %v1509_v20, %v5015_v58  ;;  %v1445_v3 = vsel %vm1415_vm5, %v1412_v22, %v5016_v49  ;;  %3374 = vmatprep.subr.mxu1 %v8970_v0  ;;  %v4398_v49 = vpop.f32.mrf.mxu1  ;;  %v3278_v20 = vld [vmem:[%s8844_s3 + $0xc8] sm:$0xff] }
 0x164   : > { %v5024_v27 = vpop.permute.xlu1 %5023  ;;  %1860 = vmatprep.mubr.f32.mxu0 %v1541_v5  ;;  %v1478_v2 = vsel %vm363_vm0, %v6933_v36, %v5020_v63  ;;  %v1380_v16 = vsel %vm363_vm0, %v5560_v18, %v5021_v24  ;;  %3375 = vmatpush1.msra.mxu1 %v3261_v15  ;;  %v7271_v18 = vld [vmem:[#allocation2 + $0x8] sm:$0xff] }
 0x165   : > { %v5026_v40 = vunpack.i.h.bf16 %v5024_v27  ;;  %v5025_v19 = vunpack.i.l.bf16 %v5024_v27  ;;  %v5029_v33 = vpop.permute.xlu0 %5028  ;;  %1861 = vmatmul.mubr.f32.gmra.mxu0 %v1445_v3  ;;  %3376 = vmatprep.subr.mxu1 %v8970_v0  ;;  %v1952_v5 = vpop.f32.mrf.mxu1  ;;  %v3277_v27 = vld [vmem:[%s8844_s3 + $0xc0] sm:$0xff] }
 0x166   : > { %v5031_v32 = vunpack.i.h.bf16 %v5029_v33  ;;  %v5030_v31 = vunpack.i.l.bf16 %v5029_v33  ;;  %3377 = vmatpush1.msra.mxu1 %v3260_v35  ;;  %v3276_v33 = vld [vmem:[%s8844_s3 + $0xb8] sm:$0xff]  ;;  %v2268_v35 = vrot.slane %v7271_v18, 1 }
 0x167   : > { %v1510_v56 = vsel %vm1382_vm4, %v1478_v2, %v5025_v19  ;;  %v1413_v36 = vsel %vm1382_vm4, %v1380_v16, %v5026_v40  ;;  %3378 = vmatprep.subr.mxu1 %v8970_v0  ;;  %v2167_v40 = vld [vmem:[#allocation2 + $0x10] sm:$0x3]  ;;  %v7274_v19 = vld [vmem:[#allocation2] sm:$0xff] }
 0x168   : > { %v5034_v54 = vpop.permute.xlu1 %5033  ;;  %v1542_v57 = vsel %vm1415_vm5, %v1510_v56, %v5030_v31  ;;  %v1446_v44 = vsel %vm1415_vm5, %v1413_v36, %v5031_v32  ;;  %3379 = vmatpush1.msra.mxu1 %v3259_v9  ;;  %v3275_v31 = vld [vmem:[%s8844_s3 + $0xb0] sm:$0xff]  ;;  %v4401_v36 = vpop.f32.mrf.mxu1  ;;  %v2443_v9 = vrot.slane %v7274_v19, 2 }
 0x169   : > { %v5036_v39 = vunpack.i.h.bf16 %v5034_v54  ;;  %v5035_v23 = vunpack.i.l.bf16 %v5034_v54  ;;  %v5039_v41 = vpop.permute.xlu0 %5038  ;;  %1865 = vmatprep.mubr.f32.mxu0 %v1542_v57  ;;  %3380 = vmatprep.subr.mxu1 %v8970_v0  ;;  %v2270_v54 = vrot.slane %v2167_v40, 1  ;;  %v2267_v57 = vrot.slane %v7274_v19, 1 }
 0x16a   : > { %v5041_v29 = vunpack.i.h.bf16 %v5039_v41  ;;  %v5040_v55 = vunpack.i.l.bf16 %v5039_v41  ;;  %1866 = vmatmul.mubr.f32.gmra.mxu0 %v1446_v44  ;;  %3381 = vmatpush1.msra.mxu1 %v3258_v47 }
 0x16b   : > { %v1479_v45 = vsel %vm363_vm0, %v6949_v6, %v5035_v23  ;;  %v1381_v28 = vsel %vm363_vm0, %v5561_v52, %v5036_v39  ;;  %3382 = vmatprep.subr.mxu1 %v8970_v0  ;;  %v3274_v39 = vld [vmem:[%s8844_s3 + $0xa8] sm:$0xff]  ;;  %v1962_v52 = vpop.f32.mrf.mxu1 }
 0x16c   : > { %v5044_v17 = vpop.permute.xlu1 %5043  ;;  %v1511_v6 = vsel %vm1382_vm4, %v1479_v45, %v5040_v55  ;;  %v1414_v60 = vsel %vm1382_vm4, %v1381_v28, %v5041_v29  ;;  %3383 = vmatpush1.msra.mxu1 %v3257_v34  ;;  %v3273_v29 = vld [vmem:[%s8844_s3 + $0xa0] sm:$0xff] }
 0x16d   : > { %v5046_v30 = vunpack.i.h.bf16 %v5044_v17  ;;  %v5045_v53 = vunpack.i.l.bf16 %v5044_v17  ;;  %3384 = vmatprep.subr.mxu1 %v8970_v0  ;;  %v2271_v17 = vsel %vm554_vm3, %v2268_v35, %v2270_v54 }
 0x16e   : > { %3385 = vmatpush1.msra.mxu1 %v3256_v51  ;;  %v3272_v51 = vld [vmem:[%s8844_s3 + $0x98] sm:$0xff] }
 0x16f   : > { %v1543_v10 = vsel %vm1415_vm5, %v1511_v6, %v5045_v53  ;;  %v1447_v21 = vsel %vm1415_vm5, %v1414_v60, %v5046_v30  ;;  %3386 = vmatprep.subr.mxu1 %v8970_v0  ;;  %v2269_v30 = vsel %vm554_vm3, %v2267_v57, %v2268_v35  ;;  %v2444_v53 = vrot.slane %v7271_v18, 2 }
 0x170   : > { %1870 = vmatprep.mubr.f32.mxu0 %v1543_v10  ;;  %3387 = vmatpush1.msra.mxu1 %v3255_v61 }
 0x171   : > { %1871 = vmatmul.mubr.f32.gmra.mxu0 %v1447_v21  ;;  %3388 = vmatprep.subr.mxu1 %v8970_v0 }
 0x172   : > { %3389 = vmatpush1.msra.mxu1 %v3254_v37  ;;  %v2446_v37 = vrot.slane %v2167_v40, 2 }
 0x173   : > { %3390 = vmatprep.subr.mxu1 %v8970_v0 }
 0x174   : > { %3391 = vmatpush1.msra.mxu1 %v3253_v59 }
 0x175   : > { %3392 = vmatprep.subr.mxu1 %v8970_v0 }
 0x176   : > { %3393 = vmatpush2.msra.mxu1 %v3284_v26 }
 0x177   : > { %3394 = vmatprep.subr.mxu1 %v8970_v0 }
 0x178   : > { %3395 = vmatpush2.msra.mxu1 %v3283_v4 }
 0x179   : > { %3396 = vmatprep.subr.mxu1 %v8970_v0 }
 0x17a   : > { %3397 = vmatpush2.msra.mxu1 %v3282_v1  ;;  %v3271_v1 = vld [vmem:[%s8844_s3 + $0x90] sm:$0xff] }
 0x17b   : > { %v1717_v13 = vpop.f32.mrf.mxu0  ;;  %3398 = vmatprep.subr.mxu1 %v8970_v0 }
 0x17c   : > { %v1718_v14 = vadd.f32 %v7241_v7, %v1717_v13  ;;  %3399 = vmatpush2.msra.mxu1 %v3281_v11  ;;  %v3270_v11 = vld [vmem:[%s8844_s3 + $0x88] sm:$0xff] }
 0x17d   : > { %v1719_v62 = vpop.f32.mrf.mxu0  ;;  %3400 = vmatprep.subr.mxu1 %v8970_v0 }
 0x17e   : > { %v1943_v38 = vadd.f32 %v1942_v46, %v1718_v14  ;;  %3401 = vmatpush2.msra.mxu1 %v3280_v8  ;;  %v2445_v14 = vsel %vm731_vm2, %v2443_v9, %v2444_v53 }
 0x17f   : > { %v1722_v50 = vpop.f32.mrf.mxu0  ;;  %3402 = vmatprep.subr.mxu1 %v8970_v0 }
 0x180   : > { %v2101_v58 = vmax.f32 %v1943_v38, 0.0  ;;  %v1723_v25 = vadd.f32 %v7241_v7, %v1722_v50  ;;  %3403 = vmatpush2.msra.mxu1 %v3279_v42  ;;  %v2447_v38 = vsel %vm731_vm2, %v2444_v53, %v2446_v37 }
 0x181   : > { %v1724_v24 = vpop.f32.mrf.mxu0  ;;  %3404 = vmatprep.subr.mxu1 %v8970_v0 }
 0x182   : > { %2133 = vst.msk [vmem:[#allocation2 + $0x19] sm:$0xff] %vm363_vm0, %v2101_v58  ;;  %v1948_v63 = vadd.f32 %v4395_v48, %v1723_v25  ;;  %3405 = vmatpush2.msra.mxu1 %v3278_v20  ;;  %v3269_v58 = vld [vmem:[%s8844_s3 + $0x80] sm:$0xff] }
 0x183   : > { %v1727_v22 = vpop.f32.mrf.mxu0  ;;  %3406 = vmatprep.subr.mxu1 %v8970_v0 }
 0x184   : > { %v2102_v3 = vmax.f32 %v1948_v63, 0.0  ;;  %v1728_v43 = vadd.f32 %v7241_v7, %v1727_v22  ;;  %3407 = vmatpush2.msra.mxu1 %v3277_v27 }
 0x185   : > { %v1729_v2 = vpop.f32.mrf.mxu0  ;;  %3408 = vmatprep.subr.mxu1 %v8970_v0 }
 0x186   : > { %2134 = vst.msk [vmem:[#allocation2 + $0x21] sm:$0xff] %vm363_vm0, %v2102_v3  ;;  %v1953_v16 = vadd.f32 %v1952_v5, %v1728_v43  ;;  %3409 = vmatpush2.msra.mxu1 %v3276_v33 }
 0x187   : > { %3410 = vmatprep.subr.mxu1 %v8970_v0 }
 0x188   : > { %v2103_v15 = vmax.f32 %v1953_v16, 0.0  ;;  %3411 = vmatpush2.msra.mxu1 %v3275_v31 }
 0x189   : > { %v1732_v32 = vpop.f32.mrf.mxu0  ;;  %3412 = vmatprep.subr.mxu1 %v8970_v0  ;;  %v7292_v41 = vld [vmem:[#allocation2 + $0x18] sm:$0xff] }
 0x18a   : > { %v1733_v56 = vadd.f32 %v7241_v7, %v1732_v32  ;;  %2135 = vst.msk [vmem:[#allocation2 + $0x31] sm:$0xff] %vm363_vm0, %v2103_v15  ;;  %3413 = vmatpush2.msra.mxu1 %v3274_v39  ;;  %v2448_v10 = vrot.slane %v7292_v41, 2 }
 0x18b   : > { %v1734_v44 = vpop.f32.mrf.mxu0  ;;  %3414 = vmatprep.subr.mxu1 %v8970_v0 }
 0x18c   : > { %v1958_v23 = vadd.f32 %v4398_v49, %v1733_v56  ;;  %3415 = vmatpush2.msra.mxu1 %v3273_v29  ;;  %v4404_v49 = vpop.f32.mrf.mxu1  ;;  %v2272_v44 = vrot.slane %v7292_v41, 1 }
 0x18d   : > { %v7299_v28 = vld [vmem:[#allocation2 + $0x20] sm:$0xff]  ;;  %v7301_v47 = vld [vmem:[#allocation2 + $0x28] sm:$0x3]  ;;  %3416 = vmatprep.subr.mxu1 %v8970_v0 }
 0x18e   : > { %v2104_v55 = vmax.f32 %v1958_v23, 0.0  ;;  %v1737_v45 = vpop.f32.mrf.mxu0  ;;  %v2449_v6 = vrot.slane %v7299_v28, 2  ;;  %v2451_v60 = vrot.slane %v7301_v47, 2  ;;  %3417 = vmatpush2.msra.mxu1 %v3272_v51  ;;  %v2275_v18 = vrot.slane %v7301_v47, 1  ;;  %v1972_v15 = vpop.f32.mrf.mxu1 }
 0x18f   : > { %v1738_v34 = vadd.f32 %v7241_v7, %v1737_v45  ;;  %3418 = vmatprep.subr.mxu1 %v8970_v0  ;;  %v2273_v56 = vrot.slane %v7299_v28, 1 }
 0x190   : > { %2136 = vst.msk [vmem:[#allocation2 + $0x39] sm:$0xff] %vm363_vm0, %v2104_v55  ;;  %v1739_v21 = vpop.f32.mrf.mxu0  ;;  %v7316_v59 = vsel %vm731_vm2, %v2449_v6, %v2451_v60  ;;  %v7319_v26 = vsel %vm731_vm2, %v2448_v10, %v2449_v6  ;;  %3419 = vmatpush2.msra.mxu1 %v3271_v1  ;;  %v4407_v47 = vpop.f32.mrf.mxu1 }
 0x191   : > { %v1963_v61 = vadd.f32 %v1962_v52, %v1738_v34  ;;  %v5052_v48 = vpack.i.bf16 %v2271_v17, %v7316_v59  ;;  %v5047_v4 = vpack.i.bf16 %v2269_v30, %v7319_v26  ;;  %v7327_v46 = vld [vmem:[#allocation2 + $0x30] sm:$0xff]  ;;  %3420 = vmatprep.subr.mxu1 %v8970_v0  ;;  %v7382_v23 = vsel %vm554_vm3, %v2272_v44, %v2273_v56 }
 0x192   : > { %v5057_v50 = vpack.i.bf16 %v2445_v14, %v7327_v46  ;;  %3421 = vmatpush2.msra.mxu1 %v3270_v11  ;;  %v2453_v24 = vrot.slane %v7327_v46, 2  ;;  %v2277_v2 = vrot.slane %v7327_v46, 1  ;;  %v7385_v29 = vsel %vm554_vm3, %v2273_v56, %v2275_v18  ;;  %v1982_v1 = vpop.f32.mrf.mxu1 }
 0x193   : > { %v2105_v13 = vmax.f32 %v1963_v61, 0.0  ;;  %5053 = vrot.lane.b32.xlu1 %v5052_v48, %s5661_s29  ;;  %5048 = vrot.lane.b32.xlu0 %v5047_v4, %s5661_s29 }
 0x194   : > { %3422 = vmatprep.subr.mxu1 %v8970_v0 }
 0x195   : > { %2137 = vst.msk [vmem:[#allocation2 + $0x49] sm:$0xff] %vm363_vm0, %v2105_v13  ;;  %v1742_v62 = vpop.f32.mrf.mxu0  ;;  %3423 = vmatpush2.msra.mxu1 %v3269_v58 }
 0x196   : > { %v1743_v8 = vadd.f32 %v7241_v7, %v1742_v62  ;;  %4513 = vmatprep.subr.mxu1 %v7047_v12 }
 0x197   : > { %v1744_v25 = vpop.f32.mrf.mxu0  ;;  %v7343_v42 = vld [vmem:[#allocation2 + $0x38] sm:$0xff]  ;;  %v2173_v63 = vld [vmem:[#allocation2 + $0x40] sm:$0x3]  ;;  %5058 = vrot.lane.b32.xlu1 %v5057_v50, %s5659_s21 }
 0x198   : > { %v1968_v20 = vadd.f32 %v4401_v36, %v1743_v8  ;;  %v5062_v22 = vpack.i.bf16 %v2447_v38, %v7343_v42  ;;  %v2454_v5 = vrot.slane %v7343_v42, 2  ;;  %v2456_v3 = vrot.slane %v2173_v63, 2 }
 0x199   : > { %v2278_v43 = vrot.slane %v7343_v42, 1  ;;  %v2280_v27 = vrot.slane %v2173_v63, 1 }
 0x19a   : > { %v2106_v16 = vmax.f32 %v1968_v20, 0.0  ;;  %v1747_v40 = vpop.f32.mrf.mxu0  ;;  %5063 = vrot.lane.b32.xlu0 %v5062_v22, %s5659_s21  ;;  %v7356_v33 = vsel %vm731_vm2, %v2453_v24, %v2454_v5  ;;  %v7359_v32 = vsel %vm731_vm2, %v2454_v5, %v2456_v3 }
 0x19b   : > { %v1748_v31 = vadd.f32 %v7241_v7, %v1747_v40  ;;  %4449 = vmatprep.mubr.msk.f32.mxu0 %vm363_vm0, %v7356_v33  ;;  %v7366_v12 = vsel %vm554_vm3, %v2278_v43, %v2280_v27  ;;  %v7369_v36 = vsel %vm554_vm3, %v2277_v2, %v2278_v43  ;;  %v5077_v45 = vpack.i.bf16 %v7382_v23, %v7356_v33 }
 0x19c   : > { %2138 = vst.msk [vmem:[#allocation2 + $0x51] sm:$0xff] %vm363_vm0, %v2106_v16  ;;  %v1749_v35 = vpop.f32.mrf.mxu0  ;;  %4450 = vmatmul.mubr.msk.f32.vlgmr.msra.gmra.mxu0 %vm363_vm0, %v7359_v32  ;;  %v5072_v54 = vpack.i.bf16 %v7299_v28, %v7366_v12  ;;  %v5067_v57 = vpack.i.bf16 %v7292_v41, %v7369_v36  ;;  %v7387_v55 = vld [vmem:[#allocation2 + $0x48] sm:$0xff]  ;;  %v5082_v41 = vpack.i.bf16 %v7385_v29, %v7359_v32 }
 0x19d   : > { %v1973_v39 = vadd.f32 %v1972_v15, %v1748_v31  ;;  %v5087_v17 = vpack.i.bf16 %v7319_v26, %v7387_v55  ;;  %v2458_v34 = vrot.slane %v7387_v55, 2  ;;  %v2282_v13 = vrot.slane %v7387_v55, 1 }
 0x19e   : > { %5073 = vrot.lane.b32.xlu1 %v5072_v54, %s5660_s26  ;;  %5068 = vrot.lane.b32.xlu0 %v5067_v57, %s5660_s26 }
 0x19f   : > { %v2107_v9 = vmax.f32 %v1973_v39, 0.0 }
 0x1a1   : > { %2139 = vst.msk [vmem:[#allocation2 + $0x61] sm:$0xff] %vm363_vm0, %v2107_v9  ;;  %v1752_v52 = vpop.f32.mrf.mxu0 }
 0x1a2   : > { %v1753_v28 = vadd.f32 %v7241_v7, %v1752_v52  ;;  %5083 = vrot.lane.b32.xlu1 %v5082_v41, %s5661_s29  ;;  %5078 = vrot.lane.b32.xlu0 %v5077_v45, %s5661_s29 }
 0x1a3   : > { %v1754_v30 = vpop.f32.mrf.mxu0  ;;  %v7399_v53 = vld [vmem:[#allocation2 + $0x50] sm:$0xff]  ;;  %v2176_v6 = vld [vmem:[#allocation2 + $0x58] sm:$0x3] }
 0x1a4   : > { %v1978_v60 = vadd.f32 %v4404_v49, %v1753_v28  ;;  %v5092_v10 = vpack.i.bf16 %v7316_v59, %v7399_v53  ;;  %v2459_v21 = vrot.slane %v7399_v53, 2  ;;  %v2285_v51 = vrot.slane %v2176_v6, 1 }
 0x1a5   : > { %v2461_v61 = vrot.slane %v2176_v6, 2  ;;  %v2283_v37 = vrot.slane %v7399_v53, 1 }
 0x1a6   : > { %v2108_v48 = vmax.f32 %v1978_v60, 0.0  ;;  %5088 = vrot.lane.b32.xlu1 %v5087_v17, %s5659_s21  ;;  %v1757_v26 = vpop.f32.mrf.mxu0  ;;  %5093 = vrot.lane.b32.xlu0 %v5092_v10, %s5659_s21  ;;  %v7409_v4 = vsel %vm731_vm2, %v2458_v34, %v2459_v21 }
 0x1a7   : > { %v1758_v59 = vadd.f32 %v7241_v7, %v1757_v26  ;;  %4452 = vmatprep.mubr.msk.f32.mxu0 %vm363_vm0, %v7409_v4  ;;  %v7416_v14 = vsel %vm731_vm2, %v2459_v21, %v2461_v61  ;;  %v7419_v11 = vsel %vm554_vm3, %v2283_v37, %v2285_v51  ;;  %v7427_v8 = vsel %vm554_vm3, %v2282_v13, %v2283_v37 }
 0x1a8   : > { %2140 = vst.msk [vmem:[#allocation2 + $0x69] sm:$0xff] %vm363_vm0, %v2108_v48  ;;  %v1759_v62 = vpop.f32.mrf.mxu0  ;;  %4453 = vmatmul.mubr.msk.f32.gmra.mxu0 %vm363_vm0, %v7416_v14  ;;  %v5102_v38 = vpack.i.bf16 %v7343_v42, %v7419_v11  ;;  %v5097_v49 = vpack.i.bf16 %v7327_v46, %v7427_v8  ;;  %v5112_v25 = vpack.i.bf16 %v7366_v12, %v7416_v14  ;;  %v7435_v24 = vld [vmem:[#allocation2 + $0x60] sm:$0xff]  ;;  %v4410_v46 = vpop.f32.mrf.mxu1 }
 0x1a9   : > { %v1983_v50 = vadd.f32 %v1982_v1, %v1758_v59  ;;  %v5107_v42 = vpack.i.bf16 %v7369_v36, %v7409_v4  ;;  %v5117_v5 = vpack.i.bf16 %v7356_v33, %v7435_v24  ;;  %v2463_v43 = vrot.slane %v7435_v24, 2 }
 0x1aa   : > { %5103 = vrot.lane.b32.xlu1 %v5102_v38, %s5660_s26  ;;  %5098 = vrot.lane.b32.xlu0 %v5097_v49, %s5660_s26  ;;  %v1992_v54 = vpop.f32.mrf.mxu1  ;;  %v2287_v57 = vrot.slane %v7435_v24, 1 }
 0x1ab   : > { %v2109_v58 = vmax.f32 %v1983_v50, 0.0 }
 0x1ac   : > { %v4413_v60 = vpop.f32.mrf.mxu1 }
 0x1ad   : > { %2141 = vst.msk [vmem:[#allocation2 + $0x79] sm:$0xff] %vm363_vm0, %v2109_v58  ;;  %v1762_v63 = vpop.f32.mrf.mxu0 }
 0x1ae   : > { %v1763_v20 = vadd.f32 %v7241_v7, %v1762_v63  ;;  %5113 = vrot.lane.b32.xlu1 %v5112_v25, %s5661_s29  ;;  %5108 = vrot.lane.b32.xlu0 %v5107_v42, %s5661_s29  ;;  %v2002_v49 = vpop.f32.mrf.mxu1 }
 0x1af   : > { %v1764_v22 = vpop.f32.mrf.mxu0  ;;  %v7445_v3 = vld [vmem:[#allocation2 + $0x68] sm:$0xff]  ;;  %v2179_v27 = vld [vmem:[#allocation2 + $0x70] sm:$0x3] }
 0x1b0   : > { %v1988_v2 = vadd.f32 %v4407_v47, %v1763_v20  ;;  %v5122_v18 = vpack.i.bf16 %v7359_v32, %v7445_v3  ;;  %v2464_v16 = vrot.slane %v7445_v3, 2  ;;  %v2290_v40 = vrot.slane %v2179_v27, 1 }
 0x1b1   : > { %v2466_v15 = vrot.slane %v2179_v27, 2  ;;  %v2288_v31 = vrot.slane %v7445_v3, 1 }
 0x1b2   : > { %v2110_v56 = vmax.f32 %v1988_v2, 0.0  ;;  %5118 = vrot.lane.b32.xlu1 %v5117_v5, %s5659_s21  ;;  %v1767_v35 = vpop.f32.mrf.mxu0  ;;  %v7454_v33 = vsel %vm731_vm2, %v2463_v43, %v2464_v16  ;;  %5123 = vrot.lane.b32.xlu0 %v5122_v18, %s5659_s21 }
 0x1b3   : > { %v1768_v44 = vadd.f32 %v7241_v7, %v1767_v35  ;;  %4455 = vmatprep.mubr.msk.f32.mxu0 %vm363_vm0, %v7454_v33  ;;  %v7462_v32 = vsel %vm731_vm2, %v2464_v16, %v2466_v15  ;;  %v7468_v9 = vsel %vm554_vm3, %v2288_v31, %v2290_v40  ;;  %v7471_v45 = vsel %vm554_vm3, %v2287_v57, %v2288_v31  ;;  %v4416_v16 = vpop.f32.mrf.mxu1 }
 0x1b4   : > { %2142 = vst.msk [vmem:[#allocation2 + $0x81] sm:$0xff] %vm363_vm0, %v2110_v56  ;;  %v1769_v39 = vpop.f32.mrf.mxu0  ;;  %4456 = vmatmul.mubr.msk.f32.gmra.mxu0 %vm363_vm0, %v7462_v32  ;;  %v5132_v52 = vpack.i.bf16 %v7399_v53, %v7468_v9  ;;  %v5127_v28 = vpack.i.bf16 %v7387_v55, %v7471_v45  ;;  %v7479_v17 = vld [vmem:[#allocation2 + $0x78] sm:$0xff]  ;;  %v5137_v30 = vpack.i.bf16 %v7427_v8, %v7454_v33 }
 0x1b5   : > { %v1993_v41 = vadd.f32 %v1992_v54, %v1768_v44  ;;  %v5142_v34 = vpack.i.bf16 %v7419_v11, %v7462_v32  ;;  %v2468_v21 = vrot.slane %v7479_v17, 2  ;;  %v5147_v1 = vpack.i.bf16 %v7409_v4, %v7479_v17 }
 0x1b6   : > { %5133 = vrot.lane.b32.xlu1 %v5132_v52, %s5660_s26  ;;  %5128 = vrot.lane.b32.xlu0 %v5127_v28, %s5660_s26  ;;  %v2292_v58 = vrot.slane %v7479_v17, 1 }
 0x1b7   : > { %v2111_v47 = vmax.f32 %v1993_v41, 0.0 }
 0x1b9   : > { %2143 = vst.msk [vmem:[#allocation2 + $0x91] sm:$0xff] %vm363_vm0, %v2111_v47  ;;  %v1772_v6 = vpop.f32.mrf.mxu0 }
 0x1ba   : > { %v1773_v53 = vadd.f32 %v7241_v7, %v1772_v6  ;;  %5143 = vrot.lane.b32.xlu1 %v5142_v34, %s5661_s29  ;;  %5138 = vrot.lane.b32.xlu0 %v5137_v30, %s5661_s29  ;;  %v2012_v30 = vpop.f32.mrf.mxu1 }
 0x1bb   : > { %v1774_v55 = vpop.f32.mrf.mxu0  ;;  %v7489_v10 = vld [vmem:[#allocation2 + $0x80] sm:$0xff]  ;;  %v2182_v51 = vld [vmem:[#allocation2 + $0x88] sm:$0x3] }
 0x1bc   : > { %v1998_v61 = vadd.f32 %v4410_v46, %v1773_v53  ;;  %v5152_v37 = vpack.i.bf16 %v7416_v14, %v7489_v10  ;;  %v2469_v48 = vrot.slane %v7489_v10, 2  ;;  %v2295_v26 = vrot.slane %v2182_v51, 1 }
 0x1bd   : > { %v2471_v13 = vrot.slane %v2182_v51, 2  ;;  %v2293_v59 = vrot.slane %v7489_v10, 1 }
 0x1be   : > { %v2112_v62 = vmax.f32 %v1998_v61, 0.0  ;;  %v1777_v38 = vpop.f32.mrf.mxu0  ;;  %v7499_v50 = vsel %vm731_vm2, %v2468_v21, %v2469_v48  ;;  %5148 = vrot.lane.b32.xlu1 %v5147_v1, %s5659_s21  ;;  %5153 = vrot.lane.b32.xlu0 %v5152_v37, %s5659_s21 }
 0x1bf   : > { %v1778_v14 = vadd.f32 %v7241_v7, %v1777_v38  ;;  %v7506_v25 = vsel %vm731_vm2, %v2469_v48, %v2471_v13  ;;  %4458 = vmatprep.mubr.msk.f32.mxu0 %vm363_vm0, %v7499_v50  ;;  %v7512_v42 = vsel %vm554_vm3, %v2293_v59, %v2295_v26  ;;  %v7515_v63 = vsel %vm554_vm3, %v2292_v58, %v2293_v59  ;;  %v4419_v13 = vpop.f32.mrf.mxu1 }
 0x1c0   : > { %2144 = vst.msk [vmem:[#allocation2 + $0x99] sm:$0xff] %vm363_vm0, %v2112_v62  ;;  %v1779_v4 = vpop.f32.mrf.mxu0  ;;  %4459 = vmatmul.mubr.msk.f32.gmra.mxu0 %vm363_vm0, %v7506_v25  ;;  %v5162_v46 = vpack.i.bf16 %v7445_v3, %v7512_v42  ;;  %v5157_v22 = vpack.i.bf16 %v7435_v24, %v7515_v63  ;;  %v7525_v43 = vld [vmem:[#allocation2 + $0x90] sm:$0xff]  ;;  %v5167_v27 = vpack.i.bf16 %v7471_v45, %v7499_v50 }
 0x1c1   : > { %v2003_v20 = vadd.f32 %v2002_v49, %v1778_v14  ;;  %v5172_v2 = vpack.i.bf16 %v7468_v9, %v7506_v25  ;;  %v2473_v15 = vrot.slane %v7525_v43, 2  ;;  %v5177_v44 = vpack.i.bf16 %v7454_v33, %v7525_v43 }
 0x1c2   : > { %5163 = vrot.lane.b32.xlu1 %v5162_v46, %s5660_s26  ;;  %5158 = vrot.lane.b32.xlu0 %v5157_v22, %s5660_s26  ;;  %v2297_v34 = vrot.slane %v7525_v43, 1 }
 0x1c3   : > { %v2113_v5 = vmax.f32 %v2003_v20, 0.0 }
 0x1c5   : > { %2145 = vst.msk [vmem:[#allocation2 + $0xa9] sm:$0xff] %vm363_vm0, %v2113_v5  ;;  %v1782_v18 = vpop.f32.mrf.mxu0 }
 0x1c6   : > { %v1783_v3 = vadd.f32 %v7241_v7, %v1782_v18  ;;  %5173 = vrot.lane.b32.xlu1 %v5172_v2, %s5661_s29  ;;  %5168 = vrot.lane.b32.xlu0 %v5167_v27, %s5661_s29  ;;  %v2022_v18 = vpop.f32.mrf.mxu1 }
 0x1c7   : > { %v1784_v24 = vpop.f32.mrf.mxu0  ;;  %v7535_v40 = vld [vmem:[#allocation2 + $0x98] sm:$0xff]  ;;  %v2185_v31 = vld [vmem:[#allocation2 + $0xa0] sm:$0x3] }
 0x1c8   : > { %v2008_v56 = vadd.f32 %v4413_v60, %v1783_v3  ;;  %v5182_v35 = vpack.i.bf16 %v7462_v32, %v7535_v40  ;;  %v2474_v54 = vrot.slane %v7535_v40, 2  ;;  %v2300_v57 = vrot.slane %v2185_v31, 1 }
 0x1c9   : > { %v2476_v39 = vrot.slane %v2185_v31, 2  ;;  %v2298_v41 = vrot.slane %v7535_v40, 1 }
 0x1ca   : > { %v2114_v52 = vmax.f32 %v2008_v56, 0.0  ;;  %v1787_v28 = vpop.f32.mrf.mxu0  ;;  %v7545_v47 = vsel %vm731_vm2, %v2473_v15, %v2474_v54  ;;  %5178 = vrot.lane.b32.xlu1 %v5177_v44, %s5659_s21  ;;  %5183 = vrot.lane.b32.xlu0 %v5182_v35, %s5659_s21 }
 0x1cb   : > { %v1788_v32 = vadd.f32 %v7241_v7, %v1787_v28  ;;  %v7552_v6 = vsel %vm731_vm2, %v2474_v54, %v2476_v39  ;;  %4461 = vmatprep.mubr.msk.f32.mxu0 %vm363_vm0, %v7545_v47  ;;  %v7558_v53 = vsel %vm554_vm3, %v2298_v41, %v2300_v57  ;;  %v7561_v60 = vsel %vm554_vm3, %v2297_v34, %v2298_v41 }
 0x1cc   : > { %2146 = vst.msk [vmem:[#allocation2 + $0xb1] sm:$0xff] %vm363_vm0, %v2114_v52  ;;  %v1789_v33 = vpop.f32.mrf.mxu0  ;;  %4462 = vmatmul.mubr.msk.f32.gmra.mxu0 %vm363_vm0, %v7552_v6  ;;  %v5192_v21 = vpack.i.bf16 %v7489_v10, %v7558_v53  ;;  %v5187_v51 = vpack.i.bf16 %v7479_v17, %v7561_v60  ;;  %v7571_v37 = vld [vmem:[#allocation2 + $0xa8] sm:$0xff]  ;;  %v5197_v48 = vpack.i.bf16 %v7515_v63, %v7545_v47  ;;  %v4422_v52 = vpop.f32.mrf.mxu1 }
 0x1cd   : > { %v2013_v55 = vadd.f32 %v2012_v30, %v1788_v32  ;;  %v5202_v26 = vpack.i.bf16 %v7512_v42, %v7552_v6  ;;  %v2478_v62 = vrot.slane %v7571_v37, 2  ;;  %v5207_v20 = vpack.i.bf16 %v7499_v50, %v7571_v37 }
 0x1ce   : > { %5193 = vrot.lane.b32.xlu1 %v5192_v21, %s5660_s26  ;;  %5188 = vrot.lane.b32.xlu0 %v5187_v51, %s5660_s26  ;;  %v2302_v3 = vrot.slane %v7571_v37, 1 }
 0x1cf   : > { %v2115_v61 = vmax.f32 %v2013_v55, 0.0 }
 0x1d1   : > { %2147 = vst.msk [vmem:[#allocation2 + $0xc1] sm:$0xff] %vm363_vm0, %v2115_v61  ;;  %v1792_v1 = vpop.f32.mrf.mxu0 }
 0x1d2   : > { %v1793_v10 = vadd.f32 %v7241_v7, %v1792_v1  ;;  %5203 = vrot.lane.b32.xlu1 %v5202_v26, %s5661_s29  ;;  %5198 = vrot.lane.b32.xlu0 %v5197_v48, %s5661_s29 }
 0x1d3   : > { %v1794_v17 = vpop.f32.mrf.mxu0  ;;  %v7581_v59 = vld [vmem:[#allocation2 + $0xb0] sm:$0xff]  ;;  %v2188_v38 = vld [vmem:[#allocation2 + $0xb8] sm:$0x3] }
 0x1d4   : > { %v2018_v49 = vadd.f32 %v4416_v16, %v1793_v10  ;;  %v5212_v58 = vpack.i.bf16 %v7506_v25, %v7581_v59  ;;  %v2479_v14 = vrot.slane %v7581_v59, 2  ;;  %v2305_v4 = vrot.slane %v2188_v38, 1  ;;  %v2032_v17 = vpop.f32.mrf.mxu1 }
 0x1d5   : > { %v2481_v46 = vrot.slane %v2188_v38, 2  ;;  %v2303_v22 = vrot.slane %v7581_v59, 1 }
 0x1d6   : > { %v2116_v5 = vmax.f32 %v2018_v49, 0.0  ;;  %v1797_v27 = vpop.f32.mrf.mxu0  ;;  %v7591_v2 = vsel %vm731_vm2, %v2478_v62, %v2479_v14  ;;  %5208 = vrot.lane.b32.xlu1 %v5207_v20, %s5659_s21  ;;  %5213 = vrot.lane.b32.xlu0 %v5212_v58, %s5659_s21 }
 0x1d7   : > { %v1798_v25 = vadd.f32 %v7241_v7, %v1797_v27  ;;  %v7598_v16 = vsel %vm731_vm2, %v2479_v14, %v2481_v46  ;;  %4464 = vmatprep.mubr.msk.f32.mxu0 %vm363_vm0, %v7591_v2  ;;  %v7604_v24 = vsel %vm554_vm3, %v2303_v22, %v2305_v4  ;;  %v7607_v15 = vsel %vm554_vm3, %v2302_v3, %v2303_v22 }
 0x1d8   : > { %2148 = vst.msk [vmem:[#allocation2 + $0xc9] sm:$0xff] %vm363_vm0, %v2116_v5  ;;  %v1799_v50 = vpop.f32.mrf.mxu0  ;;  %4465 = vmatmul.mubr.msk.f32.gmra.mxu0 %vm363_vm0, %v7598_v16  ;;  %v5222_v56 = vpack.i.bf16 %v7535_v40, %v7604_v24  ;;  %v5217_v35 = vpack.i.bf16 %v7525_v43, %v7607_v15  ;;  %v7617_v57 = vld [vmem:[#allocation2 + $0xc0] sm:$0xff]  ;;  %v5227_v44 = vpack.i.bf16 %v7561_v60, %v7591_v2 }
 0x1d9   : > { %v2023_v31 = vadd.f32 %v2022_v18, %v1798_v25  ;;  %v5232_v39 = vpack.i.bf16 %v7558_v53, %v7598_v16  ;;  %v2483_v30 = vrot.slane %v7617_v57, 2  ;;  %v5237_v51 = vpack.i.bf16 %v7545_v47, %v7617_v57  ;;  %v4425_v18 = vpop.f32.mrf.mxu1 }
 0x1da   : > { %5223 = vrot.lane.b32.xlu1 %v5222_v56, %s5660_s26  ;;  %5218 = vrot.lane.b32.xlu0 %v5217_v35, %s5660_s26 }
 0x1db   : > { %v2117_v54 = vmax.f32 %v2023_v31, 0.0 }
 0x1dd   : > { %2149 = vst.msk [vmem:[#allocation2 + $0xd9] sm:$0xff] %vm363_vm0, %v2117_v54  ;;  %v1802_v41 = vpop.f32.mrf.mxu0 }
 0x1de   : > { %v1803_v40 = vadd.f32 %v7241_v7, %v1802_v41  ;;  %5233 = vrot.lane.b32.xlu1 %v5232_v39, %s5661_s29  ;;  %5228 = vrot.lane.b32.xlu0 %v5227_v44, %s5661_s29 }
 0x1df   : > { %v1804_v43 = vpop.f32.mrf.mxu0  ;;  %v7627_v28 = vld [vmem:[#allocation2 + $0xc8] sm:$0xff]  ;;  %v2191_v34 = vld [vmem:[#allocation2 + $0xd0] sm:$0x3] }
 0x1e0   : > { %v2028_v32 = vadd.f32 %v4419_v13, %v1803_v40  ;;  %v5242_v33 = vpack.i.bf16 %v7552_v6, %v7627_v28  ;;  %v2484_v55 = vrot.slane %v7627_v28, 2  ;;  %v2310_v21 = vrot.slane %v2191_v34, 1 }
 0x1e1   : > { %v2486_v61 = vrot.slane %v2191_v34, 2  ;;  %v2308_v48 = vrot.slane %v7627_v28, 1  ;;  %v2307_v13 = vrot.slane %v7617_v57, 1  ;;  %v2042_v34 = vpop.f32.mrf.mxu1 }
 0x1e2   : > { %v2118_v26 = vmax.f32 %v2028_v32, 0.0  ;;  %v1807_v1 = vpop.f32.mrf.mxu0  ;;  %v7637_v10 = vsel %vm731_vm2, %v2483_v30, %v2484_v55  ;;  %5238 = vrot.lane.b32.xlu1 %v5237_v51, %s5659_s21  ;;  %5243 = vrot.lane.b32.xlu0 %v5242_v33, %s5659_s21 }
 0x1e3   : > { %v1808_v6 = vadd.f32 %v7241_v7, %v1807_v1  ;;  %v7644_v62 = vsel %vm731_vm2, %v2484_v55, %v2486_v61  ;;  %4467 = vmatprep.mubr.msk.f32.mxu0 %vm363_vm0, %v7637_v10  ;;  %v7650_v38 = vsel %vm554_vm3, %v2308_v48, %v2310_v21  ;;  %v7653_v49 = vsel %vm554_vm3, %v2307_v13, %v2308_v48 }
 0x1e4   : > { %2150 = vst.msk [vmem:[#allocation2 + $0xe1] sm:$0xff] %vm363_vm0, %v2118_v26  ;;  %v1809_v47 = vpop.f32.mrf.mxu0  ;;  %4468 = vmatmul.mubr.msk.f32.gmra.mxu0 %vm363_vm0, %v7644_v62  ;;  %v5252_v14 = vpack.i.bf16 %v7581_v59, %v7650_v38  ;;  %v5247_v4 = vpack.i.bf16 %v7571_v37, %v7653_v49  ;;  %v7663_v46 = vld [vmem:[#allocation2 + $0xd8] sm:$0xff]  ;;  %v5257_v22 = vpack.i.bf16 %v7607_v15, %v7637_v10 }
 0x1e5   : > { %v2033_v58 = vadd.f32 %v2032_v17, %v1808_v6  ;;  %v5262_v5 = vpack.i.bf16 %v7604_v24, %v7644_v62  ;;  %v2488_v25 = vrot.slane %v7663_v46, 2  ;;  %v5267_v44 = vpack.i.bf16 %v7591_v2, %v7663_v46  ;;  %v4428_v6 = vpop.f32.mrf.mxu1 }
 0x1e6   : > { %5253 = vrot.lane.b32.xlu1 %v5252_v14, %s5660_s26  ;;  %5248 = vrot.lane.b32.xlu0 %v5247_v4, %s5660_s26 }
 0x1e7   : > { %v2119_v20 = vmax.f32 %v2033_v58, 0.0 }
 0x1e9   : > { %2151 = vst.msk [vmem:[#allocation2 + $0xf1] sm:$0xff] %vm363_vm0, %v2119_v20  ;;  %v1812_v27 = vpop.f32.mrf.mxu0 }
 0x1ea   : > { %v1813_v59 = vadd.f32 %v7241_v7, %v1812_v27  ;;  %5263 = vrot.lane.b32.xlu1 %v5262_v5, %s5661_s29  ;;  %5258 = vrot.lane.b32.xlu0 %v5257_v22, %s5661_s29 }
 0x1eb   : > { %v1814_v37 = vpop.f32.mrf.mxu0  ;;  %v7673_v3 = vld [vmem:[#allocation2 + $0xe0] sm:$0xff]  ;;  %v2194_v50 = vld [vmem:[#allocation2 + $0xe8] sm:$0x3] }
 0x1ec   : > { %v2038_v31 = vadd.f32 %v4422_v52, %v1813_v59  ;;  %v5272_v56 = vpack.i.bf16 %v7598_v16, %v7673_v3  ;;  %v2489_v35 = vrot.slane %v7673_v3, 2  ;;  %v2315_v54 = vrot.slane %v2194_v50, 1 }
 0x1ed   : > { %v2491_v39 = vrot.slane %v2194_v50, 2  ;;  %v2313_v41 = vrot.slane %v7673_v3, 1  ;;  %v2312_v52 = vrot.slane %v7663_v46, 1 }
 0x1ee   : > { %v2120_v40 = vmax.f32 %v2038_v31, 0.0  ;;  %v1817_v43 = vpop.f32.mrf.mxu0  ;;  %v7683_v30 = vsel %vm731_vm2, %v2488_v25, %v2489_v35  ;;  %5268 = vrot.lane.b32.xlu1 %v5267_v44, %s5659_s21  ;;  %5273 = vrot.lane.b32.xlu0 %v5272_v56, %s5659_s21  ;;  %v2052_v56 = vpop.f32.mrf.mxu1 }
 0x1ef   : > { %v1818_v16 = vadd.f32 %v7241_v7, %v1817_v43  ;;  %v7690_v32 = vsel %vm731_vm2, %v2489_v35, %v2491_v39  ;;  %4470 = vmatprep.mubr.msk.f32.mxu0 %vm363_vm0, %v7683_v30  ;;  %v7696_v33 = vsel %vm554_vm3, %v2313_v41, %v2315_v54  ;;  %v7699_v55 = vsel %vm554_vm3, %v2312_v52, %v2313_v41 }
 0x1f0   : > { %2152 = vst.msk [vmem:[#allocation2 + $0xf9] sm:$0xff] %vm363_vm0, %v2120_v40  ;;  %v1819_v2 = vpop.f32.mrf.mxu0  ;;  %4471 = vmatmul.mubr.msk.f32.gmra.mxu0 %vm363_vm0, %v7690_v32  ;;  %v5282_v51 = vpack.i.bf16 %v7627_v28, %v7696_v33  ;;  %v5277_v61 = vpack.i.bf16 %v7617_v57, %v7699_v55  ;;  %v7709_v26 = vld [vmem:[#allocation2 + $0xf0] sm:$0xff]  ;;  %v5287_v1 = vpack.i.bf16 %v7653_v49, %v7683_v30 }
 0x1f1   : > { %v2043_v21 = vadd.f32 %v2042_v34, %v1818_v16  ;;  %v5292_v17 = vpack.i.bf16 %v7650_v38, %v7690_v32  ;;  %v2493_v58 = vrot.slane %v7709_v26, 2  ;;  %v5297_v27 = vpack.i.bf16 %v7637_v10, %v7709_v26 }
 0x1f2   : > { %5283 = vrot.lane.b32.xlu1 %v5282_v51, %s5660_s26  ;;  %5278 = vrot.lane.b32.xlu0 %v5277_v61, %s5660_s26 }
 0x1f3   : > { %v2121_v48 = vmax.f32 %v2043_v21, 0.0 }
 0x1f5   : > { %2153 = vst.msk [vmem:[#allocation2 + $0x109] sm:$0xff] %vm363_vm0, %v2121_v48  ;;  %v1822_v13 = vpop.f32.mrf.mxu0 }
 0x1f6   : > { %v1823_v28 = vadd.f32 %v7241_v7, %v1822_v13  ;;  %5293 = vrot.lane.b32.xlu1 %v5292_v17, %s5661_s29  ;;  %5288 = vrot.lane.b32.xlu0 %v5287_v1, %s5661_s29 }
 0x1f7   : > { %v1824_v57 = vpop.f32.mrf.mxu0  ;;  %v7719_v47 = vld [vmem:[#allocation2 + $0xf8] sm:$0xff]  ;;  %v2197_v14 = vld [vmem:[#allocation2 + $0x100] sm:$0x3] }
 0x1f8   : > { %v2048_v4 = vadd.f32 %v4425_v18, %v1823_v28  ;;  %v5302_v20 = vpack.i.bf16 %v7644_v62, %v7719_v47  ;;  %v2494_v22 = vrot.slane %v7719_v47, 2  ;;  %v2320_v5 = vrot.slane %v2197_v14, 1 }
 0x1f9   : > { %v2496_v59 = vrot.slane %v2197_v14, 2  ;;  %v2318_v37 = vrot.slane %v7719_v47, 1  ;;  %v2317_v18 = vrot.slane %v7709_v26, 1 }
 0x1fa   : > { %v2122_v25 = vmax.f32 %v2048_v4, 0.0  ;;  %v1827_v50 = vpop.f32.mrf.mxu0  ;;  %v7729_v31 = vsel %vm731_vm2, %v2493_v58, %v2494_v22  ;;  %5298 = vrot.lane.b32.xlu1 %v5297_v27, %s5659_s21  ;;  %5303 = vrot.lane.b32.xlu0 %v5302_v20, %s5659_s21 }
 0x1fb   : > { %v1828_v62 = vadd.f32 %v7241_v7, %v1827_v50  ;;  %v7736_v35 = vsel %vm731_vm2, %v2494_v22, %v2496_v59  ;;  %4473 = vmatprep.mubr.msk.f32.mxu0 %vm363_vm0, %v7729_v31  ;;  %v7742_v54 = vsel %vm554_vm3, %v2318_v37, %v2320_v5  ;;  %v7745_v44 = vsel %vm554_vm3, %v2317_v18, %v2318_v37 }
 0x1fc   : > { %2154 = vst.msk [vmem:[#allocation2 + $0x111] sm:$0xff] %vm363_vm0, %v2122_v25  ;;  %v1829_v10 = vpop.f32.mrf.mxu0  ;;  %4474 = vmatmul.mubr.msk.f32.gmra.mxu0 %vm363_vm0, %v7736_v35  ;;  %v5312_v41 = vpack.i.bf16 %v7673_v3, %v7742_v54  ;;  %v5307_v40 = vpack.i.bf16 %v7663_v46, %v7745_v44  ;;  %v7755_v34 = vld [vmem:[#allocation2 + $0x108] sm:$0xff]  ;;  %v5317_v52 = vpack.i.bf16 %v7699_v55, %v7729_v31  ;;  %v7762_v3 = vpop.f32.mrf.mxu1 }
 0x1fd   : > { %v2053_v39 = vadd.f32 %v2052_v56, %v1828_v62  ;;  %v5322_v16 = vpack.i.bf16 %v7696_v33, %v7736_v35  ;;  %v2498_v61 = vrot.slane %v7755_v34, 2  ;;  %v5327_v57 = vpack.i.bf16 %v7683_v30, %v7755_v34 }
 0x1fe   : > { %5313 = vrot.lane.b32.xlu1 %v5312_v41, %s5660_s26  ;;  %5308 = vrot.lane.b32.xlu0 %v5307_v40, %s5660_s26  ;;  %v2062_v58 = vpop.f32.mrf.mxu1  ;;  %v2322_v30 = vrot.slane %v7755_v34, 1 }
 0x1ff   : > { %v2123_v43 = vmax.f32 %v2053_v39, 0.0 }
 0x201   : > { %2155 = vst.msk [vmem:[#allocation2 + $0x121] sm:$0xff] %vm363_vm0, %v2123_v43  ;;  %v1832_v2 = vpop.f32.mrf.mxu0 }
 0x202   : > { %v1833_v46 = vadd.f32 %v7241_v7, %v1832_v2  ;;  %5323 = vrot.lane.b32.xlu1 %v5322_v16, %s5661_s29  ;;  %5318 = vrot.lane.b32.xlu0 %v5317_v52, %s5661_s29 }
 0x203   : > { %v1834_v21 = vpop.f32.mrf.mxu0  ;;  %v7767_v51 = vld [vmem:[#allocation2 + $0x110] sm:$0xff]  ;;  %v2200_v48 = vld [vmem:[#allocation2 + $0x118] sm:$0x3] }
 0x204   : > { %v2058_v1 = vadd.f32 %v4428_v6, %v1833_v46  ;;  %v5332_v17 = vpack.i.bf16 %v7690_v32, %v7767_v51  ;;  %v2499_v13 = vrot.slane %v7767_v51, 2  ;;  %v2325_v28 = vrot.slane %v2200_v48, 1 }
 0x205   : > { %v2501_v14 = vrot.slane %v2200_v48, 2  ;;  %v2323_v4 = vrot.slane %v7767_v51, 1  ;;  %v7776_v5 = vpop.permute.xlu1 %5053  ;;  %v5049_v6 = vpop.permute.xlu0 %5048 }
 0x206   : > { %v2124_v20 = vmax.f32 %v2058_v1, 0.0  ;;  %v1837_v22 = vpop.f32.mrf.mxu0  ;;  %v7779_v27 = vsel %vm731_vm2, %v2498_v61, %v2499_v13  ;;  %5328 = vrot.lane.b32.xlu1 %v5327_v57, %s5659_s21  ;;  %5333 = vrot.lane.b32.xlu0 %v5332_v17, %s5659_s21  ;;  %v5051_v50 = vunpack.i.h.bf16 %v5049_v6  ;;  %v5055_v62 = vunpack.i.l.bf16 %v7776_v5  ;;  %v7823_v1 = vld [vmem:[%s8843_s2] ss:$0 sm:$0xff] }
 0x207   : > { %v1838_v32 = vadd.f32 %v7241_v7, %v1837_v22  ;;  %4476 = vmatprep.mubr.msk.f32.mxu0 %vm363_vm0, %v7779_v27  ;;  %v7789_v37 = vsel %vm731_vm2, %v2499_v13, %v2501_v14  ;;  %v7792_v25 = vsel %vm554_vm3, %v2323_v4, %v2325_v28  ;;  %v7799_v18 = vsel %vm554_vm3, %v2322_v30, %v2323_v4  ;;  %v7826_v13 = vpop.f32.mrf.mxu1 }
 0x208   : > { %2156 = vst.msk [vmem:[#allocation2 + $0x129] sm:$0xff] %vm363_vm0, %v2124_v20  ;;  %v1839_v59 = vpop.f32.mrf.mxu0  ;;  %4477 = vmatmul.mubr.msk.f32.gmra.mxu0 %vm363_vm0, %v7789_v37  ;;  %v5342_v7 = vpack.i.bf16 %v7719_v47, %v7792_v25  ;;  %v5050_v10 = vunpack.i.l.bf16 %v5049_v6  ;;  %v5337_v41 = vpack.i.bf16 %v7709_v26, %v7799_v18  ;;  %v7804_v40 = vld [vmem:[#allocation2 + $0x120] sm:$0xff]  ;;  %v5056_v16 = vunpack.i.h.bf16 %v7776_v5  ;;  %v5565_v5 = vld [vmem:[%s8844_s3 + $0x110] sm:$0xff] }
 0x209   : > { %v2063_v56 = vadd.f32 %v2062_v58, %v1838_v32  ;;  %v5059_v39 = vpop.permute.xlu1 %5058  ;;  %v5347_v47 = vpack.i.bf16 %v7745_v44, %v7779_v27  ;;  %v3061_v46 = vsel %vm363_vm0, %v7274_v19, %v5051_v50  ;;  %v5352_v26 = vpack.i.bf16 %v7742_v54, %v7789_v37 }
 0x20a   : > { %5343 = vrot.lane.b32.xlu1 %v5342_v7, %s5660_s26  ;;  %v5061_v52 = vunpack.i.h.bf16 %v5059_v39  ;;  %5338 = vrot.lane.b32.xlu0 %v5337_v41, %s5660_s26  ;;  %v5060_v21 = vunpack.i.l.bf16 %v5059_v39  ;;  %v5357_v48 = vpack.i.bf16 %v7729_v31, %v7804_v40  ;;  %v3157_v19 = vsel %vm363_vm0, %v7382_v23, %v5050_v10 }
 0x20b   : > { %v2125_v43 = vmax.f32 %v2063_v56, 0.0  ;;  %v2327_v28 = vrot.slane %v7804_v40, 1  ;;  %v3158_v57 = vsel %vm363_vm0, %v7385_v29, %v5055_v62  ;;  %v2503_v32 = vrot.slane %v7804_v40, 2 }
 0x20c   : > { %v7811_v2 = vpop.permute.xlu0 %5063  ;;  %v3093_v58 = vsel %vm1382_vm4, %v3061_v46, %v5061_v52  ;;  %v3189_v10 = vsel %vm1382_vm4, %v3157_v19, %v5060_v21 }
 0x20d   : > { %2157 = vst.msk [vmem:[#allocation2 + $0x139] sm:$0xff] %vm363_vm0, %v2125_v43  ;;  %v1842_v61 = vpop.f32.mrf.mxu0  ;;  %v5066_v31 = vunpack.i.h.bf16 %v7811_v2  ;;  %v5065_v14 = vunpack.i.l.bf16 %v7811_v2  ;;  %v2072_v43 = vpop.f32.mrf.mxu1 }
 0x20e   : > { %v1843_v17 = vadd.f32 %v7823_v1, %v1842_v61  ;;  %5353 = vrot.lane.b32.xlu1 %v5352_v26, %s5661_s29  ;;  %5348 = vrot.lane.b32.xlu0 %v5347_v47, %s5661_s29 }
 0x20f   : > { %v1844_v4 = vpop.f32.mrf.mxu0  ;;  %v7837_v20 = vld [vmem:[#allocation2 + $0x128] sm:$0xff]  ;;  %v2203_v22 = vld [vmem:[#allocation2 + $0x130] sm:$0x3]  ;;  %v3190_v19 = vsel %vm1382_vm4, %v3158_v57, %v5065_v14  ;;  %v5564_v57 = vld [vmem:[%s8844_s3 + $0x118] sm:$0xff] }
 0x210   : > { %v2068_v23 = vadd.f32 %v7762_v3, %v1843_v17  ;;  %v5074_v6 = vpop.permute.xlu1 %5073  ;;  %v5069_v29 = vpop.permute.xlu0 %5068  ;;  %v5362_v30 = vpack.i.bf16 %v7736_v35, %v7837_v20  ;;  %v2328_v59 = vrot.slane %v7837_v20, 1  ;;  %v2330_v50 = vrot.slane %v2203_v22, 1 }
 0x211   : > { %v5075_v56 = vunpack.i.l.bf16 %v5074_v6  ;;  %v5071_v7 = vunpack.i.h.bf16 %v5069_v29  ;;  %v5070_v62 = vunpack.i.l.bf16 %v5069_v29  ;;  %v2504_v47 = vrot.slane %v7837_v20, 2  ;;  %v5563_v29 = vld [vmem:[#allocation2 + $0x8] sm:$0xff] }
 0x212   : > { %v2126_v39 = vmax.f32 %v2068_v23, 0.0  ;;  %v1847_v41 = vpop.f32.mrf.mxu0  ;;  %v7847_v3 = vsel %vm554_vm3, %v2328_v59, %v2330_v50  ;;  %v7850_v52 = vsel %vm554_vm3, %v2327_v28, %v2328_v59  ;;  %5358 = vrot.lane.b32.xlu1 %v5357_v48, %s5659_s21  ;;  %v5076_v21 = vunpack.i.h.bf16 %v5074_v6  ;;  %5363 = vrot.lane.b32.xlu0 %v5362_v30, %s5659_s21 }
 0x213   : > { %v1848_v35 = vadd.f32 %v7823_v1, %v1847_v41  ;;  %v3221_v2 = vsel %vm1415_vm5, %v3189_v10, %v5070_v62  ;;  %v5372_v46 = vpack.i.bf16 %v7767_v51, %v7847_v3  ;;  %v3125_v26 = vsel %vm1415_vm5, %v3093_v58, %v5071_v7 }
 0x214   : > { %2158 = vst.msk [vmem:[#allocation2 + $0x141] sm:$0xff] %vm363_vm0, %v2126_v39  ;;  %v7861_v61 = vpop.permute.xlu1 %5083  ;;  %v1849_v17 = vpop.f32.mrf.mxu0  ;;  %3424 = vmatprep.mubr.f32.mxu1 %v3221_v2  ;;  %v5367_v48 = vpack.i.bf16 %v7755_v34, %v7850_v52  ;;  %v2506_v28 = vrot.slane %v2203_v22, 2  ;;  %v3222_v51 = vsel %vm1415_vm5, %v3190_v19, %v5075_v56  ;;  %v3062_v30 = vsel %vm363_vm0, %v5563_v29, %v5056_v16  ;;  %v7882_v56 = vld [vmem:[#allocation2 + $0x138] sm:$0xff] }
 0x215   : > { %v2073_v4 = vadd.f32 %v2072_v43, %v1848_v35  ;;  %v5079_v23 = vpop.permute.xlu0 %5078  ;;  %3425 = vmatmul.mubr.f32.vlgmr.msra.gmra.mxu1 %v3125_v26  ;;  %v7874_v34 = vsel %vm731_vm2, %v2503_v32, %v2504_v47  ;;  %v5085_v14 = vunpack.i.l.bf16 %v7861_v61  ;;  %v3094_v50 = vsel %vm1382_vm4, %v3062_v30, %v5066_v31  ;;  %v7900_v35 = vpop.f32.mrf.mxu1 }
 0x216   : > { %v5080_v58 = vunpack.i.l.bf16 %v5079_v23  ;;  %3429 = vmatprep.mubr.f32.mxu1 %v3222_v51  ;;  %v7868_v6 = vsel %vm731_vm2, %v2504_v47, %v2506_v28  ;;  %4517 = vmatpush3.msra.mxu1 %v5564_v57  ;;  %v5081_v59 = vunpack.i.h.bf16 %v5079_v23  ;;  %v3126_v32 = vsel %vm1415_vm5, %v3094_v50, %v5076_v21  ;;  %v5566_v28 = vld [vmem:[#allocation2 + $0x18] sm:$0xff] }
 0x217   : > { %v2127_v22 = vmax.f32 %v2073_v4, 0.0  ;;  %5373 = vrot.lane.b32.xlu1 %v5372_v46, %s5660_s26  ;;  %4514 = vmatprep.subr.mxu1 %v5565_v5  ;;  %v5086_v7 = vunpack.i.h.bf16 %v7861_v61  ;;  %v5382_v39 = vpack.i.bf16 %v7792_v25, %v7868_v6  ;;  %v5377_v41 = vpack.i.bf16 %v7799_v18, %v7874_v34 }
 0x218   : > { %5368 = vrot.lane.b32.xlu0 %v5367_v48, %s5660_s26  ;;  %v5089_v16 = vpop.permute.xlu1 %5088  ;;  %v5387_v47 = vpack.i.bf16 %v7779_v27, %v7882_v56  ;;  %v3159_v2 = vsel %vm363_vm0, %v7369_v36, %v5080_v58  ;;  %v2332_v46 = vrot.slane %v7882_v56, 1  ;;  %4518 = vmatpush3.msra.mxu1 %v5565_v5  ;;  %v3063_v27 = vsel %vm363_vm0, %v5566_v28, %v5081_v59  ;;  %v5567_v36 = vld [vmem:[%s8844_s3 + $0x108] sm:$0xff]  ;;  %v5568_v59 = vld [vmem:[%s8844_s3 + $0x100] sm:$0xff] }
 0x219   : > { %2159 = vst.msk [vmem:[#allocation2 + $0x151] sm:$0xff] %vm363_vm0, %v2127_v22  ;;  %v5090_v62 = vunpack.i.l.bf16 %v5089_v16  ;;  %v7891_v10 = vpop.permute.xlu0 %5093  ;;  %v1852_v31 = vpop.f32.mrf.mxu0  ;;  %3430 = vmatmul.mubr.f32.gmra.mxu1 %v3126_v32  ;;  %v5091_v26 = vunpack.i.h.bf16 %v5089_v16  ;;  %v3160_v4 = vsel %vm363_vm0, %v7366_v12, %v5085_v14  ;;  %4515 = vmatprep.subr.mxu1 %v5567_v36 }
 0x21a   : > { %v1853_v43 = vadd.f32 %v7823_v1, %v1852_v31  ;;  %v5096_v21 = vunpack.i.h.bf16 %v7891_v10  ;;  %4519 = vmatpush3.msra.mxu1 %v5567_v36  ;;  %v5095_v12 = vunpack.i.l.bf16 %v7891_v10  ;;  %v2082_v32 = vpop.f32.mrf.mxu1 }
 0x21b   : > { %5383 = vrot.lane.b32.xlu1 %v5382_v39, %s5661_s29  ;;  %v1854_v17 = vpop.f32.mrf.mxu0  ;;  %v7907_v48 = vld [vmem:[#allocation2 + $0x140] sm:$0xff]  ;;  %v2206_v19 = vld [vmem:[#allocation2 + $0x148] sm:$0x3]  ;;  %v3191_v22 = vsel %vm1382_vm4, %v3159_v2, %v5090_v62  ;;  %4516 = vmatprep.subr.mxu1 %v5568_v59 }
 0x21c   : > { %v2078_v23 = vadd.f32 %v7826_v13, %v1853_v43  ;;  %5378 = vrot.lane.b32.xlu0 %v5377_v41, %s5661_s29  ;;  %v7917_v51 = vpop.permute.xlu1 %5103  ;;  %v5392_v58 = vpack.i.bf16 %v7789_v37, %v7907_v48  ;;  %v2333_v29 = vrot.slane %v7907_v48, 1  ;;  %v2335_v30 = vrot.slane %v2206_v19, 1  ;;  %4520 = vmatpush3.msra.mxu1 %v5568_v59  ;;  %v5569_v59 = vld [vmem:[#allocation2 + $0x20] sm:$0xff] }
 0x21d   : > { %v5105_v57 = vunpack.i.l.bf16 %v7917_v51  ;;  %v5099_v14 = vpop.permute.xlu0 %5098  ;;  %v2509_v13 = vrot.slane %v7907_v48, 2  ;;  %v3095_v41 = vsel %vm1382_vm4, %v3063_v27, %v5091_v26  ;;  %4497 = vmatprep.subr.mxu1 %v8970_v0 }
 0x21e   : > { %v2128_v50 = vmax.f32 %v2078_v23, 0.0  ;;  %v5101_v37 = vunpack.i.h.bf16 %v5099_v14  ;;  %v5100_v5 = vunpack.i.l.bf16 %v5099_v14  ;;  %v1857_v16 = vpop.f32.mrf.mxu0  ;;  %v7930_v31 = vsel %vm554_vm3, %v2333_v29, %v2335_v30 }
 0x21f   : > { %5388 = vrot.lane.b32.xlu1 %v5387_v47, %s5659_s21  ;;  %v1858_v62 = vadd.f32 %v7823_v1, %v1857_v16  ;;  %v5402_v39 = vpack.i.bf16 %v7837_v20, %v7930_v31  ;;  %v7938_v43 = vsel %vm554_vm3, %v2332_v46, %v2333_v29  ;;  %v2511_v20 = vrot.slane %v2206_v19, 2 }
 0x220   : > { %2160 = vst.msk [vmem:[#allocation2 + $0x159] sm:$0xff] %vm363_vm0, %v2128_v50  ;;  %5393 = vrot.lane.b32.xlu0 %v5392_v58, %s5659_s21  ;;  %v7942_v2 = vpop.permute.xlu1 %5113  ;;  %v1859_v17 = vpop.f32.mrf.mxu0  ;;  %v3223_v28 = vsel %vm1415_vm5, %v3191_v22, %v5100_v5  ;;  %v3127_v47 = vsel %vm1415_vm5, %v3095_v41, %v5101_v37  ;;  %v5397_v36 = vpack.i.bf16 %v7804_v40, %v7938_v43  ;;  %v5106_v46 = vunpack.i.h.bf16 %v7917_v51  ;;  %v7956_v40 = vld [vmem:[#allocation2 + $0x150] sm:$0xff] }
 0x221   : > { %v2083_v26 = vadd.f32 %v2082_v32, %v1858_v62  ;;  %v5109_v27 = vpop.permute.xlu0 %5108  ;;  %3434 = vmatprep.mubr.f32.mxu1 %v3223_v28  ;;  %v3192_v23 = vsel %vm1382_vm4, %v3160_v4, %v5095_v12  ;;  %v2508_v58 = vrot.slane %v7882_v56, 2  ;;  %v7954_v22 = vsel %vm731_vm2, %v2509_v13, %v2511_v20  ;;  %v5570_v41 = vld [vmem:[#allocation2 + $0x30] sm:$0xff] }
 0x222   : > { %v5111_v29 = vunpack.i.h.bf16 %v5109_v27  ;;  %v5110_v30 = vunpack.i.l.bf16 %v5109_v27  ;;  %3435 = vmatmul.mubr.f32.gmra.mxu1 %v3127_v47  ;;  %v3224_v14 = vsel %vm1415_vm5, %v3192_v23, %v5105_v57  ;;  %v5115_v19 = vunpack.i.l.bf16 %v7942_v2 }
 0x223   : > { %v2129_v51 = vmax.f32 %v2083_v26, 0.0  ;;  %5403 = vrot.lane.b32.xlu1 %v5402_v39, %s5660_s26  ;;  %3439 = vmatprep.mubr.f32.mxu1 %v3224_v14  ;;  %v3064_v4 = vsel %vm363_vm0, %v5569_v59, %v5086_v7  ;;  %v7964_v12 = vsel %vm731_vm2, %v2508_v58, %v2509_v13  ;;  %v5116_v57 = vunpack.i.h.bf16 %v7942_v2 }
 0x224   : > { %5398 = vrot.lane.b32.xlu0 %v5397_v36, %s5660_s26  ;;  %v5119_v50 = vpop.permute.xlu1 %5118  ;;  %v3096_v37 = vsel %vm1382_vm4, %v3064_v4, %v5096_v21  ;;  %v5412_v7 = vpack.i.bf16 %v7847_v3, %v7954_v22  ;;  %v5417_v32 = vpack.i.bf16 %v7874_v34, %v7956_v40  ;;  %v5407_v10 = vpack.i.bf16 %v7850_v52, %v7964_v12  ;;  %v7982_v21 = vpop.f32.mrf.mxu1 }
 0x225   : > { %2161 = vst.msk [vmem:[#allocation2 + $0x169] sm:$0xff] %vm363_vm0, %v2129_v51  ;;  %v5121_v5 = vunpack.i.h.bf16 %v5119_v50  ;;  %v7972_v16 = vpop.permute.xlu0 %5123  ;;  %v1862_v61 = vpop.f32.mrf.mxu0  ;;  %v3128_v13 = vsel %vm1415_vm5, %v3096_v37, %v5106_v46  ;;  %v3161_v39 = vsel %vm363_vm0, %v7427_v8, %v5110_v30  ;;  %v3065_v17 = vsel %vm363_vm0, %v5570_v41, %v5111_v29 }
 0x226   : > { %v1863_v62 = vadd.f32 %v7823_v1, %v1862_v61  ;;  %3440 = vmatmul.mubr.f32.gmra.mxu1 %v3128_v13  ;;  %v5120_v28 = vunpack.i.l.bf16 %v5119_v50  ;;  %v5126_v47 = vunpack.i.h.bf16 %v7972_v16  ;;  %v2337_v26 = vrot.slane %v7956_v40, 1  ;;  %v2092_v61 = vpop.f32.mrf.mxu1 }
 0x227   : > { %5413 = vrot.lane.b32.xlu1 %v5412_v7, %s5661_s29  ;;  %v1864_v36 = vpop.f32.mrf.mxu0  ;;  %v7989_v20 = vld [vmem:[#allocation2 + $0x158] sm:$0xff]  ;;  %v2209_v46 = vld [vmem:[#allocation2 + $0x160] sm:$0x3]  ;;  %v3162_v27 = vsel %vm363_vm0, %v7419_v11, %v5115_v19  ;;  %v5125_v30 = vunpack.i.l.bf16 %v7972_v16  ;;  %v3097_v59 = vsel %vm1382_vm4, %v3065_v17, %v5121_v5  ;;  %v2513_v11 = vrot.slane %v7956_v40, 2 }
 0x228   : > { %v2088_v23 = vadd.f32 %v7900_v35, %v1863_v62  ;;  %5408 = vrot.lane.b32.xlu0 %v5407_v10, %s5661_s29  ;;  %v5422_v8 = vpack.i.bf16 %v7868_v6, %v7989_v20  ;;  %v2338_v58 = vrot.slane %v7989_v20, 1  ;;  %v2340_v29 = vrot.slane %v2209_v46, 1  ;;  %v5134_v14 = vpop.permute.xlu1 %5133 }
 0x229   : > { %v5129_v51 = vpop.permute.xlu0 %5128  ;;  %v2514_v4 = vrot.slane %v7989_v20, 2  ;;  %v5135_v35 = vunpack.i.l.bf16 %v5134_v14  ;;  %v2516_v7 = vrot.slane %v2209_v46, 2  ;;  %v3193_v41 = vsel %vm1382_vm4, %v3161_v39, %v5120_v28  ;;  %v5571_v28 = vld [vmem:[#allocation2 + $0x38] sm:$0xff] }
 0x22a   : > { %v2130_v19 = vmax.f32 %v2088_v23, 0.0  ;;  %v5131_v50 = vunpack.i.h.bf16 %v5129_v51  ;;  %v1867_v37 = vpop.f32.mrf.mxu0  ;;  %v5130_v13 = vunpack.i.l.bf16 %v5129_v51  ;;  %v8006_v16 = vsel %vm554_vm3, %v2338_v58, %v2340_v29 }
 0x22b   : > { %5418 = vrot.lane.b32.xlu1 %v5417_v32, %s5659_s21  ;;  %v1868_v62 = vadd.f32 %v7823_v1, %v1867_v37  ;;  %v8009_v5 = vsel %vm554_vm3, %v2337_v26, %v2338_v58  ;;  %v5432_v17 = vpack.i.bf16 %v7907_v48, %v8006_v16  ;;  %v5136_v46 = vunpack.i.h.bf16 %v5134_v14 }
 0x22c   : > { %2162 = vst.msk [vmem:[#allocation2 + $0x171] sm:$0xff] %vm363_vm0, %v2130_v19  ;;  %5423 = vrot.lane.b32.xlu0 %v5422_v8, %s5659_s21  ;;  %v1869_v10 = vpop.f32.mrf.mxu0  ;;  %v3129_v32 = vsel %vm1415_vm5, %v3097_v59, %v5131_v50  ;;  %v5427_v36 = vpack.i.bf16 %v7882_v56, %v8009_v5  ;;  %v8019_v23 = vpop.permute.xlu1 %5143  ;;  %v3225_v29 = vsel %vm1415_vm5, %v3193_v41, %v5130_v13  ;;  %v8030_v14 = vld [vmem:[#allocation2 + $0x168] sm:$0xff] }
 0x22d   : > { %v2093_v26 = vadd.f32 %v2092_v61, %v1868_v62  ;;  %v5139_v58 = vpop.permute.xlu0 %5138  ;;  %v3194_v8 = vsel %vm1382_vm4, %v3162_v27, %v5125_v30  ;;  %3444 = vmatprep.mubr.f32.mxu1 %v3225_v29  ;;  %v8025_v48 = vsel %vm731_vm2, %v2514_v4, %v2516_v7  ;;  %v3066_v56 = vsel %vm363_vm0, %v5571_v28, %v5116_v57 }
 0x22e   : > { %v5140_v51 = vunpack.i.l.bf16 %v5139_v58  ;;  %v3226_v39 = vsel %vm1415_vm5, %v3194_v8, %v5135_v35  ;;  %v5145_v59 = vunpack.i.l.bf16 %v8019_v23  ;;  %v5141_v50 = vunpack.i.h.bf16 %v5139_v58  ;;  %3445 = vmatmul.mubr.f32.gmra.mxu1 %v3129_v32  ;;  %v5572_v32 = vld [vmem:[#allocation2 + $0x48] sm:$0xff] }
 0x22f   : > { %v2131_v19 = vmax.f32 %v2093_v26, 0.0  ;;  %5433 = vrot.lane.b32.xlu1 %v5432_v17, %s5660_s26  ;;  %v8035_v27 = vsel %vm731_vm2, %v2513_v11, %v2514_v4  ;;  %3449 = vmatprep.mubr.f32.mxu1 %v3226_v39  ;;  %v3098_v30 = vsel %vm1382_vm4, %v3066_v56, %v5126_v47  ;;  %v5146_v2 = vunpack.i.h.bf16 %v8019_v23 }
 0x230   : > { %5428 = vrot.lane.b32.xlu0 %v5427_v36, %s5660_s26  ;;  %v5149_v57 = vpop.permute.xlu1 %5148  ;;  %v5442_v37 = vpack.i.bf16 %v7930_v31, %v8025_v48  ;;  %v3130_v61 = vsel %vm1415_vm5, %v3098_v30, %v5136_v46  ;;  %v5447_v4 = vpack.i.bf16 %v7964_v12, %v8030_v14  ;;  %v5437_v47 = vpack.i.bf16 %v7938_v43, %v8035_v27 }
 0x231   : > { %2163 = vst.msk [vmem:[#allocation2 + $0x181] sm:$0xff] %vm363_vm0, %v2131_v19  ;;  %v8041_v35 = vpop.permute.xlu0 %5153  ;;  %v5151_v11 = vunpack.i.h.bf16 %v5149_v57  ;;  %v5150_v7 = vunpack.i.l.bf16 %v5149_v57  ;;  %v1872_v13 = vpop.f32.mrf.mxu0  ;;  %v3163_v62 = vsel %vm363_vm0, %v7471_v45, %v5140_v51  ;;  %v3067_v36 = vsel %vm363_vm0, %v5572_v32, %v5141_v50 }
 0x232   : > { %v1873_v10 = vadd.f32 %v7823_v1, %v1872_v13  ;;  %3450 = vmatmul.mubr.f32.gmra.mxu1 %v3130_v61  ;;  %v2342_v46 = vrot.slane %v8030_v14, 1  ;;  %v3164_v23 = vsel %vm363_vm0, %v7468_v9, %v5145_v59  ;;  %v5156_v26 = vunpack.i.h.bf16 %v8041_v35 }
 0x233   : > { %5443 = vrot.lane.b32.xlu1 %v5442_v37, %s5661_s29  ;;  %v8054_v41 = vld [vmem:[#allocation2 + $0x170] sm:$0xff]  ;;  %v2212_v17 = vld [vmem:[#allocation2 + $0x178] sm:$0x3]  ;;  %v1874_v45 = vpop.f32.mrf.mxu0  ;;  %v5155_v8 = vunpack.i.l.bf16 %v8041_v35  ;;  %v3195_v56 = vsel %vm1382_vm4, %v3163_v62, %v5150_v7  ;;  %v3099_v9 = vsel %vm1382_vm4, %v3067_v36, %v5151_v11 }
 0x234   : > { %5438 = vrot.lane.b32.xlu0 %v5437_v47, %s5661_s29  ;;  %v5452_v1 = vpack.i.bf16 %v7954_v22, %v8054_v41  ;;  %v2343_v58 = vrot.slane %v8054_v41, 1  ;;  %v2345_v29 = vrot.slane %v2212_v17, 1  ;;  %v2098_v51 = vadd.f32 %v7982_v21, %v1873_v10  ;;  %v5164_v39 = vpop.permute.xlu1 %5163 }
 0x235   : > { %v5159_v28 = vpop.permute.xlu0 %5158  ;;  %v5165_v59 = vunpack.i.l.bf16 %v5164_v39  ;;  %v2519_v30 = vrot.slane %v8054_v41, 2  ;;  %v2521_v21 = vrot.slane %v2212_v17, 2  ;;  %v3196_v10 = vsel %vm1382_vm4, %v3164_v23, %v5155_v8 }
 0x236   : > { %v5161_v19 = vunpack.i.h.bf16 %v5159_v28  ;;  %v5160_v50 = vunpack.i.l.bf16 %v5159_v28  ;;  %v2132_v57 = vmax.f32 %v2098_v51, 0.0  ;;  %v8072_v37 = vsel %vm554_vm3, %v2343_v58, %v2345_v29 }
 0x237   : > { %5448 = vrot.lane.b32.xlu1 %v5447_v4, %s5659_s21  ;;  %v8075_v35 = vsel %vm554_vm3, %v2342_v46, %v2343_v58  ;;  %v5462_v11 = vpack.i.bf16 %v7989_v20, %v8072_v37  ;;  %v5166_v4 = vunpack.i.h.bf16 %v5164_v39  ;;  %v2518_v17 = vrot.slane %v8030_v14, 2  ;;  %v8100_v58 = vld [vmem:[#allocation2 + $0x198] sm:$0xff] }
 0x238   : > { %5453 = vrot.lane.b32.xlu0 %v5452_v1, %s5659_s21  ;;  %v3227_v61 = vsel %vm1415_vm5, %v3195_v56, %v5160_v50  ;;  %v3131_v7 = vsel %vm1415_vm5, %v3099_v9, %v5161_v19  ;;  %v5457_v13 = vpack.i.bf16 %v7956_v40, %v8075_v35  ;;  %2164 = vst.msk [vmem:[#allocation2 + $0x189] sm:$0xff] %vm363_vm0, %v2132_v57  ;;  %v8085_v47 = vpop.permute.xlu1 %5173  ;;  %v5573_v40 = vld [vmem:[#allocation2 + $0x50] sm:$0xff]  ;;  %v8106_v28 = vld [vmem:[#allocation2 + $0x180] sm:$0xff]  ;;  %v2955_v19 = vrot.slane %v8100_v58, 1 }
 0x239   : > { %v5169_v62 = vpop.permute.xlu0 %5168  ;;  %3454 = vmatprep.mubr.f32.mxu1 %v3227_v61  ;;  %v3228_v32 = vsel %vm1415_vm5, %v3196_v10, %v5165_v59  ;;  %v8091_v20 = vsel %vm731_vm2, %v2519_v30, %v2521_v21  ;;  %v3068_v36 = vsel %vm363_vm0, %v5573_v40, %v5146_v2  ;;  %v8096_v46 = vsel %vm731_vm2, %v2518_v17, %v2519_v30  ;;  %v5574_v21 = vld [vmem:[#allocation2 + $0x60] sm:$0xff] }
 0x23a   : > { %3455 = vmatmul.mubr.f32.gmra.mxu1 %v3131_v7  ;;  %v5171_v45 = vunpack.i.h.bf16 %v5169_v62  ;;  %v5170_v1 = vunpack.i.l.bf16 %v5169_v62  ;;  %v3100_v23 = vsel %vm1382_vm4, %v3068_v36, %v5156_v26  ;;  %v5175_v29 = vunpack.i.l.bf16 %v8085_v47 }
 0x23b   : > { %5463 = vrot.lane.b32.xlu1 %v5462_v11, %s5660_s26  ;;  %3459 = vmatprep.mubr.f32.mxu1 %v3228_v32  ;;  %v5472_v39 = vpack.i.bf16 %v8006_v16, %v8091_v20  ;;  %v3132_v2 = vsel %vm1415_vm5, %v3100_v23, %v5166_v4  ;;  %v5467_v56 = vpack.i.bf16 %v8009_v5, %v8096_v46  ;;  %v5176_v9 = vunpack.i.h.bf16 %v8085_v47 }
 0x23c   : > { %5458 = vrot.lane.b32.xlu0 %v5457_v13, %s5660_s26  ;;  %v5179_v8 = vpop.permute.xlu1 %5178  ;;  %v5477_v50 = vpack.i.bf16 %v8035_v27, %v8106_v28  ;;  %v3165_v57 = vsel %vm363_vm0, %v7515_v63, %v5170_v1  ;;  %v3069_v61 = vsel %vm363_vm0, %v5574_v21, %v5171_v45  ;;  %v2718_v11 = vrot.slane %v8106_v28, 1 }
 0x23d   : > { %v5184_v51 = vpop.permute.xlu0 %5183  ;;  %v5181_v26 = vunpack.i.h.bf16 %v5179_v8  ;;  %v5180_v59 = vunpack.i.l.bf16 %v5179_v8  ;;  %v3166_v17 = vsel %vm363_vm0, %v7512_v42, %v5175_v29 }
 0x23e   : > { %3460 = vmatmul.mubr.f32.gmra.mxu1 %v3132_v2  ;;  %v5185_v13 = vunpack.i.l.bf16 %v5184_v51  ;;  %v5186_v2 = vunpack.i.h.bf16 %v5184_v51  ;;  %v2755_v51 = vrot.slane %v8106_v28, 2 }
 0x23f   : > { %5473 = vrot.lane.b32.xlu1 %v5472_v39, %s5661_s29  ;;  %v8116_v30 = vld [vmem:[#allocation2 + $0x188] sm:$0xff]  ;;  %v2215_v7 = vld [vmem:[#allocation2 + $0x190] sm:$0x3]  ;;  %v3197_v45 = vsel %vm1382_vm4, %v3165_v57, %v5180_v59  ;;  %v3101_v1 = vsel %vm1382_vm4, %v3069_v61, %v5181_v26  ;;  %v8134_v39 = vld [vmem:[#allocation2 + $0x1a0] sm:$0xff]  ;;  %v5482_v57 = vpack.i.bf16 %v8096_v46, %v8100_v58 }
 0x240   : > { %5468 = vrot.lane.b32.xlu0 %v5467_v56, %s5661_s29  ;;  %v5194_v4 = vpop.permute.xlu1 %5193  ;;  %v5487_v62 = vpack.i.bf16 %v8025_v48, %v8116_v30  ;;  %v2719_v10 = vrot.slane %v8116_v30, 1  ;;  %v2721_v36 = vrot.slane %v2215_v7, 1  ;;  %v2756_v8 = vrot.slane %v8116_v30, 2  ;;  %v8147_v61 = vld [vmem:[#allocation2 + $0x1a8] sm:$0x3] }
 0x241   : > { %v5189_v47 = vpop.permute.xlu0 %5188  ;;  %v5195_v32 = vunpack.i.l.bf16 %v5194_v4  ;;  %v5196_v59 = vunpack.i.h.bf16 %v5194_v4  ;;  %v3198_v21 = vsel %vm1382_vm4, %v3166_v17, %v5185_v13  ;;  %v2758_v4 = vrot.slane %v2215_v7, 2 }
 0x242   : > { %v5191_v40 = vunpack.i.h.bf16 %v5189_v47  ;;  %v5190_v63 = vunpack.i.l.bf16 %v5189_v47  ;;  %v8131_v23 = vsel %vm554_vm3, %v2718_v11, %v2719_v10  ;;  %v8151_v47 = vsel %vm554_vm3, %v2719_v10, %v2721_v36 }
 0x243   : > { %5478 = vrot.lane.b32.xlu1 %v5477_v50, %s5659_s21  ;;  %v5492_v56 = vpack.i.bf16 %v8030_v14, %v8131_v23  ;;  %v3230_v11 = vsel %vm1415_vm5, %v3198_v21, %v5195_v32  ;;  %v8157_v13 = vsel %vm731_vm2, %v2755_v51, %v2756_v8  ;;  %v2958_v32 = vrot.slane %v8147_v61, 1 }
 0x244   : > { %5488 = vrot.lane.b32.xlu0 %v5487_v62, %s5659_s21  ;;  %v3229_v42 = vsel %vm1415_vm5, %v3197_v45, %v5190_v63  ;;  %v3133_v29 = vsel %vm1415_vm5, %v3101_v1, %v5191_v40  ;;  %v8141_v50 = vpop.permute.xlu1 %5203  ;;  %v2956_v62 = vrot.slane %v8134_v39, 1  ;;  %v5575_v40 = vld [vmem:[#allocation2 + $0x68] sm:$0xff]  ;;  %v5497_v45 = vpack.i.bf16 %v8054_v41, %v8151_v47 }
 0x245   : > { %v5199_v26 = vpop.permute.xlu0 %5198  ;;  %3464 = vmatprep.mubr.f32.mxu1 %v3229_v42  ;;  %v3070_v63 = vsel %vm363_vm0, %v5575_v40, %v5176_v9  ;;  %v5502_v9 = vpack.i.bf16 %v8075_v35, %v8157_v13  ;;  %v5205_v21 = vunpack.i.l.bf16 %v8141_v50 }
 0x246   : > { %3465 = vmatmul.mubr.f32.gmra.mxu1 %v3133_v29  ;;  %v3102_v17 = vsel %vm1382_vm4, %v3070_v63, %v5186_v2  ;;  %v5200_v10 = vunpack.i.l.bf16 %v5199_v26  ;;  %v5201_v42 = vunpack.i.h.bf16 %v5199_v26  ;;  %v8168_v29 = vsel %vm731_vm2, %v2756_v8, %v2758_v4 }
 0x247   : > { %5483 = vrot.lane.b32.xlu1 %v5482_v57, %s5659_s21  ;;  %3469 = vmatprep.mubr.f32.mxu1 %v3230_v11  ;;  %v3134_v1 = vsel %vm1415_vm5, %v3102_v17, %v5196_v59  ;;  %v2957_v2 = vsel %vm554_vm3, %v2955_v19, %v2956_v62  ;;  %v2959_v59 = vsel %vm554_vm3, %v2956_v62, %v2958_v32 }
 0x248   : > { %5493 = vrot.lane.b32.xlu0 %v5492_v56, %s5660_s26  ;;  %v5209_v36 = vpop.permute.xlu1 %5208  ;;  %v5512_v40 = vpack.i.bf16 %v8072_v37, %v8168_v29  ;;  %v5507_v8 = vpack.i.bf16 %v8106_v28, %v2957_v2  ;;  %v3167_v19 = vsel %vm363_vm0, %v7561_v60, %v5200_v10  ;;  %v3168_v10 = vsel %vm363_vm0, %v7558_v53, %v5205_v21 }
 0x249   : > { %v5214_v7 = vpop.permute.xlu0 %5213  ;;  %v5211_v56 = vunpack.i.h.bf16 %v5209_v36  ;;  %v5210_v57 = vunpack.i.l.bf16 %v5209_v36  ;;  %v5576_v36 = vld [vmem:[#allocation2 + $0x78] sm:$0xff] }
 0x24a   : > { %3470 = vmatmul.mubr.f32.gmra.mxu1 %v3134_v1  ;;  %v5215_v26 = vunpack.i.l.bf16 %v5214_v7  ;;  %v5206_v1 = vunpack.i.h.bf16 %v8141_v50  ;;  %v5522_v50 = vpack.i.bf16 %v8116_v30, %v2959_v59 }
 0x24b   : > { %5498 = vrot.lane.b32.xlu1 %v5497_v45, %s5660_s26  ;;  %v3071_v45 = vsel %vm363_vm0, %v5576_v36, %v5201_v42  ;;  %v3199_v62 = vsel %vm1382_vm4, %v3167_v19, %v5210_v57 }
 0x24c   : > { %5503 = vrot.lane.b32.xlu0 %v5502_v9, %s5661_s29  ;;  %v5224_v51 = vpop.permute.xlu1 %5223  ;;  %v3103_v32 = vsel %vm1382_vm4, %v3071_v45, %v5211_v56  ;;  %v5216_v9 = vunpack.i.h.bf16 %v5214_v7  ;;  %v3200_v57 = vsel %vm1382_vm4, %v3168_v10, %v5215_v26  ;;  %v5517_v7 = vpack.i.bf16 %v8091_v20, %v8134_v39 }
 0x24d   : > { %v5219_v11 = vpop.permute.xlu0 %5218  ;;  %v5225_v4 = vunpack.i.l.bf16 %v5224_v51  ;;  %v5226_v2 = vunpack.i.h.bf16 %v5224_v51 }
 0x24e   : > { %v5221_v63 = vunpack.i.h.bf16 %v5219_v11  ;;  %v5220_v17 = vunpack.i.l.bf16 %v5219_v11 }
 0x24f   : > { %5513 = vrot.lane.b32.xlu1 %v5512_v40, %s5661_s29  ;;  %v3232_v56 = vsel %vm1415_vm5, %v3200_v57, %v5225_v4  ;;  %v5577_v40 = vld [vmem:[#allocation2 + $0x80] sm:$0xff] }
 0x250   : > { %5508 = vrot.lane.b32.xlu0 %v5507_v8, %s5660_s26  ;;  %v3231_v28 = vsel %vm1415_vm5, %v3199_v62, %v5220_v17  ;;  %v3135_v60 = vsel %vm1415_vm5, %v3103_v32, %v5221_v63  ;;  %v5234_v42 = vpop.permute.xlu1 %5233  ;;  %v3072_v53 = vsel %vm363_vm0, %v5577_v40, %v5206_v1 }
 0x251   : > { %v5229_v11 = vpop.permute.xlu0 %5228  ;;  %3474 = vmatprep.mubr.f32.mxu1 %v3231_v28  ;;  %v3104_v21 = vsel %vm1382_vm4, %v3072_v53, %v5216_v9  ;;  %v5235_v4 = vunpack.i.l.bf16 %v5234_v42  ;;  %v5578_v9 = vld [vmem:[#allocation2 + $0x90] sm:$0xff]  ;;  %v5236_v10 = vunpack.i.h.bf16 %v5234_v42 }
 0x252   : > { %3475 = vmatmul.mubr.f32.gmra.mxu1 %v3135_v60  ;;  %v5230_v51 = vunpack.i.l.bf16 %v5229_v11  ;;  %v3136_v26 = vsel %vm1415_vm5, %v3104_v21, %v5226_v2  ;;  %v5231_v8 = vunpack.i.h.bf16 %v5229_v11 }
 0x253   : > { %5523 = vrot.lane.b32.xlu1 %v5522_v50, %s5660_s26  ;;  %3479 = vmatprep.mubr.f32.mxu1 %v3232_v56  ;;  %v3170_v56 = vsel %vm363_vm0, %v7604_v24, %v5235_v4  ;;  %s5663_s26 = smov [#allocation3]  }
 0x254   : > { %5518 = vrot.lane.b32.xlu0 %v5517_v7, %s5659_s21  ;;  %v5239_v30 = vpop.permute.xlu1 %5238  ;;  %v3169_v1 = vsel %vm363_vm0, %v7607_v15, %v5230_v51  ;;  %v3073_v60 = vsel %vm363_vm0, %v5578_v9, %v5231_v8  ;;  %v5579_v51 = vld [vmem:[#allocation2 + $0x98] sm:$0xff]  ;;  %s5596_s21 = scalar_lea.vmem %s8769_s25, 4096  ;;  %s5600_s29 = sshll.u32 %s5663_s26, 4  ;;  %s5601_s29 = int_to_ptr.vmem [resolvable:$false] %s5600_s29 }
 0x255   : > { %v5244_v59 = vpop.permute.xlu0 %5243  ;;  %v5241_v19 = vunpack.i.h.bf16 %v5239_v30  ;;  %v5240_v63 = vunpack.i.l.bf16 %v5239_v30  ;;  %v3074_v30 = vsel %vm363_vm0, %v5579_v51, %v5236_v10  ;;  %v5580_v10 = vld [vmem:[#allocation2 + $0xa8] sm:$0xff]  ;;  %p5597_p11 = scmp.ne.s32.totalorder %s8769_s25, %s5596_s21  ;;  %s5602_s17 = scalar_lea.vmem %s5601_s29, 8192 }
 0x256   : > { %3480 = vmatmul.mubr.f32.gmra.mxu1 %v3136_v26  ;;  %v5245_v17 = vunpack.i.l.bf16 %v5244_v59  ;;  %v5246_v50 = vunpack.i.h.bf16 %v5244_v59  ;;  %p5603_p0 = scmp.lt.s32.totalorder %s8769_s25, %s5601_s29  ;;  %p5604_p1 = scmp.lt.s32.totalorder %s5602_s17, %s5596_s21 }
 0x257   : > { %v3201_v2 = vsel %vm1382_vm4, %v3169_v1, %v5240_v63  ;;  %v3105_v11 = vsel %vm1382_vm4, %v3073_v60, %v5241_v19  ;;  %p5598_p12 = pnand %p5597_p11, %p5754_p5 }
 0x258   : > { %v5254_v36 = vpop.permute.xlu1 %5253  ;;  %v3202_v21 = vsel %vm1382_vm4, %v3170_v56, %v5245_v17  ;;  %v3106_v59 = vsel %vm1382_vm4, %v3074_v30, %v5246_v50  ;;  %v5581_v30 = vld [vmem:[#allocation2 + $0xb0] sm:$0xff]  ;;  %p5605_p2 = por %p5604_p1, %p5603_p0 }
 0x259   : > { %v5249_v45 = vpop.permute.xlu0 %5248  ;;  %v5255_v62 = vunpack.i.l.bf16 %v5254_v36  ;;  %v5256_v15 = vunpack.i.h.bf16 %v5254_v36  ;;  %p5599_p13 = pneg %p5598_p12 }
 0x25a   : > { %v5251_v32 = vunpack.i.h.bf16 %v5249_v45  ;;  %v5250_v28 = vunpack.i.l.bf16 %v5249_v45 }
 0x25b   : > { %v3234_v42 = vsel %vm1415_vm5, %v3202_v21, %v5255_v62  ;;  %v3138_v24 = vsel %vm1415_vm5, %v3106_v59, %v5256_v15  ;;  %p5606_p3 = pnand %p5605_p2, %p5599_p13 }
 0x25c   : > { %v3233_v57 = vsel %vm1415_vm5, %v3201_v2, %v5250_v28  ;;  %v3137_v7 = vsel %vm1415_vm5, %v3105_v11, %v5251_v32  ;;  %v5264_v40 = vpop.permute.xlu1 %5263 }
 0x25d   : > { %v5259_v53 = vpop.permute.xlu0 %5258  ;;  %3484 = vmatprep.mubr.f32.mxu1 %v3233_v57  ;;  %v5265_v45 = vunpack.i.l.bf16 %v5264_v40  ;;  %v5266_v11 = vunpack.i.h.bf16 %v5264_v40 }
 0x25e   : > { %3485 = vmatmul.mubr.f32.gmra.mxu1 %v3137_v7  ;;  %v5260_v26 = vunpack.i.l.bf16 %v5259_v53  ;;  %v5261_v63 = vunpack.i.h.bf16 %v5259_v53 }
 0x25f   : > { %3489 = vmatprep.mubr.f32.mxu1 %v3234_v42  ;;  %v3172_v53 = vsel %vm363_vm0, %v7650_v38, %v5265_v45  ;;  %v3076_v59 = vsel %vm363_vm0, %v5581_v30, %v5266_v11 }
 0x260   : > { %v5269_v8 = vpop.permute.xlu1 %5268  ;;  %v3171_v62 = vsel %vm363_vm0, %v7653_v49, %v5260_v26  ;;  %v3075_v2 = vsel %vm363_vm0, %v5580_v10, %v5261_v63  ;;  %v5582_v10 = vld [vmem:[#allocation2 + $0xc0] sm:$0xff] }
 0x261   : > { %v5274_v19 = vpop.permute.xlu0 %5273  ;;  %v5271_v4 = vunpack.i.h.bf16 %v5269_v8  ;;  %v5270_v36 = vunpack.i.l.bf16 %v5269_v8 }
 0x262   : > { %3490 = vmatmul.mubr.f32.gmra.mxu1 %v3138_v24  ;;  %v5275_v17 = vunpack.i.l.bf16 %v5274_v19  ;;  %v5276_v7 = vunpack.i.h.bf16 %v5274_v19 }
 0x263   : > { %v3203_v50 = vsel %vm1382_vm4, %v3171_v62, %v5270_v36  ;;  %v3107_v57 = vsel %vm1382_vm4, %v3075_v2, %v5271_v4 }
 0x264   : > { %v5284_v1 = vpop.permute.xlu1 %5283  ;;  %v3204_v51 = vsel %vm1382_vm4, %v3172_v53, %v5275_v17  ;;  %v3108_v26 = vsel %vm1382_vm4, %v3076_v59, %v5276_v7 }
 0x265   : > { %v5279_v32 = vpop.permute.xlu0 %5278  ;;  %v5285_v28 = vunpack.i.l.bf16 %v5284_v1  ;;  %v5286_v49 = vunpack.i.h.bf16 %v5284_v1 }
 0x266   : > { %v5281_v9 = vunpack.i.h.bf16 %v5279_v32  ;;  %v5280_v60 = vunpack.i.l.bf16 %v5279_v32 }
 0x267   : > { %v3236_v40 = vsel %vm1415_vm5, %v3204_v51, %v5285_v28  ;;  %v3140_v38 = vsel %vm1415_vm5, %v3108_v26, %v5286_v49 }
 0x268   : > { %v3235_v56 = vsel %vm1415_vm5, %v3203_v50, %v5280_v60  ;;  %v3139_v15 = vsel %vm1415_vm5, %v3107_v57, %v5281_v9  ;;  %v5294_v21 = vpop.permute.xlu1 %5293 }
 0x269   : > { %v5289_v42 = vpop.permute.xlu0 %5288  ;;  %3494 = vmatprep.mubr.f32.mxu1 %v3235_v56  ;;  %v5295_v45 = vunpack.i.l.bf16 %v5294_v21  ;;  %v5296_v11 = vunpack.i.h.bf16 %v5294_v21 }
 0x26a   : > { %3495 = vmatmul.mubr.f32.gmra.mxu1 %v3139_v15  ;;  %v5290_v8 = vunpack.i.l.bf16 %v5289_v42  ;;  %v5291_v63 = vunpack.i.h.bf16 %v5289_v42 }
 0x26b   : > { %3499 = vmatprep.mubr.f32.mxu1 %v3236_v40  ;;  %v3174_v53 = vsel %vm363_vm0, %v7696_v33, %v5295_v45  ;;  %v5583_v40 = vld [vmem:[#allocation2 + $0xc8] sm:$0xff] }
 0x26c   : > { %v5299_v19 = vpop.permute.xlu1 %5298  ;;  %v3173_v62 = vsel %vm363_vm0, %v7699_v55, %v5290_v8  ;;  %v3077_v2 = vsel %vm363_vm0, %v5582_v10, %v5291_v63  ;;  %v3078_v30 = vsel %vm363_vm0, %v5583_v40, %v5296_v11 }
 0x26d   : > { %v5304_v24 = vpop.permute.xlu0 %5303  ;;  %v5301_v4 = vunpack.i.h.bf16 %v5299_v19  ;;  %v5300_v36 = vunpack.i.l.bf16 %v5299_v19 }
 0x26e   : > { %3500 = vmatmul.mubr.f32.gmra.mxu1 %v3140_v38  ;;  %v5305_v17 = vunpack.i.l.bf16 %v5304_v24  ;;  %v5306_v7 = vunpack.i.h.bf16 %v5304_v24 }
 0x26f   : > { %v3205_v50 = vsel %vm1382_vm4, %v3173_v62, %v5300_v36  ;;  %v3109_v57 = vsel %vm1382_vm4, %v3077_v2, %v5301_v4 }
 0x270   : > { %v5314_v1 = vpop.permute.xlu1 %5313  ;;  %v3206_v51 = vsel %vm1382_vm4, %v3174_v53, %v5305_v17  ;;  %v3110_v59 = vsel %vm1382_vm4, %v3078_v30, %v5306_v7 }
 0x271   : > { %v5309_v32 = vpop.permute.xlu0 %5308  ;;  %v5315_v28 = vunpack.i.l.bf16 %v5314_v1  ;;  %v5316_v55 = vunpack.i.h.bf16 %v5314_v1 }
 0x272   : > { %v5311_v9 = vunpack.i.h.bf16 %v5309_v32  ;;  %v5310_v60 = vunpack.i.l.bf16 %v5309_v32 }
 0x273   : > { %v3238_v21 = vsel %vm1415_vm5, %v3206_v51, %v5315_v28  ;;  %v3142_v19 = vsel %vm1415_vm5, %v3110_v59, %v5316_v55 }
 0x274   : > { %v3237_v56 = vsel %vm1415_vm5, %v3205_v50, %v5310_v60  ;;  %v3141_v15 = vsel %vm1415_vm5, %v3109_v57, %v5311_v9  ;;  %v5324_v49 = vpop.permute.xlu1 %5323  ;;  %v5584_v9 = vld [vmem:[#allocation2 + $0xd8] sm:$0xff] }
 0x275   : > { %v5319_v42 = vpop.permute.xlu0 %5318  ;;  %3504 = vmatprep.mubr.f32.mxu1 %v3237_v56  ;;  %v5325_v4 = vunpack.i.l.bf16 %v5324_v49  ;;  %v5326_v10 = vunpack.i.h.bf16 %v5324_v49 }
 0x276   : > { %3505 = vmatmul.mubr.f32.gmra.mxu1 %v3141_v15  ;;  %v5320_v33 = vunpack.i.l.bf16 %v5319_v42  ;;  %v5321_v24 = vunpack.i.h.bf16 %v5319_v42  ;;  %v5585_v42 = vld [vmem:[#allocation2 + $0xe0] sm:$0xff] }
 0x277   : > { %3509 = vmatprep.mubr.f32.mxu1 %v3238_v21  ;;  %v3080_v51 = vsel %vm363_vm0, %v5585_v42, %v5326_v10 }
 0x278   : > { %v5329_v26 = vpop.permute.xlu1 %5328  ;;  %v3175_v1 = vsel %vm363_vm0, %v7745_v44, %v5320_v33  ;;  %v3079_v60 = vsel %vm363_vm0, %v5584_v9, %v5321_v24  ;;  %v3176_v44 = vsel %vm363_vm0, %v7742_v54, %v5325_v4 }
 0x279   : > { %v5334_v8 = vpop.permute.xlu0 %5333  ;;  %v5331_v38 = vunpack.i.h.bf16 %v5329_v26  ;;  %v5330_v63 = vunpack.i.l.bf16 %v5329_v26 }
 0x27a   : > { %3510 = vmatmul.mubr.f32.gmra.mxu1 %v3142_v19  ;;  %v5335_v45 = vunpack.i.l.bf16 %v5334_v8  ;;  %v5336_v50 = vunpack.i.h.bf16 %v5334_v8 }
 0x27b   : > { %v3207_v2 = vsel %vm1382_vm4, %v3175_v1, %v5330_v63  ;;  %v3111_v11 = vsel %vm1382_vm4, %v3079_v60, %v5331_v38  ;;  %v5586_v1 = vld [vmem:[#allocation2 + $0xf0] sm:$0xff] }
 0x27c   : > { %v5344_v36 = vpop.permute.xlu1 %5343  ;;  %v3208_v55 = vsel %vm1382_vm4, %v3176_v44, %v5335_v45  ;;  %v3112_v40 = vsel %vm1382_vm4, %v3080_v51, %v5336_v50  ;;  %v5587_v44 = vld [vmem:[#allocation2 + $0xf8] sm:$0xff] }
 0x27d   : > { %v5339_v17 = vpop.permute.xlu0 %5338  ;;  %v5345_v32 = vunpack.i.l.bf16 %v5344_v36  ;;  %v5346_v15 = vunpack.i.h.bf16 %v5344_v36 }
 0x27e   : > { %v5341_v62 = vunpack.i.h.bf16 %v5339_v17  ;;  %v5340_v28 = vunpack.i.l.bf16 %v5339_v17 }
 0x27f   : > { %v3240_v49 = vsel %vm1415_vm5, %v3208_v55, %v5345_v32  ;;  %v3144_v26 = vsel %vm1415_vm5, %v3112_v40, %v5346_v15 }
 0x280   : > { %v5354_v57 = vpop.permute.xlu1 %5353  ;;  %v3239_v7 = vsel %vm1415_vm5, %v3207_v2, %v5340_v28  ;;  %v3143_v56 = vsel %vm1415_vm5, %v3111_v11, %v5341_v62 }
 0x281   : > { %v5349_v53 = vpop.permute.xlu0 %5348  ;;  %3514 = vmatprep.mubr.f32.mxu1 %v3239_v7  ;;  %v5355_v33 = vunpack.i.l.bf16 %v5354_v57  ;;  %v5356_v62 = vunpack.i.h.bf16 %v5354_v57 }
 0x282   : > { %3515 = vmatmul.mubr.f32.gmra.mxu1 %v3143_v56  ;;  %v5350_v30 = vunpack.i.l.bf16 %v5349_v53  ;;  %v5351_v54 = vunpack.i.h.bf16 %v5349_v53 }
 0x283   : > { %3519 = vmatprep.mubr.f32.mxu1 %v3240_v49  ;;  %v3082_v15 = vsel %vm363_vm0, %v5587_v44, %v5356_v62 }
 0x284   : > { %v5359_v21 = vpop.permute.xlu1 %5358  ;;  %v3177_v4 = vsel %vm363_vm0, %v7799_v18, %v5350_v30  ;;  %v3081_v32 = vsel %vm363_vm0, %v5586_v1, %v5351_v54  ;;  %v3178_v18 = vsel %vm363_vm0, %v7792_v25, %v5355_v33 }
 0x285   : > { %v5364_v59 = vpop.permute.xlu0 %5363  ;;  %v5361_v8 = vunpack.i.h.bf16 %v5359_v21  ;;  %v5360_v19 = vunpack.i.l.bf16 %v5359_v21 }
 0x286   : > { %3520 = vmatmul.mubr.f32.gmra.mxu1 %v3144_v26  ;;  %v5365_v38 = vunpack.i.l.bf16 %v5364_v59  ;;  %v5366_v60 = vunpack.i.h.bf16 %v5364_v59 }
 0x287   : > { %v3209_v28 = vsel %vm1382_vm4, %v3177_v4, %v5360_v19  ;;  %v3113_v9 = vsel %vm1382_vm4, %v3081_v32, %v5361_v8 }
 0x288   : > { %v3210_v56 = vsel %vm1382_vm4, %v3178_v18, %v5365_v38  ;;  %v3114_v55 = vsel %vm1382_vm4, %v3082_v15, %v5366_v60  ;;  %v5588_v38 = vld [vmem:[#allocation2 + $0x108] sm:$0xff] }
 0x289   : > { %v5374_v24 = vpop.permute.xlu1 %5373 }
 0x28a   : > { %v5369_v63 = vpop.permute.xlu0 %5368  ;;  %v5375_v36 = vunpack.i.l.bf16 %v5374_v24  ;;  %v5376_v50 = vunpack.i.h.bf16 %v5374_v24 }
 0x28b   : > { %v5371_v45 = vunpack.i.h.bf16 %v5369_v63  ;;  %v5370_v17 = vunpack.i.l.bf16 %v5369_v63 }
 0x28c   : > { %v3242_v57 = vsel %vm1415_vm5, %v3210_v56, %v5375_v36  ;;  %v3146_v51 = vsel %vm1415_vm5, %v3114_v55, %v5376_v50 }
 0x28d   : > { %v5384_v10 = vpop.permute.xlu1 %5383  ;;  %v3241_v2 = vsel %vm1415_vm5, %v3209_v28, %v5370_v17  ;;  %v3145_v11 = vsel %vm1415_vm5, %v3113_v9, %v5371_v45 }
 0x28e   : > { %v5379_v7 = vpop.permute.xlu0 %5378  ;;  %3524 = vmatprep.mubr.f32.mxu1 %v3241_v2  ;;  %v5385_v30 = vunpack.i.l.bf16 %v5384_v10  ;;  %v5386_v4 = vunpack.i.h.bf16 %v5384_v10  ;;  %v5589_v2 = vld [vmem:[#allocation2 + $0x110] sm:$0xff] }
 0x28f   : > { %3525 = vmatmul.mubr.f32.gmra.mxu1 %v3145_v11  ;;  %v5380_v49 = vunpack.i.l.bf16 %v5379_v7  ;;  %v5381_v25 = vunpack.i.h.bf16 %v5379_v7 }
 0x290   : > { %3529 = vmatprep.mubr.f32.mxu1 %v3242_v57  ;;  %v3084_v11 = vsel %vm363_vm0, %v5589_v2, %v5386_v4 }
 0x291   : > { %v5389_v53 = vpop.permute.xlu1 %5388  ;;  %v3179_v8 = vsel %vm363_vm0, %v7850_v52, %v5380_v49  ;;  %v3083_v63 = vsel %vm363_vm0, %v5588_v38, %v5381_v25  ;;  %v3180_v52 = vsel %vm363_vm0, %v7847_v3, %v5385_v30  ;;  %v5590_v30 = vld [vmem:[#allocation2 + $0x120] sm:$0xff] }
 0x292   : > { %v5394_v42 = vpop.permute.xlu0 %5393  ;;  %v5391_v21 = vunpack.i.h.bf16 %v5389_v53  ;;  %v5390_v40 = vunpack.i.l.bf16 %v5389_v53 }
 0x293   : > { %3530 = vmatmul.mubr.f32.gmra.mxu1 %v3146_v51  ;;  %v5395_v26 = vunpack.i.l.bf16 %v5394_v42  ;;  %v5396_v17 = vunpack.i.h.bf16 %v5394_v42 }
 0x294   : > { %v3211_v36 = vsel %vm1382_vm4, %v3179_v8, %v5390_v40  ;;  %v3115_v45 = vsel %vm1382_vm4, %v3083_v63, %v5391_v21 }
 0x295   : > { %v5404_v59 = vpop.permute.xlu1 %5403  ;;  %v3212_v60 = vsel %vm1382_vm4, %v3180_v52, %v5395_v26  ;;  %v3116_v50 = vsel %vm1382_vm4, %v3084_v11, %v5396_v17  ;;  %v5591_v17 = vld [vmem:[#allocation2 + $0x128] sm:$0xff] }
 0x296   : > { %v5399_v54 = vpop.permute.xlu0 %5398  ;;  %v5405_v19 = vunpack.i.l.bf16 %v5404_v59  ;;  %v5406_v28 = vunpack.i.h.bf16 %v5404_v59 }
 0x297   : > { %v5401_v33 = vunpack.i.h.bf16 %v5399_v54  ;;  %v5400_v24 = vunpack.i.l.bf16 %v5399_v54 }
 0x298   : > { %v3244_v10 = vsel %vm1415_vm5, %v3212_v60, %v5405_v19  ;;  %v3148_v57 = vsel %vm1415_vm5, %v3116_v50, %v5406_v28 }
 0x299   : > { %v5414_v1 = vpop.permute.xlu1 %5413  ;;  %v3243_v32 = vsel %vm1415_vm5, %v3211_v36, %v5400_v24  ;;  %v3147_v62 = vsel %vm1415_vm5, %v3115_v45, %v5401_v33 }
 0x29a   : > { %v5409_v9 = vpop.permute.xlu0 %5408  ;;  %3534 = vmatprep.mubr.f32.mxu1 %v3243_v32  ;;  %v5415_v53 = vunpack.i.l.bf16 %v5414_v1  ;;  %v5416_v26 = vunpack.i.h.bf16 %v5414_v1 }
 0x29b   : > { %3535 = vmatmul.mubr.f32.gmra.mxu1 %v3147_v62  ;;  %v5410_v7 = vunpack.i.l.bf16 %v5409_v9  ;;  %v5411_v3 = vunpack.i.h.bf16 %v5409_v9 }
 0x29c   : > { %3539 = vmatprep.mubr.f32.mxu1 %v3244_v10  ;;  %v3086_v1 = vsel %vm363_vm0, %v5591_v17, %v5416_v26 }
 0x29d   : > { %v5419_v18 = vpop.permute.xlu1 %5418  ;;  %v3181_v51 = vsel %vm363_vm0, %v7938_v43, %v5410_v7  ;;  %v3085_v59 = vsel %vm363_vm0, %v5590_v30, %v5411_v3  ;;  %v3182_v43 = vsel %vm363_vm0, %v7930_v31, %v5415_v53 }
 0x29e   : > { %v5424_v56 = vpop.permute.xlu0 %5423  ;;  %v5421_v44 = vunpack.i.h.bf16 %v5419_v18  ;;  %v5420_v15 = vunpack.i.l.bf16 %v5419_v18 }
 0x29f   : > { %3540 = vmatmul.mubr.f32.gmra.mxu1 %v3148_v57  ;;  %v5425_v49 = vunpack.i.l.bf16 %v5424_v56  ;;  %v5426_v19 = vunpack.i.h.bf16 %v5424_v56 }
 0x2a0   : > { %v3213_v54 = vsel %vm1382_vm4, %v3181_v51, %v5420_v15  ;;  %v3117_v8 = vsel %vm1382_vm4, %v3085_v59, %v5421_v44  ;;  %v5592_v44 = vld [vmem:[#allocation2 + $0x138] sm:$0xff] }
 0x2a1   : > { %v5434_v55 = vpop.permute.xlu1 %5433  ;;  %v3214_v36 = vsel %vm1382_vm4, %v3182_v43, %v5425_v49  ;;  %v3118_v62 = vsel %vm1382_vm4, %v3086_v1, %v5426_v19 }
 0x2a2   : > { %v5429_v42 = vpop.permute.xlu0 %5428  ;;  %v5435_v25 = vunpack.i.l.bf16 %v5434_v55  ;;  %v5436_v63 = vunpack.i.h.bf16 %v5434_v55 }
 0x2a3   : > { %v5431_v21 = vunpack.i.h.bf16 %v5429_v42  ;;  %v5430_v40 = vunpack.i.l.bf16 %v5429_v42 }
 0x2a4   : > { %v3246_v45 = vsel %vm1415_vm5, %v3214_v36, %v5435_v25  ;;  %v3150_v9 = vsel %vm1415_vm5, %v3118_v62, %v5436_v63 }
 0x2a5   : > { %v5444_v33 = vpop.permute.xlu1 %5443  ;;  %v3245_v24 = vsel %vm1415_vm5, %v3213_v54, %v5430_v40  ;;  %v3149_v38 = vsel %vm1415_vm5, %v3117_v8, %v5431_v21  ;;  %v5593_v54 = vld [vmem:[#allocation2 + $0x140] sm:$0xff] }
 0x2a6   : > { %v5439_v4 = vpop.permute.xlu0 %5438  ;;  %3544 = vmatprep.mubr.f32.mxu1 %v3245_v24  ;;  %v5445_v2 = vunpack.i.l.bf16 %v5444_v33  ;;  %v5446_v53 = vunpack.i.h.bf16 %v5444_v33 }
 0x2a7   : > { %3545 = vmatmul.mubr.f32.gmra.mxu1 %v3149_v38  ;;  %v5440_v52 = vunpack.i.l.bf16 %v5439_v4  ;;  %v5441_v31 = vunpack.i.h.bf16 %v5439_v4 }
 0x2a8   : > { %3549 = vmatprep.mubr.f32.mxu1 %v3246_v45  ;;  %v3088_v8 = vsel %vm363_vm0, %v5593_v54, %v5446_v53 }
 0x2a9   : > { %v5449_v32 = vpop.permute.xlu1 %5448  ;;  %v3183_v7 = vsel %vm363_vm0, %v8009_v5, %v5440_v52  ;;  %v3087_v15 = vsel %vm363_vm0, %v5592_v44, %v5441_v31  ;;  %v3184_v5 = vsel %vm363_vm0, %v8006_v16, %v5445_v2 }
 0x2aa   : > { %v5454_v28 = vpop.permute.xlu0 %5453  ;;  %v5451_v60 = vunpack.i.h.bf16 %v5449_v32  ;;  %v5450_v10 = vunpack.i.l.bf16 %v5449_v32 }
 0x2ab   : > { %3550 = vmatmul.mubr.f32.gmra.mxu1 %v3150_v9  ;;  %v5455_v18 = vunpack.i.l.bf16 %v5454_v28  ;;  %v5456_v42 = vunpack.i.h.bf16 %v5454_v28  ;;  %v5594_v28 = vld [vmem:[#allocation2 + $0x150] sm:$0xff] }
 0x2ac   : > { %v3215_v55 = vsel %vm1382_vm4, %v3183_v7, %v5450_v10  ;;  %v3119_v49 = vsel %vm1382_vm4, %v3087_v15, %v5451_v60 }
 0x2ad   : > { %v5464_v11 = vpop.permute.xlu1 %5463  ;;  %v3216_v59 = vsel %vm1382_vm4, %v3184_v5, %v5455_v18  ;;  %v3120_v33 = vsel %vm1382_vm4, %v3088_v8, %v5456_v42 }
 0x2ae   : > { %v5459_v50 = vpop.permute.xlu0 %5458  ;;  %v5465_v56 = vunpack.i.l.bf16 %v5464_v11  ;;  %v5466_v40 = vunpack.i.h.bf16 %v5464_v11 }
 0x2af   : > { %v5461_v57 = vunpack.i.h.bf16 %v5459_v50  ;;  %v5460_v3 = vunpack.i.l.bf16 %v5459_v50 }
 0x2b0   : > { %v3248_v26 = vsel %vm1415_vm5, %v3216_v59, %v5465_v56  ;;  %v3152_v43 = vsel %vm1415_vm5, %v3120_v33, %v5466_v40 }
 0x2b1   : > { %v5474_v51 = vpop.permute.xlu1 %5473  ;;  %v3247_v25 = vsel %vm1415_vm5, %v3215_v55, %v5460_v3  ;;  %v3151_v21 = vsel %vm1415_vm5, %v3119_v49, %v5461_v57  ;;  %v5595_v55 = vld [vmem:[#allocation2 + $0x158] sm:$0xff] }
 0x2b2   : > { %v5469_v30 = vpop.permute.xlu0 %5468  ;;  %3554 = vmatprep.mubr.f32.mxu1 %v3247_v25  ;;  %v5475_v45 = vunpack.i.l.bf16 %v5474_v51  ;;  %v5476_v31 = vunpack.i.h.bf16 %v5474_v51 }
 0x2b3   : > { %3555 = vmatmul.mubr.f32.gmra.mxu1 %v3151_v21  ;;  %v5470_v24 = vunpack.i.l.bf16 %v5469_v30  ;;  %v5471_v16 = vunpack.i.h.bf16 %v5469_v30 }
 0x2b4   : > { %3559 = vmatprep.mubr.f32.mxu1 %v3248_v26  ;;  %v3186_v57 = vsel %vm363_vm0, %v8072_v37, %v5475_v45  ;;  %v3090_v49 = vsel %vm363_vm0, %v5595_v55, %v5476_v31  ;;  %v3884_v55 = vld [vmem:[%s8846_s5 + $0x18] sm:$0xff] }
 0x2b5   : > { %v5479_v19 = vpop.permute.xlu1 %5478  ;;  %v3185_v1 = vsel %vm363_vm0, %v8075_v35, %v5470_v24  ;;  %v3089_v9 = vsel %vm363_vm0, %v5594_v28, %v5471_v16 }
 0x2b6   : > { %v5489_v38 = vpop.permute.xlu0 %5488  ;;  %v5481_v63 = vunpack.i.h.bf16 %v5479_v19  ;;  %v5480_v4 = vunpack.i.l.bf16 %v5479_v19 }
 0x2b7   : > { %3560 = vmatmul.mubr.f32.gmra.mxu1 %v3152_v43  ;;  %v5490_v32 = vunpack.i.l.bf16 %v5489_v38  ;;  %v5491_v2 = vunpack.i.h.bf16 %v5489_v38 }
 0x2b8   : > { %v3217_v60 = vsel %vm1382_vm4, %v3185_v1, %v5480_v4  ;;  %v3121_v10 = vsel %vm1382_vm4, %v3089_v9, %v5481_v63 }
 0x2b9   : > { %v5484_v36 = vpop.permute.xlu1 %5483  ;;  %v3218_v15 = vsel %vm1382_vm4, %v3186_v57, %v5490_v32  ;;  %v3122_v51 = vsel %vm1382_vm4, %v3090_v49, %v5491_v2 }
 0x2ba   : > { %v5494_v17 = vpop.permute.xlu0 %5493  ;;  %v5486_v21 = vunpack.i.h.bf16 %v5484_v36  ;;  %v5485_v5 = vunpack.i.l.bf16 %v5484_v36 }
 0x2bb   : > { %v5496_v62 = vunpack.i.h.bf16 %v5494_v17  ;;  %v5495_v52 = vunpack.i.l.bf16 %v5494_v17 }
 0x2bd   : > { %v5499_v11 = vpop.permute.xlu1 %5498  ;;  %v3249_v18 = vsel %vm1415_vm5, %v3217_v60, %v5495_v52  ;;  %v3153_v50 = vsel %vm1415_vm5, %v3121_v10, %v5496_v62 }
 0x2be   : > { %v5501_v7 = vunpack.i.h.bf16 %v5499_v11  ;;  %v5500_v56 = vunpack.i.l.bf16 %v5499_v11  ;;  %v5504_v35 = vpop.permute.xlu0 %5503  ;;  %3564 = vmatprep.mubr.f32.mxu1 %v3249_v18 }
 0x2bf   : > { %v5506_v3 = vunpack.i.h.bf16 %v5504_v35  ;;  %v5505_v44 = vunpack.i.l.bf16 %v5504_v35  ;;  %3565 = vmatmul.mubr.f32.gmra.mxu1 %v3153_v50 }
 0x2c0   : > { %v3250_v53 = vsel %vm1415_vm5, %v3218_v15, %v5500_v56  ;;  %v3154_v30 = vsel %vm1415_vm5, %v3122_v51, %v5501_v7 }
 0x2c1   : > { %v5514_v42 = vpop.permute.xlu1 %5513  ;;  %3569 = vmatprep.mubr.f32.mxu1 %v3250_v53  ;;  %v3187_v25 = vsel %vm363_vm0, %v8131_v23, %v5505_v44  ;;  %v3091_v37 = vsel %vm363_vm0, %v8030_v14, %v5506_v3 }
 0x2c2   : > { %v5509_v40 = vpop.permute.xlu0 %5508  ;;  %v5516_v54 = vunpack.i.h.bf16 %v5514_v42  ;;  %v5515_v8 = vunpack.i.l.bf16 %v5514_v42  ;;  %v3219_v19 = vsel %vm1382_vm4, %v3187_v25, %v5485_v5  ;;  %v3123_v33 = vsel %vm1382_vm4, %v3091_v37, %v5486_v21 }
 0x2c3   : > { %v5511_v59 = vunpack.i.h.bf16 %v5509_v40  ;;  %v5510_v26 = vunpack.i.l.bf16 %v5509_v40  ;;  %3570 = vmatmul.mubr.f32.gmra.mxu1 %v3154_v30  ;;  %v3883_v40 = vld [vmem:[%s8846_s5 + $0x10] sm:$0xff]  ;;  %v3882_v30 = vld [vmem:[%s8846_s5 + $0x8] sm:$0xff] }
 0x2c4   : > { %v3188_v36 = vsel %vm363_vm0, %v8151_v47, %v5515_v8  ;;  %v3092_v45 = vsel %vm363_vm0, %v8054_v41, %v5516_v54 }
 0x2c5   : > { %v5524_v24 = vpop.permute.xlu1 %5523  ;;  %v3251_v23 = vsel %vm1415_vm5, %v3219_v19, %v5510_v26  ;;  %v3155_v38 = vsel %vm1415_vm5, %v3123_v33, %v5511_v59  ;;  %v3881_v26 = vld [vmem:[%s8846_s5] sm:$0xff] }
 0x2c6   : > { %v5519_v14 = vpop.permute.xlu0 %5518  ;;  %3574 = vmatprep.mubr.f32.mxu1 %v3251_v23  ;;  %v5526_v63 = vunpack.i.h.bf16 %v5524_v24  ;;  %v5525_v4 = vunpack.i.l.bf16 %v5524_v24  ;;  %v4451_v23 = vpop.f32.mrf.mxu0 }
 0x2c7   : > { %v5521_v43 = vunpack.i.h.bf16 %v5519_v14  ;;  %v5520_v16 = vunpack.i.l.bf16 %v5519_v14  ;;  %3575 = vmatmul.mubr.f32.gmra.mxu1 %v3155_v38 }
 0x2c9   : > { %v3220_v17 = vsel %vm1382_vm4, %v3188_v36, %v5520_v16  ;;  %v3124_v1 = vsel %vm1382_vm4, %v3092_v45, %v5521_v43  ;;  %v3651_v43 = vpop.f32.mrf.mxu0 }
 0x2ca   : > { %v3252_v32 = vsel %vm1415_vm5, %v3220_v17, %v5525_v4  ;;  %v3156_v62 = vsel %vm1415_vm5, %v3124_v1, %v5526_v63 }
 0x2cb   : > { %3579 = vmatprep.mubr.f32.mxu1 %v3252_v32  ;;  %v4454_v63 = vpop.f32.mrf.mxu0 }
 0x2cc   : > { %3580 = vmatmul.mubr.f32.gmra.mxu1 %v3156_v62 }
 0x2cd   : > { %4479 = vmatprep.mubr.msk.f32.mxu1 %vm363_vm0, %v7874_v34  ;;  %v3661_v4 = vpop.f32.mrf.mxu0 }
 0x2cf   : > { %v4457_v45 = vpop.f32.mrf.mxu0 }
 0x2d0   : > { %4480 = vmatmul.mubr.msk.f32.vlgmr.msra.gmra.mxu1 %vm363_vm0, %v7868_v6  ;;  %v3056_v6 = vrot.slane %v8100_v58, 2 }
 0x2d1   : > { %4482 = vmatprep.mubr.msk.f32.mxu1 %vm363_vm0, %v7964_v12  ;;  %v3057_v12 = vrot.slane %v8134_v39, 2  ;;  %4498 = vmatpush3.msra.mxu1 %v3884_v55  ;;  %v3671_v32 = vpop.f32.mrf.mxu0 }
 0x2d2   : > { %4499 = vmatprep.subr.mxu1 %v8970_v0 }
 0x2d3   : > { %4500 = vmatpush3.msra.mxu1 %v3883_v40 }
 0x2d4   : > { %4483 = vmatmul.mubr.msk.f32.gmra.mxu1 %vm363_vm0, %v7954_v22  ;;  %v3059_v22 = vrot.slane %v8147_v61, 2  ;;  %4501 = vmatprep.subr.mxu1 %v8970_v0 }
 0x2d5   : > { %4485 = vmatprep.mubr.msk.f32.mxu1 %vm363_vm0, %v8035_v27  ;;  %v8352_v41 = vpop.f32.mrf.mxu1  ;;  %4502 = vmatpush3.msra.mxu1 %v3882_v30 }
 0x2d6   : > { %v3060_v27 = vsel %vm731_vm2, %v3057_v12, %v3059_v22  ;;  %4503 = vmatprep.subr.mxu1 %v8970_v0 }
 0x2d7   : > { %v3428_v47 = vpop.f32.mrf.mxu1  ;;  %4504 = vmatpush3.msra.mxu1 %v3881_v26 }
 0x2d8   : > { %4486 = vmatmul.mubr.msk.f32.gmra.mxu1 %vm363_vm0, %v8025_v48  ;;  %v3058_v48 = vsel %vm731_vm2, %v3056_v6, %v3057_v12  ;;  %4508 = vmatprep.subr.mxu1 %v8970_v0  ;;  %v4460_v47 = vpop.f32.mrf.mxu0  ;;  %v8438_v6 = vld [vmem:[%s8845_s4] ss:$0 sm:$0xff] }
 0x2d9   : > { %4488 = vmatprep.mubr.msk.f32.mxu1 %vm363_vm0, %v8096_v46  ;;  %v8358_v34 = vpop.f32.mrf.mxu1  ;;  %v3427_v22 = vadd.f32 %v8438_v6, %v8352_v41 }
 0x2da   : > { %v3432_v12 = vadd.f32 %v8438_v6, %v8358_v34 }
 0x2db   : > { %v3433_v52 = vpop.f32.mrf.mxu1 }
 0x2dc   : > { %4489 = vmatmul.mubr.msk.f32.gmra.mxu1 %vm363_vm0, %v8091_v20  ;;  %v3681_v52 = vpop.f32.mrf.mxu0 }
 0x2dd   : > { %4491 = vmatprep.mubr.msk.f32.mxu1 %vm363_vm0, %v8157_v13 }
 0x2e0   : > { %4492 = vmatmul.mubr.msk.f32.gmra.mxu1 %vm363_vm0, %v8168_v29 }
 0x2e1   : > { %4494 = vmatprep.mubr.msk.f32.mxu1 %vm363_vm0, %v3058_v48 }
 0x2e2   : > { %v8372_v46 = vpop.f32.mrf.mxu1 }
 0x2e3   : > { %v3437_v48 = vadd.f32 %v8438_v6, %v8372_v46 }
 0x2e4   : > { %4495 = vmatmul.mubr.msk.f32.gmra.mxu1 %vm363_vm0, %v3060_v27  ;;  %v3438_v58 = vpop.f32.mrf.mxu1 }
 0x2e5   : > { %4505 = vmatprep.mubr.msk.f32.mxu1 %vm5662_vm6, %v8970_v0  ;;  %v4463_v58 = vpop.f32.mrf.mxu0 }
 0x2e6   : > { %v8375_v20 = vpop.f32.mrf.mxu1 }
 0x2e8   : > { %v3443_v39 = vpop.f32.mrf.mxu1 }
 0x2e9   : > { %v8448_v39 = vadd.f32 %v4451_v23, %v3432_v12 }
 0x2eb   : > { %v3811_v46 = vsel %vm363_vm0, %v8448_v39, 0.0 }
 0x2ee   : > { %v8377_v13 = vpop.f32.mrf.mxu1 }
 0x2ef   : > { %v3447_v34 = vadd.f32 %v8438_v6, %v8377_v13 }
 0x2f0   : > { %v3448_v61 = vpop.f32.mrf.mxu1 }
 0x2f1   : > { %v3442_v61 = vadd.f32 %v8438_v6, %v8375_v20  ;;  %v8470_v13 = vadd.f32 %v3671_v32, %v3447_v34 }
 0x2f2   : > { %v8379_v28 = vpop.f32.mrf.mxu1 }
 0x2f4   : > { %v3453_v9 = vpop.f32.mrf.mxu1 }
 0x2fa   : > { %v8381_v31 = vpop.f32.mrf.mxu1 }
 0x2fb   : > { %v3457_v55 = vadd.f32 %v8438_v6, %v8381_v31 }
 0x2fc   : > { %v3458_v29 = vpop.f32.mrf.mxu1 }
 0x2fd   : > { %v8452_v29 = vadd.f32 %v3651_v43, %v3427_v22  ;;  %v8482_v26 = vadd.f32 %v3681_v52, %v3457_v55 }
 0x2fe   : > { %v8383_v60 = vpop.f32.mrf.mxu1 }
 0x300   : > { %v3463_v10 = vpop.f32.mrf.mxu1 }
 0x301   : > { %v8454_v10 = vadd.f32 %v3661_v4, %v3437_v48  ;;  %v3821_v4 = vsel %vm363_vm0, %v8482_v26, 0.0 }
 0x306   : > { %v8385_v2 = vpop.f32.mrf.mxu1 }
 0x308   : > { %v3468_v11 = vpop.f32.mrf.mxu1 }
 0x309   : > { %v3691_v11 = vpop.f32.mrf.mxu0 }
 0x30a   : > { %v8387_v18 = vpop.f32.mrf.mxu1 }
 0x30c   : > { %v3473_v50 = vpop.f32.mrf.mxu1 }
 0x30d   : > { %v8462_v50 = vadd.f32 %v4454_v63, %v3442_v61 }
 0x312   : > { %v8389_v7 = vpop.f32.mrf.mxu1 }
 0x314   : > { %v3478_v56 = vpop.f32.mrf.mxu1 }
 0x315   : > { %v3452_v56 = vadd.f32 %v8438_v6, %v8379_v28  ;;  %v3462_v28 = vadd.f32 %v8438_v6, %v8383_v60  ;;  %v3472_v60 = vadd.f32 %v8438_v6, %v8387_v18 }
 0x316   : > { %v8391_v35 = vpop.f32.mrf.mxu1 }
 0x317   : > { %v8490_v43 = vadd.f32 %v4460_v47, %v3462_v28  ;;  %v8504_v12 = vadd.f32 %v4463_v58, %v3472_v60  ;;  %v3482_v18 = vadd.f32 %v8438_v6, %v8391_v35 }
 0x318   : > { %v3483_v57 = vpop.f32.mrf.mxu1 }
 0x319   : > { %v4466_v57 = vpop.f32.mrf.mxu0  ;;  %v3823_v47 = vsel %vm363_vm0, %v8490_v43, 0.0 }
 0x31a   : > { %v8516_v58 = vadd.f32 %v4466_v57, %v3482_v18 }
 0x31b   : > { %v3701_v40 = vpop.f32.mrf.mxu0 }
 0x31c   : > { %v3831_v57 = vsel %vm363_vm0, %v8516_v58, 0.0 }
 0x31e   : > { %v8393_v3 = vpop.f32.mrf.mxu1 }
 0x320   : > { %v3488_v44 = vpop.f32.mrf.mxu1 }
 0x321   : > { %v3810_v44 = vsel %vm363_vm0, %v8452_v29, 0.0 }
 0x322   : > { %v8395_v15 = vpop.f32.mrf.mxu1 }
 0x323   : > { %v3492_v35 = vadd.f32 %v8438_v6, %v8395_v15 }
 0x324   : > { %v3493_v53 = vpop.f32.mrf.mxu1 }
 0x325   : > { %v3813_v53 = vsel %vm363_vm0, %v8454_v10, 0.0 }
 0x32a   : > { %v8401_v49 = vpop.f32.mrf.mxu1 }
 0x32c   : > { %v3498_v42 = vpop.f32.mrf.mxu1 }
 0x32d   : > { %v3812_v42 = vadd.f32 %v3811_v46, %v3810_v44 }
 0x32e   : > { %v8403_v51 = vpop.f32.mrf.mxu1 }
 0x32f   : > { %v3814_v30 = vadd.f32 %v3813_v53, %v3812_v42  ;;  %v3497_v53 = vadd.f32 %v8438_v6, %v8401_v49  ;;  %v3502_v15 = vadd.f32 %v8438_v6, %v8403_v51 }
 0x330   : > { %v3503_v25 = vpop.f32.mrf.mxu1 }
 0x331   : > { %v3815_v25 = vsel %vm363_vm0, %v8462_v50, 0.0 }
 0x332   : > { %v3816_v23 = vadd.f32 %v3815_v25, %v3814_v30 }
 0x336   : > { %v8405_v37 = vpop.f32.mrf.mxu1 }
 0x337   : > { %v3507_v49 = vadd.f32 %v8438_v6, %v8405_v37 }
 0x338   : > { %v3508_v21 = vpop.f32.mrf.mxu1 }
 0x339   : > { %v8476_v21 = vadd.f32 %v4457_v45, %v3452_v56 }
 0x33a   : > { %v8407_v5 = vpop.f32.mrf.mxu1 }
 0x33b   : > { %v3512_v51 = vadd.f32 %v8438_v6, %v8407_v5 }
 0x33c   : > { %v3513_v59 = vpop.f32.mrf.mxu1 }
 0x33d   : > { %v3817_v59 = vsel %vm363_vm0, %v8470_v13, 0.0 }
 0x33e   : > { %v3818_v63 = vadd.f32 %v3817_v59, %v3816_v23 }
 0x342   : > { %v8423_v54 = vpop.f32.mrf.mxu1 }
 0x343   : > { %v3517_v37 = vadd.f32 %v8438_v6, %v8423_v54 }
 0x344   : > { %v3518_v8 = vpop.f32.mrf.mxu1 }
 0x345   : > { %v3467_v8 = vadd.f32 %v8438_v6, %v8385_v2  ;;  %v3477_v2 = vadd.f32 %v8438_v6, %v8389_v7  ;;  %v3487_v7 = vadd.f32 %v8438_v6, %v8393_v3 }
 0x346   : > { %v8425_v19 = vpop.f32.mrf.mxu1 }
 0x347   : > { %v8496_v45 = vadd.f32 %v3691_v11, %v3467_v8  ;;  %v3827_v11 = vsel %vm363_vm0, %v8504_v12, 0.0  ;;  %v3522_v5 = vadd.f32 %v8438_v6, %v8425_v19 }
 0x348   : > { %v3523_v33 = vpop.f32.mrf.mxu1 }
 0x349   : > { %v4469_v33 = vpop.f32.mrf.mxu0  ;;  %v3825_v61 = vsel %vm363_vm0, %v8496_v45, 0.0 }
 0x34a   : > { %v8530_v25 = vadd.f32 %v4469_v33, %v3492_v35 }
 0x34b   : > { %v3711_v32 = vpop.f32.mrf.mxu0 }
 0x34c   : > { %v8522_v44 = vadd.f32 %v3711_v32, %v3487_v7  ;;  %v3835_v33 = vsel %vm363_vm0, %v8530_v25, 0.0 }
 0x34d   : > { %v4472_v22 = vpop.f32.mrf.mxu0 }
 0x34e   : > { %v3833_v30 = vsel %vm363_vm0, %v8522_v44, 0.0  ;;  %v8544_v60 = vadd.f32 %v4472_v22, %v3502_v15 }
 0x34f   : > { %v8427_v24 = vpop.f32.mrf.mxu1  ;;  %v3721_v46 = vpop.f32.mrf.mxu0 }
 0x350   : > { %v8536_v59 = vadd.f32 %v3721_v46, %v3497_v53  ;;  %v3839_v18 = vsel %vm363_vm0, %v8544_v60, 0.0 }
 0x351   : > { %v3528_v38 = vpop.f32.mrf.mxu1  ;;  %v4475_v55 = vpop.f32.mrf.mxu0 }
 0x352   : > { %v3819_v38 = vsel %vm363_vm0, %v8476_v21, 0.0 }
 0x353   : > { %v8429_v14 = vpop.f32.mrf.mxu1  ;;  %v3731_v23 = vpop.f32.mrf.mxu0 }
 0x354   : > { %v8550_v32 = vadd.f32 %v3731_v23, %v3507_v49  ;;  %v3532_v15 = vadd.f32 %v8438_v6, %v8429_v14 }
 0x355   : > { %v3533_v16 = vpop.f32.mrf.mxu1 }
 0x356   : > { %v3841_v7 = vsel %vm363_vm0, %v8550_v32, 0.0 }
 0x35b   : > { %v8431_v36 = vpop.f32.mrf.mxu1 }
 0x35d   : > { %v3538_v17 = vpop.f32.mrf.mxu1 }
 0x35f   : > { %v8433_v1 = vpop.f32.mrf.mxu1 }
 0x361   : > { %v3543_v62 = vpop.f32.mrf.mxu1 }
 0x362   : > { %v3820_v62 = vadd.f32 %v3819_v38, %v3818_v63  ;;  %v4478_v63 = vpop.f32.mrf.mxu0 }
 0x363   : > { %v8568_v46 = vadd.f32 %v4478_v63, %v3522_v5 }
 0x364   : > { %v3822_v48 = vadd.f32 %v3821_v4, %v3820_v62 }
 0x366   : > { %v3824_v34 = vadd.f32 %v3823_v47, %v3822_v48  ;;  %v3741_v48 = vpop.f32.mrf.mxu0 }
 0x367   : > { %v8446_v27 = vpop.f32.mrf.mxu1 }
 0x368   : > { %v3826_v56 = vadd.f32 %v3825_v61, %v3824_v34  ;;  %v8564_v34 = vadd.f32 %v3741_v48, %v3517_v37 }
 0x369   : > { %v3548_v9 = vpop.f32.mrf.mxu1 }
 0x36a   : > { %v8510_v9 = vadd.f32 %v3701_v40, %v3477_v2  ;;  %v3828_v42 = vadd.f32 %v3827_v11, %v3826_v56  ;;  %v3837_v2 = vsel %vm363_vm0, %v8536_v59, 0.0  ;;  %v3845_v19 = vsel %vm363_vm0, %v8564_v34, 0.0 }
 0x36b   : > { %v8458_v41 = vpop.f32.mrf.mxu1 }
 0x36d   : > { %v3553_v20 = vpop.f32.mrf.mxu1 }
 0x36e   : > { %v3829_v20 = vsel %vm363_vm0, %v8510_v9, 0.0 }
 0x36f   : > { %v3830_v40 = vadd.f32 %v3829_v20, %v3828_v42  ;;  %v3847_v42 = vsel %vm363_vm0, %v8568_v46, 0.0 }
 0x371   : > { %v3832_v38 = vadd.f32 %v3831_v57, %v3830_v40  ;;  %v3527_v57 = vadd.f32 %v8438_v6, %v8427_v24 }
 0x373   : > { %v8486_v31 = vpop.f32.mrf.mxu1  ;;  %v3834_v4 = vadd.f32 %v3833_v30, %v3832_v38 }
 0x375   : > { %v3558_v16 = vpop.f32.mrf.mxu1  ;;  %v3836_v47 = vadd.f32 %v3835_v33, %v3834_v4  ;;  %v3537_v33 = vadd.f32 %v8438_v6, %v8431_v36  ;;  %v3547_v36 = vadd.f32 %v8438_v6, %v8446_v27  ;;  %v3557_v27 = vadd.f32 %v8438_v6, %v8486_v31 }
 0x377   : > { %v8500_v17 = vpop.f32.mrf.mxu1  ;;  %v3838_v61 = vadd.f32 %v3837_v2, %v3836_v47 }
 0x379   : > { %v3563_v52 = vpop.f32.mrf.mxu1  ;;  %v3840_v54 = vadd.f32 %v3839_v18, %v3838_v61 }
 0x37a   : > { %v8558_v52 = vadd.f32 %v4475_v55, %v3512_v51  ;;  %v3542_v51 = vadd.f32 %v8438_v6, %v8433_v1  ;;  %v3552_v1 = vadd.f32 %v8438_v6, %v8458_v41  ;;  %v3562_v41 = vadd.f32 %v8438_v6, %v8500_v17 }
 0x37b   : > { %v3842_v56 = vadd.f32 %v3841_v7, %v3840_v54 }
 0x37c   : > { %v3843_v35 = vsel %vm363_vm0, %v8558_v52, 0.0 }
 0x37d   : > { %v3844_v53 = vadd.f32 %v3843_v35, %v3842_v56 }
 0x37f   : > { %v8526_v3 = vpop.f32.mrf.mxu1 }
 0x380   : > { %v3567_v31 = vadd.f32 %v8438_v6, %v8526_v3 }
 0x381   : > { %v3568_v28 = vpop.f32.mrf.mxu1 }
 0x382   : > { %v3846_v28 = vadd.f32 %v3845_v19, %v3844_v53 }
 0x383   : > { %v8540_v8 = vpop.f32.mrf.mxu1 }
 0x384   : > { %v3848_v23 = vadd.f32 %v3847_v42, %v3846_v28  ;;  %v3572_v17 = vadd.f32 %v8438_v6, %v8540_v8 }
 0x385   : > { %v3573_v16 = vpop.f32.mrf.mxu1 }
 0x387   : > { %v8554_v62 = vpop.f32.mrf.mxu1 }
 0x388   : > { %v3577_v3 = vadd.f32 %v8438_v6, %v8554_v62 }
 0x389   : > { %v3578_v22 = vpop.f32.mrf.mxu1 }
 0x38c   : > { %v3581_v11 = vpop.f32.mrf.mxu1 }
 0x38e   : > { %v3583_v20 = vpop.f32.mrf.mxu1 }
 0x390   : > { %v4481_v55 = vpop.f32.mrf.mxu1 }
 0x391   : > { %v8578_v30 = vadd.f32 %v4481_v55, %v3532_v15 }
 0x392   : > { %v3751_v40 = vpop.f32.mrf.mxu1 }
 0x393   : > { %v8580_v49 = vadd.f32 %v3751_v40, %v3527_v57  ;;  %v3851_v14 = vsel %vm363_vm0, %v8578_v30, 0.0 }
 0x394   : > { %v4484_v38 = vpop.f32.mrf.mxu1 }
 0x395   : > { %v3849_v24 = vsel %vm363_vm0, %v8580_v49, 0.0  ;;  %v8590_v4 = vadd.f32 %v4484_v38, %v3542_v51 }
 0x396   : > { %v3850_v16 = vadd.f32 %v3849_v24, %v3848_v23  ;;  %v3761_v63 = vpop.f32.mrf.mxu1 }
 0x397   : > { %v8592_v2 = vadd.f32 %v3761_v63, %v3537_v33  ;;  %v3855_v48 = vsel %vm363_vm0, %v8590_v4, 0.0  ;;  %v3582_v63 = vadd.f32 %v8438_v6, %v3581_v11 }
 0x398   : > { %v3852_v37 = vadd.f32 %v3851_v14, %v3850_v16  ;;  %v4487_v47 = vpop.f32.mrf.mxu1 }
 0x399   : > { %v3853_v18 = vsel %vm363_vm0, %v8592_v2, 0.0  ;;  %v8602_v61 = vadd.f32 %v4487_v47, %v3552_v1 }
 0x39a   : > { %v3854_v5 = vadd.f32 %v3853_v18, %v3852_v37  ;;  %v3771_v22 = vpop.f32.mrf.mxu1 }
 0x39b   : > { %v8604_v7 = vadd.f32 %v3771_v22, %v3547_v36  ;;  %v3859_v53 = vsel %vm363_vm0, %v8602_v61, 0.0 }
 0x39c   : > { %v3856_v54 = vadd.f32 %v3855_v48, %v3854_v5  ;;  %v4490_v35 = vpop.f32.mrf.mxu1 }
 0x39d   : > { %v3857_v56 = vsel %vm363_vm0, %v8604_v7, 0.0  ;;  %v8614_v55 = vadd.f32 %v4490_v35, %v3562_v41 }
 0x39e   : > { %v3858_v20 = vadd.f32 %v3857_v56, %v3856_v54  ;;  %v3781_v19 = vpop.f32.mrf.mxu1 }
 0x39f   : > { %v8616_v42 = vadd.f32 %v3781_v19, %v3557_v27  ;;  %v3863_v38 = vsel %vm363_vm0, %v8614_v55, 0.0  ;;  %v3885_v19 = vld [vmem:[%s8847_s6] sm:$0x1] }
 0x3a0   : > { %v3860_v57 = vadd.f32 %v3859_v53, %v3858_v20  ;;  %v4493_v15 = vpop.f32.mrf.mxu1  ;;  %v3960_v20 = vld [vmem:[%s8848_s7] sm:$0x3] }
 0x3a1   : > { %v3861_v28 = vsel %vm363_vm0, %v8616_v42, 0.0  ;;  %v8626_v33 = vadd.f32 %v4493_v15, %v3572_v17 }
 0x3a2   : > { %v3862_v40 = vadd.f32 %v3861_v28, %v3860_v57  ;;  %v3791_v23 = vpop.f32.mrf.mxu1 }
 0x3a3   : > { %v8628_v51 = vadd.f32 %v3791_v23, %v3567_v31  ;;  %v3867_v47 = vsel %vm363_vm0, %v8626_v33, 0.0 }
 0x3a4   : > { %v3864_v24 = vadd.f32 %v3863_v38, %v3862_v40  ;;  %v4496_v16 = vpop.f32.mrf.mxu1 }
 0x3a5   : > { %v3865_v8 = vsel %vm363_vm0, %v8628_v51, 0.0  ;;  %v8637_v36 = vadd.f32 %v4496_v16, %v3582_v63  ;;  %v4046_v16 = vlaneseq }
 0x3a6   : > { %v3866_v14 = vadd.f32 %v3865_v8, %v3864_v24  ;;  %v3801_v37 = vpop.f32.mrf.mxu1 }
 0x3a7   : > { %v8639_v1 = vadd.f32 %v3801_v37, %v3577_v3  ;;  %v3871_v6 = vsel %vm363_vm0, %v8637_v36, 0.0  ;;  %v4047_v3 = vshrl.u32 %v4046_v16, 7 }
 0x3a8   : > { %v3868_v18 = vadd.f32 %v3867_v47, %v3866_v14 }
 0x3a9   : > { %v3869_v5 = vsel %vm363_vm0, %v8639_v1, 0.0  ;;  %v4048_v63 = vsub.s32 0, %v4047_v3  ;;  %v8985_v3 = vld [vmem:[#allocation20_spill] sm:$0xff] }
 0x3aa   : > { %v3870_v22 = vadd.f32 %v3869_v5, %v3868_v18 }
 0x3ac   : > { %v3872_v62 = vadd.f32 %v3871_v6, %v3870_v22 }
 0x3ae   : > { %v3873_v11 = vrot.slane %v3872_v62, 4 }
 0x3b0   : > { %v3874_v48 = vadd.f32 %v3873_v11, %v3872_v62 }
 0x3b2   : > { %v3875_v54 = vrot.slane %v3874_v48, 2 }
 0x3b4   : > { %v3876_v35 = vadd.f32 %v3875_v54, %v3874_v48 }
 0x3b6   : > { %v3877_v27 = vrot.slane %v3876_v35, 1 }
 0x3b8   : > { %v3878_v41 = vadd.f32 %v3877_v27, %v3876_v35  ;;  %v8971_v35 = vld [vmem:[#allocation8_spill] sm:$0xff]  ;;  %v8972_v27 = vld [vmem:[#allocation9_spill] sm:$0xff] }
 0x3ba   : > { %v3880_v56 = vmul.f32 0.00390625, %v3878_v41  ;;  %v8973_v41 = vld [vmem:[#allocation6_spill] sm:$0xff] }
 0x3bc   : > { %4506 = vmatmul.mubr.msk.f32.vlgmr.msra.gmra.mxu1 %vm363_vm0, %v3880_v56  ;;  %v8974_v56 = vld [vmem:[#allocation7_spill] sm:$0xff] }
 0x3bd   : > { %4510 = vmatprep.mubr.msk.f32.mxu1 %vm5662_vm6, %v8970_v0  ;;  %4509 = vmatpush3.msk.msra.mxu1 %vm3966_vm7, %v3960_v20  ;;  %v3961_v0 = vld [vmem:[%s8849_s8] sm:$0x1]  ;;  %v8975_v20 = vld [vmem:[#allocation10_spill] sm:$0xff] }
 0x47c   : > { %v3955_v53 = vpop.f32.mrf.mxu1 }
 0x47d   : > { %v3956_v57 = vadd.f32 %v3955_v53, %v3885_v19  ;;  %v8976_v19 = vld [vmem:[#allocation11_spill] sm:$0xff]  ;;  %v8977_v53 = vld [vmem:[#allocation12_spill] sm:$0xff] }
 0x47e   : > { %v4507_v15 = vpop.f32.mrf.mxu1 }
 0x47f   : > { %v3959_v31 = vmax.f32 %v3956_v57, 0.0  ;;  %v8978_v57 = vld [vmem:[#allocation13_spill] sm:$0xff]  ;;  %v8979_v15 = vld [vmem:[#allocation14_spill] sm:$0xff] }
 0x481   : > { %4511 = vmatmul.mubr.msk.f32.vlgmr.msra.gmra.mxu1 %vm3962_vm8, %v3959_v31  ;;  %v8980_v31 = vld [vmem:[#allocation15_spill] sm:$0xff] }
 0x541   : > { %v4036_v17 = vpop.f32.mrf.mxu1 }
 0x542   : > { %v4037_v28 = vadd.f32 %v4036_v17, %v3961_v0  ;;  %v8981_v0 = vld [vmem:[#allocation16_spill] sm:$0xff] }
 0x543   : > { %v4512_v40 = vpop.f32.mrf.mxu1 }
 0x544   : > { %v4298_v23 = vmul.f32 -1.442695, %v4037_v28  ;;  %v8982_v28 = vld [vmem:[#allocation17_spill] sm:$0xff] }
 0x546   : > { %5527 = vpow2.f32 %v4298_v23  ;;  %v8983_v23 = vld [vmem:[#allocation18_spill] sm:$0xff] }
 0x553   : > { %v5528_v38 = vpop.eup %5527 }
 0x554   : > { %v4043_v24 = vadd.f32 1.0, %v5528_v38 }
 0x556   : > { %5529 = vrcp.f32 %v4043_v24  ;;  %v8984_v24 = vld [vmem:[#allocation19_spill] sm:$0xff] }
 0x563   : > { %v5530_v8 = vpop.eup %5529 }
 0x564   : > { %v4049_v14 = vrot.slane %v5530_v8, %v4048_v63  ;;  %v8986_v8 = vld [vmem:[#allocation21_spill] sm:$0xff] }
 0x566   : > { %v4050_v37 = vmul.f32 %v4049_v14, %v8452_v29  ;;  %v4051_v47 = vmul.f32 %v4049_v14, %v8448_v39  ;;  %v4052_v18 = vmul.f32 %v4049_v14, %v8454_v10  ;;  %v4053_v5 = vmul.f32 %v4049_v14, %v8462_v50 }
 0x567   : > { %v4054_v22 = vmul.f32 %v4049_v14, %v8470_v13  ;;  %v4055_v6 = vmul.f32 %v4049_v14, %v8476_v21  ;;  %v4056_v62 = vmul.f32 %v4049_v14, %v8482_v26  ;;  %v4057_v11 = vmul.f32 %v4049_v14, %v8490_v43 }
 0x568   : > { %v4058_v48 = vmul.f32 %v4049_v14, %v8496_v45  ;;  %v4059_v29 = vmul.f32 %v4049_v14, %v8504_v12  ;;  %v4060_v39 = vmul.f32 %v4049_v14, %v8510_v9  ;;  %v4061_v54 = vmul.f32 %v4049_v14, %v8516_v58 }
 0x569   : > { %v4062_v10 = vmul.f32 %v4049_v14, %v8522_v44  ;;  %v4063_v50 = vmul.f32 %v4049_v14, %v8530_v25  ;;  %v4064_v13 = vmul.f32 %v4049_v14, %v8536_v59  ;;  %v4065_v21 = vmul.f32 %v4049_v14, %v8544_v60 }
 0x56a   : > { %v4066_v26 = vmul.f32 %v4049_v14, %v8550_v32  ;;  %v4067_v43 = vmul.f32 %v4049_v14, %v8558_v52  ;;  %v4068_v45 = vmul.f32 %v4049_v14, %v8564_v34  ;;  %v4069_v12 = vmul.f32 %v4049_v14, %v8568_v46 }
 0x56b   : > { %v4070_v9 = vmul.f32 %v4049_v14, %v8580_v49  ;;  %v4071_v58 = vmul.f32 %v4049_v14, %v8578_v30  ;;  %v4072_v44 = vmul.f32 %v4049_v14, %v8592_v2  ;;  %v4073_v25 = vmul.f32 %v4049_v14, %v8590_v4 }
 0x56c   : > { %v4074_v59 = vmul.f32 %v4049_v14, %v8604_v7  ;;  %v4075_v60 = vmul.f32 %v4049_v14, %v8602_v61  ;;  %v4076_v32 = vmul.f32 %v4049_v14, %v8616_v42  ;;  %v4077_v52 = vmul.f32 %v4049_v14, %v8614_v55 }
 0x56d   : > { %v4078_v34 = vmul.f32 %v4049_v14, %v8628_v51  ;;  %v4079_v46 = vmul.f32 %v4049_v14, %v8626_v33  ;;  %v4080_v49 = vmul.f32 %v4049_v14, %v8639_v1  ;;  %v4081_v30 = vmul.f32 %v4049_v14, %v8637_v36 }
 0x56e   : > { %v4082_v2 = vadd.f32 %v4050_v37, %v8971_v35  ;;  %v4083_v4 = vadd.f32 %v4051_v47, %v8972_v27  ;;  %v4084_v7 = vadd.f32 %v4052_v18, %v8973_v41  ;;  %v4085_v61 = vadd.f32 %v4053_v5, %v8974_v56  ;;  %v8987_v37 = vld [vmem:[#allocation22_spill] sm:$0xff]  ;;  %v8988_v18 = vld [vmem:[#allocation23_spill] sm:$0xff] }
 0x56f   : > { %v4086_v42 = vadd.f32 %v4054_v22, %v8975_v20  ;;  %v4087_v55 = vadd.f32 %v4055_v6, %v8976_v19  ;;  %v4088_v51 = vadd.f32 %v4056_v62, %v8977_v53  ;;  %v4089_v33 = vadd.f32 %v4057_v11, %v8978_v57  ;;  %v8989_v22 = vld [vmem:[#allocation24_spill] sm:$0xff]  ;;  %v8990_v62 = vld [vmem:[#allocation25_spill] sm:$0xff]  ;;  %v9001_v35 = vld [vmem:[#allocation38_spill] sm:$0xff] }
 0x570   : > { %v4090_v1 = vadd.f32 %v4058_v48, %v8979_v15  ;;  %v4091_v36 = vadd.f32 %v4059_v29, %v8980_v31  ;;  %v4092_v17 = vadd.f32 %v4060_v39, %v8981_v0  ;;  %v4093_v40 = vadd.f32 %v4061_v54, %v8982_v28  ;;  %4114 = vst.msk [vmem:[%s8704_s23] sm:$0xff] %vm363_vm0, %v4082_v2  ;;  %v8991_v48 = vld [vmem:[#allocation26_spill] sm:$0xff]  ;;  %v8992_v39 = vld [vmem:[#allocation27_spill] sm:$0xff] }
 0x571   : > { %4115 = vst.msk [vmem:[%s8704_s23 + $0x8] sm:$0xff] %vm363_vm0, %v4083_v4  ;;  %4116 = vst.msk [vmem:[%s8704_s23 + $0x10] sm:$0xff] %vm363_vm0, %v4084_v7  ;;  %v4094_v38 = vadd.f32 %v4062_v10, %v8983_v23  ;;  %v4095_v16 = vadd.f32 %v4063_v50, %v8984_v24  ;;  %v4096_v63 = vadd.f32 %v4064_v13, %v8985_v3  ;;  %v8993_v10 = vld [vmem:[#allocation28_spill] sm:$0xff]  ;;  %v8994_v13 = vld [vmem:[#allocation29_spill] sm:$0xff] }
 0x572   : > { %4117 = vst.msk [vmem:[%s8704_s23 + $0x18] sm:$0xff] %vm363_vm0, %v4085_v61  ;;  %v4097_v14 = vadd.f32 %v4065_v21, %v8986_v8  ;;  %4118 = vst.msk [vmem:[%s8704_s23 + $0x20] sm:$0xff] %vm363_vm0, %v4086_v42  ;;  %v4098_v47 = vadd.f32 %v4066_v26, %v8987_v37  ;;  %v4099_v5 = vadd.f32 %v4067_v43, %v8988_v18  ;;  %v8995_v26 = vld [vmem:[#allocation30_spill] sm:$0xff]  ;;  %v9002_v27 = vld [vmem:[#allocation39_spill] sm:$0xff] }
 0x573   : > { %4119 = vst.msk [vmem:[%s8704_s23 + $0x28] sm:$0xff] %vm363_vm0, %v4087_v55  ;;  %4120 = vst.msk [vmem:[%s8704_s23 + $0x30] sm:$0xff] %vm363_vm0, %v4088_v51  ;;  %v4100_v6 = vadd.f32 %v4068_v45, %v8989_v22  ;;  %v4101_v11 = vadd.f32 %v4069_v12, %v8990_v62  ;;  %v4102_v29 = vadd.f32 %v4070_v9, %v8991_v48  ;;  %v8996_v45 = vld [vmem:[#allocation31_spill] sm:$0xff]  ;;  %v8997_v9 = vld [vmem:[#allocation32_spill] sm:$0xff] }
 0x574   : > { %4121 = vst.msk [vmem:[%s8704_s23 + $0x38] sm:$0xff] %vm363_vm0, %v4089_v33  ;;  %4122 = vst.msk [vmem:[%s8704_s23 + $0x40] sm:$0xff] %vm363_vm0, %v4090_v1  ;;  %v4103_v54 = vadd.f32 %v4071_v58, %v8992_v39  ;;  %v4104_v50 = vadd.f32 %v4072_v44, %v8993_v10  ;;  %v4105_v21 = vadd.f32 %v4073_v25, %v8994_v13  ;;  %v8998_v44 = vld [vmem:[#allocation33_spill] sm:$0xff] }
 0x575   : > { %4123 = vst.msk [vmem:[%s8704_s23 + $0x48] sm:$0xff] %vm363_vm0, %v4091_v36  ;;  %4124 = vst.msk [vmem:[%s8704_s23 + $0x50] sm:$0xff] %vm363_vm0, %v4092_v17  ;;  %v4106_v43 = vadd.f32 %v4074_v59, %v8995_v26  ;;  %v4107_v12 = vadd.f32 %v4075_v60, %v8996_v45  ;;  %v4108_v58 = vadd.f32 %v4076_v32, %v8997_v9  ;;  %v8999_v59 = vld [vmem:[#allocation34_spill] sm:$0xff]  ;;  %v9000_v32 = vld [vmem:[#allocation35_spill] sm:$0xff] }
 0x576   : > { %4125 = vst.msk [vmem:[%s8704_s23 + $0x58] sm:$0xff] %vm363_vm0, %v4093_v40  ;;  %4126 = vst.msk [vmem:[%s8704_s23 + $0x60] sm:$0xff] %vm363_vm0, %v4094_v38  ;;  %v4109_v25 = vadd.f32 %v4077_v52, %v8998_v44  ;;  %v4110_v60 = vadd.f32 %v4078_v34, %v8999_v59  ;;  %v4111_v52 = vadd.f32 %v4079_v46, %v9000_v32 }
 0x577   : > { %4127 = vst.msk [vmem:[%s8704_s23 + $0x68] sm:$0xff] %vm363_vm0, %v4095_v16  ;;  %4128 = vst.msk [vmem:[%s8704_s23 + $0x70] sm:$0xff] %vm363_vm0, %v4096_v63  ;;  %v4112_v2 = vadd.f32 %v4080_v49, %v9001_v35  ;;  %v4113_v4 = vadd.f32 %v4081_v30, %v9002_v27 }
 0x578   : > { %4129 = vst.msk [vmem:[%s8704_s23 + $0x78] sm:$0xff] %vm363_vm0, %v4097_v14  ;;  %4130 = vst.msk [vmem:[%s8704_s23 + $0x80] sm:$0xff] %vm363_vm0, %v4098_v47 }
 0x579   : > { %4131 = vst.msk [vmem:[%s8704_s23 + $0x88] sm:$0xff] %vm363_vm0, %v4099_v5  ;;  %4132 = vst.msk [vmem:[%s8704_s23 + $0x90] sm:$0xff] %vm363_vm0, %v4100_v6 }
 0x57a   : > { %4133 = vst.msk [vmem:[%s8704_s23 + $0x98] sm:$0xff] %vm363_vm0, %v4101_v11  ;;  %4134 = vst.msk [vmem:[%s8704_s23 + $0xa0] sm:$0xff] %vm363_vm0, %v4102_v29 }
 0x57b   : > { %4135 = vst.msk [vmem:[%s8704_s23 + $0xa8] sm:$0xff] %vm363_vm0, %v4103_v54  ;;  %4136 = vst.msk [vmem:[%s8704_s23 + $0xb0] sm:$0xff] %vm363_vm0, %v4104_v50 }
 0x57c   : > { %4137 = vst.msk [vmem:[%s8704_s23 + $0xb8] sm:$0xff] %vm363_vm0, %v4105_v21  ;;  %4138 = vst.msk [vmem:[%s8704_s23 + $0xc0] sm:$0xff] %vm363_vm0, %v4106_v43 }
 0x57d   : > { %4139 = vst.msk [vmem:[%s8704_s23 + $0xc8] sm:$0xff] %vm363_vm0, %v4107_v12  ;;  %4140 = vst.msk [vmem:[%s8704_s23 + $0xd0] sm:$0xff] %vm363_vm0, %v4108_v58 }
 0x57e   : > { %4141 = vst.msk [vmem:[%s8704_s23 + $0xd8] sm:$0xff] %vm363_vm0, %v4109_v25  ;;  %4142 = vst.msk [vmem:[%s8704_s23 + $0xe0] sm:$0xff] %vm363_vm0, %v4110_v60 }
 0x57f   : > { %4143 = vst.msk [vmem:[%s8704_s23 + $0xe8] sm:$0xff] %vm363_vm0, %v4111_v52  ;;  %4144 = vst.msk [vmem:[%s8704_s23 + $0xf0] sm:$0xff] %vm363_vm0, %v4112_v2 }
 0x580   : > { %4145 = vst.msk [vmem:[%s8704_s23 + $0xf8] sm:$0xff] %vm363_vm0, %v4113_v4 }
 0x581   : > { %5609 = shalt.err (!%p5606_p3)
}
 0x582   : > { %s5610_s16 = scalar_lea.hbm %s8767_s28, 4096  ;;  %s5614_s24 = scalar_lea.hbm %s8850_s9, 8192 }
 0x583   : > { %p5611_p4 = scmp.ne.s32.totalorder %s8767_s28, %s5610_s16  ;;  %p5615_p9 = scmp.lt.s32.totalorder %s8767_s28, %s8850_s9 }
 0x584   : > { %p5616_p10 = scmp.lt.s32.totalorder %s5614_s24, %s5610_s16 }
 0x585   : > { %p5612_p7 = pnand %p5611_p4, %p5754_p5 }
 0x586   : > { %p5617_p11 = por %p5616_p10, %p5615_p9 }
 0x587   : > { %p5613_p8 = pneg %p5612_p7 }
 0x589   : > { %p5618_p12 = pnand %p5617_p11, %p5613_p8 }
 0x58b   : > { %5621 = shalt.err (!%p5618_p12)
}
 0x58c   : > { %s5664_s21 = smov 128   ;;  %s5665_s26 = smov 8  }
 0x58d   : > { %4521 = dma.vmem_to_hbm [thread:$0]  (%p5754_p5), %s8769_s25, 4096, %s8767_s28, %s8801_s14, %s5664_s21, %s5664_s21, %s5665_s26  }
 0x58e PF: > { %p4527_p13 = scmp.ge.s32.totalorder %s5656_s12, 2  ;;  %s4175_s29 = sand.u32 1, %s5644_s30  }
 0x58f   : > { %s4176_s17 = scalar_lea.sflag [#allocation4], %s4175_s29 }
 0x590   : > { %p4524_p0 = pnand %p4527_p13, %p5758_p6 }
 0x592   : > { %p4525_p1 = pneg %p4524_p0 }
 0x594   : > { %5639 = dma.done.wait (%p4525_p1), %s4176_s17, 4096  }
 0x595   : > { %5641 = vsyncadd (%p4525_p1), %s4176_s17, 4294963200  ;;  %p19_p2 = scmp.ge.s32.totalorder %s5741_s15, 4   ;;  %s9003_s30 = smov %s5648_s10 }
 0x596   : > { %s9004_s10 = smov %s5652_s11  ;;  %s9005_s11 = smov %s5752_s18 }
 0x597   : > { %s9006_s12 = smov %s5741_s15  ;;  %21 = sbr.rel (!%p19_p2) target bundleno = 3 (0x3), region = 92 }
 0x59c   :  { %4181 = vsyncpa [#allocation4], 1 }
 0x59d   :  { %4183 = vsyncpa [#allocation4 + $0x1], 1 }

</bundles_post_ra>
